<compile_context>
chip_gen: v7x
topology: tpu7x:2x2x1
jax: 0.10.0
libtpu: 0.0.40
codegen_flags: <defaults>
</compile_context>

<pallas_src>
import jax
import jax.numpy as jnp
from jax.experimental import pallas as pl
from jax.experimental.pallas import tpu as pltpu

# ---- config (small but MXU-filling shapes) -------------------------------------------
B = 256                    # batch
IMG_C, IMG_H, IMG_W = 3, 16, 16
PIX = IMG_C * IMG_H * IMG_W            # 768 flattened image lanes
N_LM = 4                                # number of landmarks
LM_DIM = N_LM * IMG_C                   # 12 landmark-pixel features (stand-in)
FEAT_DIM = 64              # stand-in for base_network.output_num()
BOTTLENECK = 128           # bottleneck_dim (1024 in the real model)
WIDTH = 128                # width          (1024 in the real model)
CLASS_NUM = 31             # class_num
CPAD = 128                 # class dim padded to lane-dense 128
BN_EPS = 1e-5
NEG_BIG = -1e30            # bias for padded class lanes (exp -> 0 in softmax)

# merged-output lane layout: [ feat | logits | softmax | adv ]
OFF_FEAT = 0
OFF_LOGITS = BOTTLENECK
OFF_SOFTMAX = BOTTLENECK + CPAD
OFF_ADV = BOTTLENECK + 2 * CPAD
OUT_LANES = BOTTLENECK + 3 * CPAD      # 512

# ---- generation-dependent knobs (detection failure -> safe defaults) -------------------
try:
    _kind = jax.devices()[0].device_kind.lower()
except Exception:  # pragma: no cover - defensive; default backend assumed TPU
    _kind = ""
IS_V7X = ("v7" in _kind) or ("7x" in _kind)
IS_V6E = ("v6" in _kind)
# v7x: two TensorCores -> two parallel 128-row tiles; v5e/v6e: single TC -> one grid step
TB = 128 if IS_V7X else B
# v5e (128x128 MXU): block-diagonal stage-2 wastes half the vmatmul pushes -> split it
SPLIT_STAGE2 = not (IS_V6E or IS_V7X)


# ---- Pallas kernel: fully fused MDD head ----------------------------------------------
def mdd_head_kernel(x_ref, lm_ref, wpix_ref, wlm_ref, bb_ref,
                    wc_ref, bc_ref, wd_ref, bd_ref, out_ref):
    # bottleneck: stand-in projection + avg-pool folded into wpix/wlm, BatchNorm1d(eval)
    # folded into the weights, + ReLU (Dropout = identity in eval)
    feat = jnp.dot(x_ref[...], wpix_ref[...], preferred_element_type=jnp.float32)
    feat = feat + jnp.dot(lm_ref[...], wlm_ref[...],
                          preferred_element_type=jnp.float32)
    feat = jnp.maximum(feat + bb_ref[...], 0.0)                      # (TB, BOTTLENECK)
    out_ref[:, OFF_FEAT:OFF_FEAT + BOTTLENECK] = feat

    # fused classifier heads, stage 1: single (BOTTLENECK, 2*WIDTH) matmul + ReLU
    h = jnp.maximum(
        jnp.dot(feat.astype(jnp.bfloat16), wc_ref[...],
                preferred_element_type=jnp.float32) + bc_ref[...], 0.0)  # (TB, 2*WIDTH)

    if SPLIT_STAGE2:
        # v5e: two (TB,128)@(128,CPAD) matmuls (block-diag halves are structurally zero)
        logits = (jnp.dot(h[:, :WIDTH].astype(jnp.bfloat16),
                          wd_ref[:WIDTH, :CPAD],
                          preferred_element_type=jnp.float32) + bd_ref[:, :CPAD])
        adv = (jnp.dot(h[:, WIDTH:].astype(jnp.bfloat16),
                       wd_ref[WIDTH:, CPAD:],
                       preferred_element_type=jnp.float32) + bd_ref[:, CPAD:])
    else:
        # v6e/v7x: 256x256 MXU executes the block-diagonal weight as one native load
        logits_cat = jnp.dot(h.astype(jnp.bfloat16), wd_ref[...],
                             preferred_element_type=jnp.float32) + bd_ref[...]
        logits = logits_cat[:, :CPAD]        # classifier_layer (padded lanes = NEG_BIG)
        adv = logits_cat[:, CPAD:]           # classifier_layer_2 (GRL is backward-only)

    out_ref[:, OFF_LOGITS:OFF_LOGITS + CPAD] = logits
    out_ref[:, OFF_ADV:OFF_ADV + CPAD] = adv

    # softmax over classes; padded lanes carry NEG_BIG bias -> exp() == 0, excluded
    m = jnp.max(logits, axis=1, keepdims=True)
    e = jnp.exp(logits - m)
    s = jnp.sum(e, axis=1, keepdims=True)
    out_ref[:, OFF_SOFTMAX:OFF_SOFTMAX + CPAD] = e * pl.reciprocal(s, approx=True)


def mdd_head(x_flat, local, params):
    """x_flat: (B, PIX) bf16, local: (B, LM_DIM) bf16 -> (B, OUT_LANES) f32 slab."""
    row = lambda shape: pl.BlockSpec(shape, lambda i: (i, 0))
    rep = lambda shape: pl.BlockSpec(shape, lambda i: (0, 0))   # invariant weight blocks
    # TODO(synk): at real-model sizes (BOTTLENECK=WIDTH=1024) set
    # pltpu.CompilerParams(vmem_limit_bytes=...) and pipeline_mode=pl.Buffered(1) on the
    # rep(...) weight specs (their block index never changes).

    return pl.pallas_call(
        mdd_head_kernel,
        out_shape=jax.ShapeDtypeStruct((B, OUT_LANES), jnp.float32),
        grid_spec=pltpu.PrefetchScalarGridSpec(
            num_scalar_prefetch=0,
            grid=(B // TB,),
            in_specs=[
                row((TB, PIX)),
                row((TB, LM_DIM)),
                rep((PIX, BOTTLENECK)), rep((LM_DIM, BOTTLENECK)), rep((1, BOTTLENECK)),
                rep((BOTTLENECK, 2 * WIDTH)), rep((1, 2 * WIDTH)),
                rep((2 * WIDTH, 2 * CPAD)), rep((1, 2 * CPAD)),
            ],
            out_specs=row((TB, OUT_LANES)),
        ),
        compiler_params=pltpu.CompilerParams(
            dimension_semantics=("parallel",)),   # shards batch tiles across v7x TCs
    )(x_flat, local, *params)


# ---- stand-in base network inputs (glue, plain JAX) ------------------------------------
def base_network_inputs(inputs, landmarks):
    # TODO(synk): IR_global_local_feat(50) (IR-50 backbone + Crop_Net on landmark crops)
    # is not defined in the reference source; stand-in = global avg-pool (folded into the
    # kernel weights) + landmark-pixel gather (single XLA gather below) + linear
    # projection (folded into the kernel weights).
    b, c, h, w = inputs.shape
    x_flat = inputs.reshape(b, c * h * w).astype(jnp.bfloat16)           # (B, PIX)
    xi = jnp.clip(landmarks[..., 0], 0, w - 1)
    yi = jnp.clip(landmarks[..., 1], 0, h - 1)
    local = inputs[jnp.arange(b)[:, None], :, yi, xi]                    # (B, L, C)
    local = local.reshape(b, -1).astype(jnp.bfloat16)                    # (B, LM_DIM)
    return x_flat, local


# ---- deterministic parameter construction (mirrors MDDNet.__init__) + fusion prep ------
def make_params(key):
    ks = jax.random.split(key, 6)
    # stand-in projection for the (undefined) backbone
    w_proj = 0.01 * jax.random.normal(ks[0], (IMG_C + LM_DIM, FEAT_DIM), jnp.float32)
    b_proj = jnp.zeros((1, FEAT_DIM), jnp.float32)

    # bottleneck Linear: weight ~ N(0, 0.005), bias = 0.1  (stored as (in, out))
    wb = 0.005 * jax.random.normal(ks[1], (FEAT_DIM, BOTTLENECK), jnp.float32)
    bb = jnp.full((1, BOTTLENECK), 0.1, jnp.float32)
    # BatchNorm1d fresh init: gamma=1, beta=0, running_mean=0, running_var=1 (eval fold)
    gamma = jnp.ones((1, BOTTLENECK), jnp.float32)
    beta = jnp.zeros((1, BOTTLENECK), jnp.float32)
    mu = jnp.zeros((1, BOTTLENECK), jnp.float32)
    var = jnp.ones((1, BOTTLENECK), jnp.float32)
    scale = gamma * jax.lax.rsqrt(var + BN_EPS)
    wb_f = wb * scale
    bb_f = (bb - mu) * scale + beta

    # fold stand-in projection into the bottleneck (exact: no nonlinearity between them)
    w_fused = w_proj @ wb_f                  # (IMG_C + LM_DIM, BOTTLENECK)
    b_fused = b_proj @ wb_f + bb_f           # (1, BOTTLENECK)

    # fold the 1/(H*W) global average pool into the "global" rows -> (PIX, BOTTLENECK)
    w_g = w_fused[:IMG_C]                    # (3, BOTTLENECK)
    w_lm = w_fused[IMG_C:]                   # (LM_DIM, BOTTLENECK), (l, c) row order
    w_pix = jnp.repeat(w_g, IMG_H * IMG_W, axis=0) / float(IMG_H * IMG_W)  # (PIX, BN)

    # classifier heads: Linear -> ReLU -> (Dropout=id) -> Linear, weight ~ N(0,0.01), bias 0
    wc1 = 0.01 * jax.random.normal(ks[2], (BOTTLENECK, WIDTH), jnp.float32)
    bc1 = jnp.zeros((1, WIDTH), jnp.float32)
    wd1 = 0.01 * jax.random.normal(ks[3], (WIDTH, CLASS_NUM), jnp.float32)
    bd1 = jnp.zeros((1, CLASS_NUM), jnp.float32)
    wc2 = 0.01 * jax.random.normal(ks[4], (BOTTLENECK, WIDTH), jnp.float32)
    bc2 = jnp.zeros((1, WIDTH), jnp.float32)
    wd2 = 0.01 * jax.random.normal(ks[5], (WIDTH, CLASS_NUM), jnp.float32)
    bd2 = jnp.zeros((1, CLASS_NUM), jnp.float32)

    # fuse stage-1 of both heads into one (BOTTLENECK, 2*WIDTH) weight
    wc_cat = jnp.concatenate([wc1, wc2], axis=1)
    bc_cat = jnp.concatenate([bc1, bc2], axis=1)

    # pad class dim to lane-dense CPAD, block-diagonal stage-2 weight (v6e/v7x run it as
    # one matmul; v5e slices out the two non-zero blocks); padded-lane biases = NEG_BIG
    wd_bd = jnp.zeros((2 * WIDTH, 2 * CPAD), jnp.float32)
    wd_bd = wd_bd.at[:WIDTH, :CLASS_NUM].set(wd1)
    wd_bd = wd_bd.at[WIDTH:, CPAD:CPAD + CLASS_NUM].set(wd2)
    bd_cat = jnp.full((1, 2 * CPAD), NEG_BIG, jnp.float32)
    bd_cat = bd_cat.at[:, :CLASS_NUM].set(bd1)
    bd_cat = bd_cat.at[:, CPAD:CPAD + CLASS_NUM].set(bd2)

    bf = jnp.bfloat16   # bf16 weights for the MXU; biases stay f32 (post-accumulate add)
    return (w_pix.astype(bf), w_lm.astype(bf), b_fused,
            wc_cat.astype(bf), bc_cat,
            wd_bd.astype(bf), bd_cat)


@jax.jit
def mddnet_forward(inputs, landmarks, head_params):
    x_flat, local = base_network_inputs(inputs, landmarks)
    return mdd_head(x_flat, local, head_params)   # lane-dense (B, 512) slab


if __name__ == "__main__":
    key = jax.random.PRNGKey(0)
    k_in, k_lm, k_par = jax.random.split(key, 3)

    inputs = jax.random.normal(k_in, (B, IMG_C, IMG_H, IMG_W), jnp.float32)   # NCHW
    landmarks = jax.random.randint(k_lm, (B, N_LM, 2), 0, IMG_W, jnp.int32)   # (x, y)

    head_params = make_params(k_par)

    slab = mddnet_forward(inputs, landmarks, head_params)
    jax.block_until_ready(slab)

    # consumer-side indexing out of the lane-dense slab (kept out of the kernel path)
    features = slab[:, OFF_FEAT:OFF_FEAT + BOTTLENECK]
    outputs = slab[:, OFF_LOGITS:OFF_LOGITS + CLASS_NUM]
    softmax_outputs = slab[:, OFF_SOFTMAX:OFF_SOFTMAX + CLASS_NUM]
    outputs_adv = slab[:, OFF_ADV:OFF_ADV + CLASS_NUM]

    assert slab.shape == (B, OUT_LANES)
    assert features.shape == (B, BOTTLENECK)
    assert outputs.shape == (B, CLASS_NUM)
    assert softmax_outputs.shape == (B, CLASS_NUM)
    assert outputs_adv.shape == (B, CLASS_NUM)
    # softmax rows must sum to ~1 (padded lanes contribute exactly 0; approx reciprocal
    # -> tolerance relaxed to 1e-3 per review)
    assert bool(jnp.allclose(jnp.sum(softmax_outputs, axis=1), 1.0, atol=1e-3))

    print("KERNEL_OK")
</pallas_src>

<mosaic_0001>
module attributes {stable_mosaic.version = 11 : i64} {
  func.func @mdd_head_kernel(%arg0: i32, %arg1: memref<256x768xbf16, #tpu.memory_space<vmem>>, %arg2: memref<256x12xbf16, #tpu.memory_space<vmem>>, %arg3: memref<768x128xbf16, #tpu.memory_space<vmem>>, %arg4: memref<12x128xbf16, #tpu.memory_space<vmem>>, %arg5: memref<1x128xf32, #tpu.memory_space<vmem>>, %arg6: memref<128x256xbf16, #tpu.memory_space<vmem>>, %arg7: memref<1x256xf32, #tpu.memory_space<vmem>>, %arg8: memref<256x256xbf16, #tpu.memory_space<vmem>>, %arg9: memref<1x256xf32, #tpu.memory_space<vmem>>, %arg10: memref<256x512xf32, #tpu.memory_space<vmem>>) attributes {dimension_semantics = [#tpu.dimension_semantics<parallel>], iteration_bounds = array<i64: 1>, scalar_prefetch = 0 : i64, scratch_operands = 0 : i64, tpu.core_type = #tpu.core_type<tc>, window_params = [{transform_indices = @transform_0, window_bounds = array<i64: 256, 768>}, {transform_indices = @transform_1, window_bounds = array<i64: 256, 12>}, {pipeline_mode = #tpu.pipeline_mode<synchronous>, transform_indices = @transform_2, window_bounds = array<i64: 768, 128>}, {pipeline_mode = #tpu.pipeline_mode<synchronous>, transform_indices = @transform_3, window_bounds = array<i64: 12, 128>}, {pipeline_mode = #tpu.pipeline_mode<synchronous>, transform_indices = @transform_4, window_bounds = array<i64: 1, 128>}, {pipeline_mode = #tpu.pipeline_mode<synchronous>, transform_indices = @transform_5, window_bounds = array<i64: 128, 256>}, {pipeline_mode = #tpu.pipeline_mode<synchronous>, transform_indices = @transform_6, window_bounds = array<i64: 1, 256>}, {pipeline_mode = #tpu.pipeline_mode<synchronous>, transform_indices = @transform_7, window_bounds = array<i64: 256, 256>}, {pipeline_mode = #tpu.pipeline_mode<synchronous>, transform_indices = @transform_8, window_bounds = array<i64: 1, 256>}, {transform_indices = @transform_9, window_bounds = array<i64: 256, 512>}]} {
    %c0 = arith.constant 0 : index
    %c0_0 = arith.constant 0 : index
    %0 = vector.load %arg1[%c0, %c0_0] : memref<256x768xbf16, #tpu.memory_space<vmem>>, vector<256x768xbf16>
    %c0_1 = arith.constant 0 : index
    %c0_2 = arith.constant 0 : index
    %1 = vector.load %arg3[%c0_1, %c0_2] : memref<768x128xbf16, #tpu.memory_space<vmem>>, vector<768x128xbf16>
    %cst = arith.constant dense<0.000000e+00> : vector<256x128xf32>
    %2 = tpu.matmul %0, %1, %cst {dimension_numbers = #tpu.dot_dimension_numbers<[1], [0], [0], [1], [0, 0, 1, 1], [], []>} : vector<256x768xbf16>, vector<768x128xbf16>, vector<256x128xf32> -> vector<256x128xf32>
    %c0_3 = arith.constant 0 : index
    %c0_4 = arith.constant 0 : index
    %3 = vector.load %arg2[%c0_3, %c0_4] : memref<256x12xbf16, #tpu.memory_space<vmem>>, vector<256x12xbf16>
    %c0_5 = arith.constant 0 : index
    %c0_6 = arith.constant 0 : index
    %4 = vector.load %arg4[%c0_5, %c0_6] : memref<12x128xbf16, #tpu.memory_space<vmem>>, vector<12x128xbf16>
    %cst_7 = arith.constant dense<0.000000e+00> : vector<256x128xf32>
    %5 = tpu.matmul %3, %4, %cst_7 {dimension_numbers = #tpu.dot_dimension_numbers<[1], [0], [0], [1], [0, 0, 1, 1], [], []>} : vector<256x12xbf16>, vector<12x128xbf16>, vector<256x128xf32> -> vector<256x128xf32>
    %6 = arith.addf %2, %5 : vector<256x128xf32>
    %c0_8 = arith.constant 0 : index
    %c0_9 = arith.constant 0 : index
    %7 = vector.load %arg5[%c0_8, %c0_9] : memref<1x128xf32, #tpu.memory_space<vmem>>, vector<1x128xf32>
    %8 = vector.broadcast %7 : vector<1x128xf32> to vector<256x128xf32>
    %9 = arith.addf %6, %8 : vector<256x128xf32>
    %cst_10 = arith.constant 0.000000e+00 : f32
    %10 = vector.broadcast %cst_10 : f32 to vector<256x128xf32>
    %11 = arith.maximumf %9, %10 : vector<256x128xf32>
    %c0_11 = arith.constant 0 : index
    %c0_12 = arith.constant 0 : index
    %12 = vector.load %arg10[%c0_11, %c0_12] : memref<256x512xf32, #tpu.memory_space<vmem>>, vector<256x128xf32>
    tpu.vector_store %arg10[%c0_11, %c0_12], %11 {strides = array<i32>} : memref<256x512xf32, #tpu.memory_space<vmem>>, vector<256x128xf32>,
    %13 = arith.truncf %11 : vector<256x128xf32> to vector<256x128xbf16>
    %c0_13 = arith.constant 0 : index
    %c0_14 = arith.constant 0 : index
    %14 = vector.load %arg6[%c0_13, %c0_14] : memref<128x256xbf16, #tpu.memory_space<vmem>>, vector<128x256xbf16>
    %cst_15 = arith.constant dense<0.000000e+00> : vector<256x256xf32>
    %15 = tpu.matmul %13, %14, %cst_15 {dimension_numbers = #tpu.dot_dimension_numbers<[1], [0], [0], [1], [0, 0, 1, 1], [], []>} : vector<256x128xbf16>, vector<128x256xbf16>, vector<256x256xf32> -> vector<256x256xf32>
    %c0_16 = arith.constant 0 : index
    %c0_17 = arith.constant 0 : index
    %16 = vector.load %arg7[%c0_16, %c0_17] : memref<1x256xf32, #tpu.memory_space<vmem>>, vector<1x256xf32>
    %17 = vector.broadcast %16 : vector<1x256xf32> to vector<256x256xf32>
    %18 = arith.addf %15, %17 : vector<256x256xf32>
    %cst_18 = arith.constant 0.000000e+00 : f32
    %19 = vector.broadcast %cst_18 : f32 to vector<256x256xf32>
    %20 = arith.maximumf %18, %19 : vector<256x256xf32>
    %21 = vector.extract_strided_slice %20 {offsets = [0, 0], sizes = [256, 128], strides = [1, 1]} : vector<256x256xf32> to vector<256x128xf32>
    %22 = arith.truncf %21 : vector<256x128xf32> to vector<256x128xbf16>
    %c0_19 = arith.constant 0 : index
    %c0_20 = arith.constant 0 : index
    %23 = vector.load %arg8[%c0_19, %c0_20] : memref<256x256xbf16, #tpu.memory_space<vmem>>, vector<128x128xbf16>
    %cst_21 = arith.constant dense<0.000000e+00> : vector<256x128xf32>
    %24 = tpu.matmul %22, %23, %cst_21 {dimension_numbers = #tpu.dot_dimension_numbers<[1], [0], [0], [1], [0, 0, 1, 1], [], []>} : vector<256x128xbf16>, vector<128x128xbf16>, vector<256x128xf32> -> vector<256x128xf32>
    %c0_22 = arith.constant 0 : index
    %c0_23 = arith.constant 0 : index
    %25 = vector.load %arg9[%c0_22, %c0_23] : memref<1x256xf32, #tpu.memory_space<vmem>>, vector<1x128xf32>
    %26 = vector.broadcast %25 : vector<1x128xf32> to vector<256x128xf32>
    %27 = arith.addf %24, %26 : vector<256x128xf32>
    %28 = vector.extract_strided_slice %20 {offsets = [0, 128], sizes = [256, 128], strides = [1, 1]} : vector<256x256xf32> to vector<256x128xf32>
    %29 = arith.truncf %28 : vector<256x128xf32> to vector<256x128xbf16>
    %c128 = arith.constant 128 : index
    %c128_24 = arith.constant 128 : index
    %30 = vector.load %arg8[%c128, %c128_24] : memref<256x256xbf16, #tpu.memory_space<vmem>>, vector<128x128xbf16>
    %cst_25 = arith.constant dense<0.000000e+00> : vector<256x128xf32>
    %31 = tpu.matmul %29, %30, %cst_25 {dimension_numbers = #tpu.dot_dimension_numbers<[1], [0], [0], [1], [0, 0, 1, 1], [], []>} : vector<256x128xbf16>, vector<128x128xbf16>, vector<256x128xf32> -> vector<256x128xf32>
    %c0_26 = arith.constant 0 : index
    %c128_27 = arith.constant 128 : index
    %32 = vector.load %arg9[%c0_26, %c128_27] : memref<1x256xf32, #tpu.memory_space<vmem>>, vector<1x128xf32>
    %33 = vector.broadcast %32 : vector<1x128xf32> to vector<256x128xf32>
    %34 = arith.addf %31, %33 : vector<256x128xf32>
    %c0_28 = arith.constant 0 : index
    %c128_29 = arith.constant 128 : index
    %35 = vector.load %arg10[%c0_28, %c128_29] : memref<256x512xf32, #tpu.memory_space<vmem>>, vector<256x128xf32>
    tpu.vector_store %arg10[%c0_28, %c128_29], %27 {strides = array<i32>} : memref<256x512xf32, #tpu.memory_space<vmem>>, vector<256x128xf32>,
    %c0_30 = arith.constant 0 : index
    %c384 = arith.constant 384 : index
    %36 = vector.load %arg10[%c0_30, %c384] : memref<256x512xf32, #tpu.memory_space<vmem>>, vector<256x128xf32>
    tpu.vector_store %arg10[%c0_30, %c384], %34 {strides = array<i32>} : memref<256x512xf32, #tpu.memory_space<vmem>>, vector<256x128xf32>,
    %cst_31 = arith.constant dense<0xFF800000> : vector<256xf32>
    %37 = vector.multi_reduction <maximumf>, %27, %cst_31 [1] : vector<256x128xf32> to vector<256xf32>
    %38 = vector.shape_cast %37 : vector<256xf32> to vector<256x1xf32>
    %39 = vector.broadcast %38 : vector<256x1xf32> to vector<256x128xf32>
    %40 = arith.subf %27, %39 : vector<256x128xf32>
    %41 = math.exp %40 : vector<256x128xf32>
    %cst_32 = arith.constant dense<0.000000e+00> : vector<256xf32>
    %42 = vector.multi_reduction <add>, %41, %cst_32 [1] : vector<256x128xf32> to vector<256xf32>
    %43 = vector.shape_cast %42 : vector<256xf32> to vector<256x1xf32>
    %44 = tpu.reciprocal %43 {approx = true} : vector<256x1xf32> -> vector<256x1xf32>
    %45 = vector.broadcast %44 : vector<256x1xf32> to vector<256x128xf32>
    %46 = arith.mulf %41, %45 : vector<256x128xf32>
    %c0_33 = arith.constant 0 : index
    %c256 = arith.constant 256 : index
    %47 = vector.load %arg10[%c0_33, %c256] : memref<256x512xf32, #tpu.memory_space<vmem>>, vector<256x128xf32>
    tpu.vector_store %arg10[%c0_33, %c256], %46 {strides = array<i32>} : memref<256x512xf32, #tpu.memory_space<vmem>>, vector<256x128xf32>,
    return
  }
  func.func @transform_0(%arg0: i32) -> (i32, i32) {
    %c0_i32 = arith.constant 0 : i32
    %c0_i32_0 = arith.constant 0 : i32
    return %arg0, %c0_i32 : i32, i32
  }
  func.func @transform_1(%arg0: i32) -> (i32, i32) {
    %c0_i32 = arith.constant 0 : i32
    %c0_i32_0 = arith.constant 0 : i32
    return %arg0, %c0_i32 : i32, i32
  }
  func.func @transform_2(%arg0: i32) -> (i32, i32) {
    %c0_i32 = arith.constant 0 : i32
    %c0_i32_0 = arith.constant 0 : i32
    %c0_i32_1 = arith.constant 0 : i32
    return %c0_i32, %c0_i32_0 : i32, i32
  }
  func.func @transform_3(%arg0: i32) -> (i32, i32) {
    %c0_i32 = arith.constant 0 : i32
    %c0_i32_0 = arith.constant 0 : i32
    %c0_i32_1 = arith.constant 0 : i32
    return %c0_i32, %c0_i32_0 : i32, i32
  }
  func.func @transform_4(%arg0: i32) -> (i32, i32) {
    %c0_i32 = arith.constant 0 : i32
    %c0_i32_0 = arith.constant 0 : i32
    %c0_i32_1 = arith.constant 0 : i32
    return %c0_i32, %c0_i32_0 : i32, i32
  }
  func.func @transform_5(%arg0: i32) -> (i32, i32) {
    %c0_i32 = arith.constant 0 : i32
    %c0_i32_0 = arith.constant 0 : i32
    %c0_i32_1 = arith.constant 0 : i32
    return %c0_i32, %c0_i32_0 : i32, i32
  }
  func.func @transform_6(%arg0: i32) -> (i32, i32) {
    %c0_i32 = arith.constant 0 : i32
    %c0_i32_0 = arith.constant 0 : i32
    %c0_i32_1 = arith.constant 0 : i32
    return %c0_i32, %c0_i32_0 : i32, i32
  }
  func.func @transform_7(%arg0: i32) -> (i32, i32) {
    %c0_i32 = arith.constant 0 : i32
    %c0_i32_0 = arith.constant 0 : i32
    %c0_i32_1 = arith.constant 0 : i32
    return %c0_i32, %c0_i32_0 : i32, i32
  }
  func.func @transform_8(%arg0: i32) -> (i32, i32) {
    %c0_i32 = arith.constant 0 : i32
    %c0_i32_0 = arith.constant 0 : i32
    %c0_i32_1 = arith.constant 0 : i32
    return %c0_i32, %c0_i32_0 : i32, i32
  }
  func.func @transform_9(%arg0: i32) -> (i32, i32) {
    %c0_i32 = arith.constant 0 : i32
    %c0_i32_0 = arith.constant 0 : i32
    return %arg0, %c0_i32 : i32, i32
  }
}

</mosaic_0001>

<bundles_post_ra>
// kernel: mddnet_forward.1
= control target key start
LH: loop header
LB: loop body
LE: loop exit
PB: predicated region body
PF: predicated region fallthrough
CT: control target
= control target key end

     0   :  { %vm394_vm0 = vcmask 1045504   ;;  %vm345_vm1 = vcmask 97280   ;;  %s5681_s0 = inlined_call_operand.vmem [shape: bf16[256,768], index: 0, kind: input, shape index: {}]   ;;  %s5682_s1 = inlined_call_operand.vmem [shape: bf16[256,12], index: 1, kind: input, shape index: {}]   ;;  %s5683_s2 = inlined_call_operand.vmem [shape: bf16[768,128], index: 2, kind: input, shape index: {}]   ;;  %s5684_s3 = inlined_call_operand.vmem [shape: bf16[12,128], index: 3, kind: input, shape index: {}]   ;;  %s5685_s4 = inlined_call_operand.vmem [shape: f32[1,128], index: 4, kind: input, shape index: {}]   ;;  %s5686_s5 = inlined_call_operand.vmem [shape: bf16[128,256], index: 5, kind: input, shape index: {}]   ;;  %s5687_s6 = inlined_call_operand.vmem [shape: f32[1,256], index: 6, kind: input, shape index: {}]   ;;  %s5688_s7 = inlined_call_operand.vmem [shape: bf16[256,256], index: 7, kind: input, shape index: {}]   ;;  %s5689_s8 = inlined_call_operand.vmem [shape: f32[1,256], index: 8, kind: input, shape index: {}]   ;;  %s5690_s9 = inlined_call_operand.hbm [shape: f32[256,512], index: 9, kind: output, shape index: {}]  }
   0x1   :  { %v3941_v0 = vld [vmem:[%s5684_s3] sm:$0x3f]   ;;  %v3943_v3 = vld [vmem:[%s5682_s1 + $0x48] sm:$0xff]   ;;  %v3953_v13 = vld [vmem:[%s5682_s1 + $0x50] sm:$0xff]  }
   0x2   :  { %v3942_v1 = vld [vmem:[%s5682_s1 + $0x40] sm:$0xff]   ;;  %3936 = vmatprep.subr.msk.bf16.mxu1 %vm394_vm0, %v3941_v0  ;;  %v396_v2 = vsel %vm394_vm0, %v3941_v0, 0  ;;  %3935 = vmatprep.subr.msk.bf16.mxu0 %vm394_vm0, %v3941_v0  ;;  %v3947_v7 = vld [vmem:[%s5682_s1 + $0x8] sm:$0xff]   ;;  %v3955_v15 = vld [vmem:[%s5682_s1 + $0x58] sm:$0xff]  }
   0x3   :  { %3934 = vmatpush3.bf16.msra.mxu1 %v396_v2  ;;  %3804 = vmatpush3.bf16.msra.mxu0 %v396_v2  ;;  %v3944_v4 = vld [vmem:[%s5683_s2 + $0x40] sm:$0xff]   ;;  %v3950_v10 = vld [vmem:[%s5683_s2 + $0x48] sm:$0xff]   ;;  %v3956_v16 = vld [vmem:[%s5683_s2 + $0x50] sm:$0xff]  }
   0x4   :  { %3821 = vmatprep.mubr.msk.bf16.mxu1 %vm345_vm1, %v3942_v1  ;;  %v3945_v5 = vld [vmem:[%s5682_s1] sm:$0xff]   ;;  %3419 = vmatprep.subr.bf16.mxu1 %v3944_v4  ;;  %v3951_v11 = vld [vmem:[%s5683_s2 + $0x8] sm:$0xff]   ;;  %v3957_v17 = vld [vmem:[%s5682_s1 + $0x10] sm:$0xff]  }
   0x5   :  { %v3946_v6 = vld [vmem:[%s5683_s2] sm:$0xff]   ;;  %3805 = vmatprep.mubr.msk.bf16.mxu0 %vm345_vm1, %v3945_v5  ;;  %v3952_v12 = vld [vmem:[%s5683_s2 + $0xc8] sm:$0xff]   ;;  %v3958_v18 = vld [vmem:[%s5683_s2 + $0x10] sm:$0xff]  }
   0x6   :  { %3822 = vmatmul.mubr.msk.bf16.vlgmr.msra.gmra.mrb[0].mxu1 %vm345_vm1, %v3943_v3  ;;  %v3948_v8 = vld [vmem:[%s5683_s2 + $0xc0] sm:$0xff]   ;;  %3806 = vmatmul.mubr.msk.bf16.vlgmr.msra.gmra.mrb[0].mxu0 %vm345_vm1, %v3947_v7  ;;  %v3954_v14 = vld [vmem:[%s5683_s2 + $0x88] sm:$0xff]   ;;  %v3959_v19 = vld [vmem:[%s5682_s1 + $0x18] sm:$0xff]  }
   0x7   :  { %3420 = vmatpush3.bf16.msra.mxu1 %v3946_v6  ;;  %v3949_v9 = vld [vmem:[%s5683_s2 + $0x80] sm:$0xff]   ;;  %3531 = vmatprep.subr.bf16.mxu0 %v3948_v8  ;;  %v3960_v20 = vld [vmem:[%s5683_s2 + $0xd0] sm:$0xff]   ;;  %v3962_v22 = vld [vmem:[%s5683_s2 + $0x58] sm:$0xff]  }
   0x8   :  { %3532 = vmatpush3.bf16.msra.mxu0 %v3949_v9  ;;  %3421 = vmatprep.subr.bf16.mxu1 %v3950_v10  ;;  %v3961_v21 = vld [vmem:[%s5683_s2 + $0x90] sm:$0xff]   ;;  %v3963_v23 = vld [vmem:[%s5683_s2 + $0x18] sm:$0xff]   ;;  %v3965_v25 = vld [vmem:[%s5682_s1 + $0x60] sm:$0xff]  }
   0x9   :  { %3533 = vmatprep.subr.bf16.mxu0 %v3952_v12  ;;  %3825 = vmatprep.mubr.msk.bf16.mxu1 %vm345_vm1, %v3953_v13  ;;  %v3964_v24 = vld [vmem:[%s5683_s2 + $0xd8] sm:$0xff]   ;;  %v3967_v27 = vld [vmem:[%s5682_s1 + $0x68] sm:$0xff]   ;;  %v3968_v28 = vld [vmem:[%s5683_s2 + $0x60] sm:$0xff]  }
   0xa   :  { %3809 = vmatprep.mubr.msk.bf16.mxu0 %vm345_vm1, %v3957_v17  ;;  %v3966_v26 = vld [vmem:[%s5683_s2 + $0x98] sm:$0xff]   ;;  %v3969_v29 = vld [vmem:[%s5682_s1 + $0x20] sm:$0xff]   ;;  %v3971_v31 = vld [vmem:[%s5682_s1 + $0x28] sm:$0xff]  }
   0xb   :  { %3422 = vmatpush3.bf16.msra.mxu1 %v3951_v11  ;;  %v3970_v30 = vld [vmem:[%s5683_s2 + $0x20] sm:$0xff]   ;;  %v3974_v34 = vld [vmem:[%s5683_s2 + $0x68] sm:$0xff]   ;;  %v3977_v37 = vld [vmem:[%s5682_s1 + $0x70] sm:$0xff]  }
   0xc   :  { %3534 = vmatpush3.bf16.msra.mxu0 %v3954_v14  ;;  %3423 = vmatprep.subr.bf16.mxu1 %v3956_v16  ;;  %v3972_v32 = vld [vmem:[%s5683_s2 + $0xe0] sm:$0xff]   ;;  %v3975_v35 = vld [vmem:[%s5683_s2 + $0x28] sm:$0xff]   ;;  %v3979_v39 = vld [vmem:[%s5682_s1 + $0x78] sm:$0xff]  }
   0xd   :  { %3535 = vmatprep.subr.bf16.mxu0 %v3960_v20  ;;  %v3973_v33 = vld [vmem:[%s5683_s2 + $0xa0] sm:$0xff]   ;;  %v3976_v36 = vld [vmem:[%s5683_s2 + $0xe8] sm:$0xff]   ;;  %v3980_v40 = vld [vmem:[%s5683_s2 + $0x70] sm:$0xff]  }
   0xe   :  { %3826 = vmatmul.mubr.msk.bf16.gmra.mrb[4].mxu1 %vm345_vm1, %v3955_v15  ;;  %3810 = vmatmul.mubr.msk.bf16.gmra.mrb[4].mxu0 %vm345_vm1, %v3959_v19  ;;  %v3978_v38 = vld [vmem:[%s5683_s2 + $0xa8] sm:$0xff]   ;;  %v3981_v41 = vld [vmem:[%s5682_s1 + $0x30] sm:$0xff]   ;;  %v3983_v43 = vld [vmem:[%s5682_s1 + $0x38] sm:$0xff]  }
   0xf   :  { %3424 = vmatpush3.bf16.msra.mxu1 %v3958_v18  ;;  %3829 = vmatprep.mubr.msk.bf16.mxu1 %vm345_vm1, %v3965_v25  ;;  %v3982_v42 = vld [vmem:[%s5683_s2 + $0x30] sm:$0xff]   ;;  %v3986_v46 = vld [vmem:[%s5683_s2 + $0x78] sm:$0xff]   ;;  %v3993_v52 = vld [vmem:[%s5683_s2 + $0x140] sm:$0xff]  }
  0x10   :  { %3536 = vmatpush3.bf16.msra.mxu0 %v3961_v21  ;;  %3425 = vmatprep.subr.bf16.mxu1 %v3962_v22  ;;  %v3984_v44 = vld [vmem:[%s5683_s2 + $0xf0] sm:$0xff]   ;;  %v3987_v47 = vld [vmem:[%s5683_s2 + $0x38] sm:$0xff]   ;;  %v3994_v53 = vld [vmem:[%s5681_s0 + $0x8] ss:$24 sps:$4 sm:$0xff]  }
  0x11   :  { %3537 = vmatprep.subr.bf16.mxu0 %v3964_v24  ;;  %3813 = vmatprep.mubr.msk.bf16.mxu0 %vm345_vm1, %v3969_v29  ;;  %v3985_v45 = vld [vmem:[%s5683_s2 + $0xb0] sm:$0xff]   ;;  %v3988_v48 = vld [vmem:[%s5683_s2 + $0xf8] sm:$0xff]   ;;  %v3996_v54 = vld [vmem:[%s5681_s0 + $0xc] ss:$24 sps:$4 sm:$0xff]  }
  0x12   :  { %v3989_v49 = vld [vmem:[%s5681_s0] ss:$24 sps:$4 sm:$0xff]   ;;  %v3991_v50 = vld [vmem:[%s5681_s0 + $0x4] ss:$24 sps:$4 sm:$0xff]   ;;  %v3998_v56 = vld [vmem:[%s5681_s0 + $0x34] ss:$24 sps:$4 sm:$0xff]  }
  0x13   :  { %3426 = vmatpush3.bf16.msra.mxu1 %v3963_v23  ;;  %v3992_v51 = vld [vmem:[%s5683_s2 + $0xb8] sm:$0xff]   ;;  %v3997_v55 = vld [vmem:[%s5683_s2 + $0x100] sm:$0xff]   ;;  %v4000_v57 = vld [vmem:[%s5681_s0 + $0x30] ss:$24 sps:$4 sm:$0xff]  }
  0x14   :  { %3538 = vmatpush3.bf16.msra.mxu0 %v3966_v26  ;;  %3427 = vmatprep.subr.bf16.mxu1 %v3968_v28  ;;  %v4001_v58 = vld [vmem:[%s5681_s0 + $0x3c] ss:$24 sps:$4 sm:$0xff]   ;;  %v4003_v59 = vld [vmem:[%s5681_s0 + $0x38] ss:$24 sps:$4 sm:$0xff]   ;;  %v4007_v61 = vld [vmem:[%s5683_s2 + $0x148] sm:$0xff]  }
  0x15   :  { %3539 = vmatprep.subr.bf16.mxu0 %v3972_v32  ;;  %v4004_v60 = vld [vmem:[%s5681_s0 + $0x64] ss:$24 sps:$4 sm:$0xff]   ;;  %v4010_v63 = vld [vmem:[%s5683_s2 + $0x108] sm:$0xff]   ;;  %v4006_v0 = vld [vmem:[%s5681_s0 + $0x60] ss:$24 sps:$4 sm:$0xff]  }
  0x16   :  { %3830 = vmatmul.mubr.msk.bf16.gmra.mrb[8].mxu1 %vm345_vm1, %v3967_v27  ;;  %3814 = vmatmul.mubr.msk.bf16.gmra.mrb[8].mxu0 %vm345_vm1, %v3971_v31  ;;  %v4008_v62 = vld [vmem:[%s5681_s0 + $0x6c] ss:$24 sps:$4 sm:$0xff]   ;;  %v4021_v2 = vld [vmem:[%s5683_s2 + $0x150] sm:$0xff]   ;;  %v4011_v3 = vld [vmem:[%s5681_s0 + $0x68] ss:$24 sps:$4 sm:$0xff]  }
  0x17   :  { %3428 = vmatpush3.bf16.msra.mxu1 %v3970_v30  ;;  %3833 = vmatprep.mubr.msk.bf16.mxu1 %vm345_vm1, %v3977_v37  ;;  %v4012_v1 = vld [vmem:[%s5681_s0 + $0x94] ss:$24 sps:$4 sm:$0xff]   ;;  %v4014_v6 = vld [vmem:[%s5681_s0 + $0x90] ss:$24 sps:$4 sm:$0xff]   ;;  %v4018_v7 = vld [vmem:[%s5681_s0 + $0xc4] ss:$24 sps:$4 sm:$0xff]  }
  0x18   :  { %3540 = vmatpush3.bf16.msra.mxu0 %v3973_v33  ;;  %3429 = vmatprep.subr.bf16.mxu1 %v3974_v34  ;;  %v4015_v4 = vld [vmem:[%s5681_s0 + $0x9c] ss:$24 sps:$4 sm:$0xff]   ;;  %v4017_v9 = vld [vmem:[%s5681_s0 + $0x98] ss:$24 sps:$4 sm:$0xff]   ;;  %v4022_v11 = vld [vmem:[%s5681_s0 + $0xcc] ss:$24 sps:$4 sm:$0xff]  }
  0x19   :  { %3541 = vmatprep.subr.bf16.mxu0 %v3976_v36  ;;  %3817 = vmatprep.mubr.msk.bf16.mxu0 %vm345_vm1, %v3981_v41  ;;  %v4024_v5 = vld [vmem:[%s5683_s2 + $0x110] sm:$0xff]   ;;  %v4035_v8 = vld [vmem:[%s5683_s2 + $0x158] sm:$0xff]   ;;  %v4049_v13 = vld [vmem:[%s5683_s2 + $0x160] sm:$0xff]  }
  0x1a   :  { %v4038_v10 = vld [vmem:[%s5683_s2 + $0x118] sm:$0xff]   ;;  %v4026_v14 = vld [vmem:[%s5681_s0 + $0xf4] ss:$24 sps:$4 sm:$0xff]   ;;  %v4052_v15 = vld [vmem:[%s5683_s2 + $0x120] sm:$0xff]  }
  0x1b   :  { %3430 = vmatpush3.bf16.msra.mxu1 %v3975_v35  ;;  %v4020_v12 = vld [vmem:[%s5681_s0 + $0xc0] ss:$24 sps:$4 sm:$0xff]   ;;  %v4029_v17 = vld [vmem:[%s5681_s0 + $0xfc] ss:$24 sps:$4 sm:$0xff]   ;;  %v4028_v18 = vld [vmem:[%s5681_s0 + $0xf0] ss:$24 sps:$4 sm:$0xff]  }
  0x1c   :  { %3542 = vmatpush3.bf16.msra.mxu0 %v3978_v38  ;;  %3431 = vmatprep.subr.bf16.mxu1 %v3980_v40  ;;  %v4025_v16 = vld [vmem:[%s5681_s0 + $0xc8] ss:$24 sps:$4 sm:$0xff]   ;;  %v4032_v20 = vld [vmem:[%s5681_s0 + $0x124] ss:$24 sps:$4 sm:$0xff]   ;;  %v4031_v22 = vld [vmem:[%s5681_s0 + $0xf8] ss:$24 sps:$4 sm:$0xff]  }
  0x1d   :  { %3543 = vmatprep.subr.bf16.mxu0 %v3984_v44  ;;  %v4063_v19 = vld [vmem:[%s5683_s2 + $0x168] sm:$0xff]   ;;  %v4077_v24 = vld [vmem:[%s5683_s2 + $0x170] sm:$0xff]   ;;  %v4034_v25 = vld [vmem:[%s5681_s0 + $0x120] ss:$24 sps:$4 sm:$0xff]  }
  0x1e   :  { %3834 = vmatmul.mubr.msk.bf16.gmra.mrb[12].mxu1 %vm345_vm1, %v3979_v39  ;;  %3818 = vmatmul.mubr.msk.bf16.gmra.mrb[12].mxu0 %vm345_vm1, %v3983_v43  ;;  %v4066_v21 = vld [vmem:[%s5683_s2 + $0x128] sm:$0xff]   ;;  %v4080_v27 = vld [vmem:[%s5683_s2 + $0x130] sm:$0xff]   ;;  %v4091_v30 = vld [vmem:[%s5683_s2 + $0x178] sm:$0xff]  }
  0x1f   :  { %3432 = vmatpush3.bf16.msra.mxu1 %v3982_v42  ;;  %1359 = vmatprep.mubr.bf16.mxu1 %v3991_v50  ;;  %v4036_v23 = vld [vmem:[%s5681_s0 + $0x12c] ss:$24 sps:$4 sm:$0xff]   ;;  %v4039_v28 = vld [vmem:[%s5681_s0 + $0x128] ss:$24 sps:$4 sm:$0xff]   ;;  %v4043_v29 = vld [vmem:[%s5681_s0 + $0x15c] ss:$24 sps:$4 sm:$0xff]  }
  0x20   :  { %3544 = vmatpush3.bf16.msra.mxu0 %v3985_v45  ;;  %3433 = vmatprep.subr.bf16.mxu1 %v3986_v46  ;;  %v4040_v26 = vld [vmem:[%s5681_s0 + $0x154] ss:$24 sps:$4 sm:$0xff]   ;;  %v4042_v31 = vld [vmem:[%s5681_s0 + $0x150] ss:$24 sps:$4 sm:$0xff]   ;;  %v4094_v32 = vld [vmem:[%s5683_s2 + $0x138] sm:$0xff]  }
  0x21   :  { %3545 = vmatprep.subr.bf16.mxu0 %v3988_v48  ;;  %1520 = vmatprep.mubr.bf16.mxu0 %v3996_v54  ;;  %v4046_v33 = vld [vmem:[%s5681_s0 + $0x184] ss:$24 sps:$4 sm:$0xff]   ;;  %v4045_v34 = vld [vmem:[%s5681_s0 + $0x158] ss:$24 sps:$4 sm:$0xff]   ;;  %v4054_v37 = vld [vmem:[%s5681_s0 + $0x1b4] ss:$24 sps:$4 sm:$0xff]  }
  0x22   :  { %v4050_v35 = vld [vmem:[%s5681_s0 + $0x18c] ss:$24 sps:$4 sm:$0xff]   ;;  %v4048_v36 = vld [vmem:[%s5681_s0 + $0x180] ss:$24 sps:$4 sm:$0xff]   ;;  %v4057_v39 = vld [vmem:[%s5681_s0 + $0x1bc] ss:$24 sps:$4 sm:$0xff]  }
  0x23   :  { %3434 = vmatpush3.bf16.msra.mxu1 %v3987_v47  ;;  %v4053_v38 = vld [vmem:[%s5681_s0 + $0x188] ss:$24 sps:$4 sm:$0xff]   ;;  %v4059_v41 = vld [vmem:[%s5681_s0 + $0x1b8] ss:$24 sps:$4 sm:$0xff]   ;;  %v4060_v42 = vld [vmem:[%s5681_s0 + $0x1e4] ss:$24 sps:$4 sm:$0xff]  }
  0x24   :  { %3546 = vmatpush3.bf16.msra.mxu0 %v3992_v51  ;;  %3643 = vmatprep.subr.bf16.mxu1 %v3993_v52  ;;  %v4056_v40 = vld [vmem:[%s5681_s0 + $0x1b0] ss:$24 sps:$4 sm:$0xff]   ;;  %v4064_v43 = vld [vmem:[%s5681_s0 + $0x1ec] ss:$24 sps:$4 sm:$0xff]   ;;  %v4062_v44 = vld [vmem:[%s5681_s0 + $0x1e0] ss:$24 sps:$4 sm:$0xff]  }
  0x25   :  { %v4068_v45 = vld [vmem:[%s5681_s0 + $0x214] ss:$24 sps:$4 sm:$0xff]   ;;  %v4067_v46 = vld [vmem:[%s5681_s0 + $0x1e8] ss:$24 sps:$4 sm:$0xff]   ;;  %v4073_v50 = vld [vmem:[%s5681_s0 + $0x218] ss:$24 sps:$4 sm:$0xff]  }
  0x26   :  { %1360 = vmatmul.mubr.bf16.vlgmr.msra.gmra.mrb[16].mxu1 %v3989_v49  ;;  %v4071_v47 = vld [vmem:[%s5681_s0 + $0x21c] ss:$24 sps:$4 sm:$0xff]   ;;  %v4070_v48 = vld [vmem:[%s5681_s0 + $0x210] ss:$24 sps:$4 sm:$0xff]   ;;  %v4078_v51 = vld [vmem:[%s5681_s0 + $0x24c] ss:$24 sps:$4 sm:$0xff]  }
  0x27   :  { %3644 = vmatpush3.bf16.msra.mxu1 %v3997_v55  ;;  %1521 = vmatmul.mubr.bf16.vlgmr.msra.gmra.mrb[16].mxu0 %v3994_v53  ;;  %v4074_v49 = vld [vmem:[%s5681_s0 + $0x244] ss:$24 sps:$4 sm:$0xff]  }
  0x28   :  { %1367 = vmatprep.mubr.bf16.mxu1 %v3998_v56  ;;  %1528 = vmatprep.mubr.bf16.mxu0 %v4001_v58 }
  0x29   :  { %3645 = vmatprep.subr.bf16.mxu1 %v4007_v61 }
  0x2b   :  { %3646 = vmatpush3.bf16.msra.mxu1 %v4010_v63 }
  0x2c   :  { %3647 = vmatprep.subr.bf16.mxu1 %v4021_v2 }
  0x2e   :  { %1368 = vmatmul.mubr.bf16.gmra.mrb[20].mxu1 %v4000_v57 }
  0x2f   :  { %1375 = vmatprep.mubr.bf16.mxu1 %v4004_v60  ;;  %1529 = vmatmul.mubr.bf16.gmra.mrb[20].mxu0 %v4003_v59 }
  0x30   :  { %1536 = vmatprep.mubr.bf16.mxu0 %v4008_v62  ;;  %3648 = vmatpush3.bf16.msra.mxu1 %v4024_v5 }
  0x31   :  { %3649 = vmatprep.subr.bf16.mxu1 %v4035_v8 }
  0x34   :  { %3650 = vmatpush3.bf16.msra.mxu1 %v4038_v10 }
  0x35   :  { %3651 = vmatprep.subr.bf16.mxu1 %v4049_v13 }
  0x36   :  { %1376 = vmatmul.mubr.bf16.gmra.mrb[24].mxu1 %v4006_v0 }
  0x37   :  { %1383 = vmatprep.mubr.bf16.mxu1 %v4012_v1  ;;  %1537 = vmatmul.mubr.bf16.gmra.mrb[24].mxu0 %v4011_v3 }
  0x38   :  { %1544 = vmatprep.mubr.bf16.mxu0 %v4015_v4  ;;  %3652 = vmatpush3.bf16.msra.mxu1 %v4052_v15 }
  0x39   :  { %3653 = vmatprep.subr.bf16.mxu1 %v4063_v19 }
  0x3c   :  { %3654 = vmatpush3.bf16.msra.mxu1 %v4066_v21 }
  0x3d   :  { %3655 = vmatprep.subr.bf16.mxu1 %v4077_v24 }
  0x3e   :  { %1384 = vmatmul.mubr.bf16.gmra.mrb[28].mxu1 %v4014_v6 }
  0x3f   :  { %1391 = vmatprep.mubr.bf16.mxu1 %v4018_v7  ;;  %1545 = vmatmul.mubr.bf16.gmra.mrb[28].mxu0 %v4017_v9 }
  0x40   :  { %1552 = vmatprep.mubr.bf16.mxu0 %v4022_v11  ;;  %3656 = vmatpush3.bf16.msra.mxu1 %v4080_v27 }
  0x41   :  { %3657 = vmatprep.subr.bf16.mxu1 %v4091_v30 }
  0x44   :  { %3658 = vmatpush3.bf16.msra.mxu1 %v4094_v32 }
  0x46   :  { %1392 = vmatmul.mubr.bf16.gmra.mrb[32].mxu1 %v4020_v12 }
  0x47   :  { %1399 = vmatprep.mubr.bf16.mxu1 %v4026_v14  ;;  %1553 = vmatmul.mubr.bf16.gmra.mrb[32].mxu0 %v4025_v16 }
  0x48   :  { %1560 = vmatprep.mubr.bf16.mxu0 %v4029_v17 }
  0x4e   :  { %1400 = vmatmul.mubr.bf16.gmra.mrb[36].mxu1 %v4028_v18 }
  0x4f   :  { %1407 = vmatprep.mubr.bf16.mxu1 %v4032_v20  ;;  %1561 = vmatmul.mubr.bf16.gmra.mrb[36].mxu0 %v4031_v22 }
  0x50   :  { %1568 = vmatprep.mubr.bf16.mxu0 %v4036_v23 }
  0x56   :  { %1408 = vmatmul.mubr.bf16.gmra.mrb[40].mxu1 %v4034_v25 }
  0x57   :  { %1415 = vmatprep.mubr.bf16.mxu1 %v4040_v26  ;;  %1569 = vmatmul.mubr.bf16.gmra.mrb[40].mxu0 %v4039_v28 }
  0x58   :  { %1576 = vmatprep.mubr.bf16.mxu0 %v4043_v29 }
  0x5e   :  { %1416 = vmatmul.mubr.bf16.gmra.mrb[44].mxu1 %v4042_v31 }
  0x5f   :  { %1423 = vmatprep.mubr.bf16.mxu1 %v4046_v33  ;;  %1577 = vmatmul.mubr.bf16.gmra.mrb[44].mxu0 %v4045_v34 }
  0x60   :  { %1584 = vmatprep.mubr.bf16.mxu0 %v4050_v35 }
  0x66   :  { %1424 = vmatmul.mubr.bf16.gmra.mrb[48].mxu1 %v4048_v36 }
  0x67   :  { %1431 = vmatprep.mubr.bf16.mxu1 %v4054_v37  ;;  %1585 = vmatmul.mubr.bf16.gmra.mrb[48].mxu0 %v4053_v38 }
  0x68   :  { %1592 = vmatprep.mubr.bf16.mxu0 %v4057_v39 }
  0x6e   :  { %1432 = vmatmul.mubr.bf16.gmra.mrb[52].mxu1 %v4056_v40 }
  0x6f   :  { %1439 = vmatprep.mubr.bf16.mxu1 %v4060_v42  ;;  %1593 = vmatmul.mubr.bf16.gmra.mrb[52].mxu0 %v4059_v41 }
  0x70   :  { %1600 = vmatprep.mubr.bf16.mxu0 %v4064_v43 }
  0x76   :  { %1440 = vmatmul.mubr.bf16.gmra.mrb[56].mxu1 %v4062_v44 }
  0x77   :  { %1447 = vmatprep.mubr.bf16.mxu1 %v4068_v45  ;;  %1601 = vmatmul.mubr.bf16.gmra.mrb[56].mxu0 %v4067_v46 }
  0x78   :  { %1608 = vmatprep.mubr.bf16.mxu0 %v4071_v47 }
  0x7e   :  { %1448 = vmatmul.mubr.bf16.gmra.mrb[60].mxu1 %v4070_v48 }
  0x7f   :  { %1455 = vmatprep.mubr.bf16.mxu1 %v4074_v49 }
  0x80   :  { %14 = vsyncpa [#allocation3], 0  ;;  %1609 = vmatmul.mubr.bf16.gmra.mrb[60].mxu0 %v4073_v50  ;;  %v4076_v52 = vld [vmem:[%s5681_s0 + $0x240] ss:$24 sps:$4 sm:$0xff]   ;;  %v4082_v53 = vld [vmem:[%s5681_s0 + $0x274] ss:$24 sps:$4 sm:$0xff]  }
  0x81   :  { %1616 = vmatprep.mubr.bf16.mxu0 %v4078_v51  ;;  %v4081_v54 = vld [vmem:[%s5681_s0 + $0x248] ss:$24 sps:$4 sm:$0xff]   ;;  %v4085_v55 = vld [vmem:[%s5681_s0 + $0x27c] ss:$24 sps:$4 sm:$0xff]   ;;  %v4143_v58 = vld [vmem:[%s5686_s5 + $0x4] ss:$8 sps:$4 sm:$0xff]  }
  0x82   :  { %v4084_v56 = vld [vmem:[%s5681_s0 + $0x270] ss:$24 sps:$4 sm:$0xff]   ;;  %v4088_v59 = vld [vmem:[%s5681_s0 + $0x2a4] ss:$24 sps:$4 sm:$0xff]   ;;  %2037 = vmatprep.subr.bf16.mxu0 %v4143_v58  ;;  %v4090_v62 = vld [vmem:[%s5681_s0 + $0x2a0] ss:$24 sps:$4 sm:$0xff]  }
  0x83   :  { %v4141_v57 = vld [vmem:[%s5686_s5] ss:$8 sps:$4 sm:$0xff]   ;;  %v4087_v60 = vld [vmem:[%s5681_s0 + $0x278] ss:$24 sps:$4 sm:$0xff]   ;;  %v4092_v61 = vld [vmem:[%s5681_s0 + $0x2ac] ss:$24 sps:$4 sm:$0xff]  }
  0x84   :  { %2038 = vmatpush1.bf16.msra.mxu0 %v4141_v57  ;;  %v4096_v63 = vld [vmem:[%s5681_s0 + $0x2d4] ss:$24 sps:$4 sm:$0xff]   ;;  %v4095_v0 = vld [vmem:[%s5681_s0 + $0x2a8] ss:$24 sps:$4 sm:$0xff]   ;;  %v4150_v3 = vld [vmem:[%s5686_s5 + $0x10] ss:$8 sps:$4 sm:$0xff]  }
  0x85   :  { %v4099_v1 = vld [vmem:[%s5681_s0 + $0x2dc] ss:$24 sps:$4 sm:$0xff]   ;;  %v4098_v2 = vld [vmem:[%s5681_s0 + $0x2d0] ss:$24 sps:$4 sm:$0xff]   ;;  %v4107_v9 = vld [vmem:[%s5681_s0 + $0x40] ss:$24 sps:$4 sm:$0xff]  }
  0x86   :  { %1456 = vmatmul.mubr.bf16.gmra.mrb[64].mxu1 %v4076_v52  ;;  %v4152_v4 = vld [vmem:[%s5686_s5 + $0x14] ss:$8 sps:$4 sm:$0xff]   ;;  %v4101_v6 = vld [vmem:[%s5681_s0 + $0x2d8] ss:$24 sps:$4 sm:$0xff]   ;;  %v4156_v10 = vld [vmem:[%s5686_s5 + $0x20] ss:$8 sps:$4 sm:$0xff]  }
  0x87   :  { %1463 = vmatprep.mubr.bf16.mxu1 %v4082_v53  ;;  %v4104_v5 = vld [vmem:[%s5681_s0 + $0x14] ss:$24 sps:$4 sm:$0xff]   ;;  %2039 = vmatprep.subr.bf16.mxu0 %v4152_v4  ;;  %v4102_v7 = vld [vmem:[%s5681_s0 + $0x10] ss:$24 sps:$4 sm:$0xff]   ;;  %v4105_v8 = vld [vmem:[%s5681_s0 + $0x44] ss:$24 sps:$4 sm:$0xff]  }
  0x88   :  { %1617 = vmatmul.mubr.bf16.gmra.mrb[64].mxu0 %v4081_v54  ;;  %v4158_v11 = vld [vmem:[%s5686_s5 + $0x24] ss:$8 sps:$4 sm:$0xff]   ;;  %v4110_v13 = vld [vmem:[%s5681_s0 + $0x70] ss:$24 sps:$4 sm:$0xff]   ;;  %v4113_v15 = vld [vmem:[%s5681_s0 + $0xa0] ss:$24 sps:$4 sm:$0xff]  }
  0x89   :  { %1624 = vmatprep.mubr.bf16.mxu0 %v4085_v55  ;;  %2040 = vmatpush1.bf16.msra.mxu0 %v4150_v3  ;;  %v4108_v12 = vld [vmem:[%s5681_s0 + $0x74] ss:$24 sps:$4 sm:$0xff]   ;;  %v4111_v14 = vld [vmem:[%s5681_s0 + $0xa4] ss:$24 sps:$4 sm:$0xff]   ;;  %v4159_v16 = vld [vmem:[%s5686_s5 + $0x30] ss:$8 sps:$4 sm:$0xff]  }
  0x8a   :  { %2041 = vmatprep.subr.bf16.mxu0 %v4158_v11  ;;  %v4161_v17 = vld [vmem:[%s5686_s5 + $0x34] ss:$8 sps:$4 sm:$0xff]   ;;  %v4116_v19 = vld [vmem:[%s5681_s0 + $0xd0] ss:$24 sps:$4 sm:$0xff]   ;;  %v4119_v21 = vld [vmem:[%s5681_s0 + $0x100] ss:$24 sps:$4 sm:$0xff]  }
  0x8b   :  { %v4114_v18 = vld [vmem:[%s5681_s0 + $0xd4] ss:$24 sps:$4 sm:$0xff]   ;;  %v4117_v20 = vld [vmem:[%s5681_s0 + $0x104] ss:$24 sps:$4 sm:$0xff]   ;;  %v4162_v22 = vld [vmem:[%s5686_s5 + $0x40] ss:$8 sps:$4 sm:$0xff]  }
  0x8c   :  { %v4164_v23 = vld [vmem:[%s5686_s5 + $0x44] ss:$8 sps:$4 sm:$0xff]   ;;  %v4122_v33 = vld [vmem:[%s5681_s0 + $0x130] ss:$24 sps:$4 sm:$0xff]   ;;  %v4125_v38 = vld [vmem:[%s5681_s0 + $0x160] ss:$24 sps:$4 sm:$0xff]  }
  0x8d   :  { %2042 = vmatpush1.bf16.msra.mxu0 %v4156_v10  ;;  %v4120_v24 = vld [vmem:[%s5681_s0 + $0x134] ss:$24 sps:$4 sm:$0xff]   ;;  %v4123_v34 = vld [vmem:[%s5681_s0 + $0x164] ss:$24 sps:$4 sm:$0xff]   ;;  %v4165_v41 = vld [vmem:[%s5686_s5 + $0x50] ss:$8 sps:$4 sm:$0xff]  }
  0x8e   :  { %1464 = vmatmul.mubr.bf16.gmra.mrb[68].mxu1 %v4084_v56  ;;  %2043 = vmatprep.subr.bf16.mxu0 %v4161_v17  ;;  %v4167_v42 = vld [vmem:[%s5686_s5 + $0x54] ss:$8 sps:$4 sm:$0xff]   ;;  %v4128_v47 = vld [vmem:[%s5681_s0 + $0x190] ss:$24 sps:$4 sm:$0xff]   ;;  %v4131_v57 = vld [vmem:[%s5681_s0 + $0x1c0] ss:$24 sps:$4 sm:$0xff]  }
  0x8f   :  { %1471 = vmatprep.mubr.bf16.mxu1 %v4088_v59  ;;  %v4126_v43 = vld [vmem:[%s5681_s0 + $0x194] ss:$24 sps:$4 sm:$0xff]   ;;  %v4129_v50 = vld [vmem:[%s5681_s0 + $0x1c4] ss:$24 sps:$4 sm:$0xff]   ;;  %v4168_v58 = vld [vmem:[%s5686_s5 + $0x60] ss:$8 sps:$4 sm:$0xff]  }
  0x90   :  { %1625 = vmatmul.mubr.bf16.gmra.mrb[68].mxu0 %v4087_v60  ;;  %v4170_v59 = vld [vmem:[%s5686_s5 + $0x64] ss:$8 sps:$4 sm:$0xff]   ;;  %v4171_v10 = vld [vmem:[%s5686_s5 + $0x70] ss:$8 sps:$4 sm:$0xff]   ;;  %v4173_v11 = vld [vmem:[%s5686_s5 + $0x74] ss:$8 sps:$4 sm:$0xff]  }
  0x91   :  { %1632 = vmatprep.mubr.bf16.mxu0 %v4092_v61  ;;  %2044 = vmatpush1.bf16.msra.mxu0 %v4159_v16  ;;  %v4132_v60 = vld [vmem:[%s5681_s0 + $0x1f4] ss:$24 sps:$4 sm:$0xff]   ;;  %v4135_v4 = vld [vmem:[%s5681_s0 + $0x224] ss:$24 sps:$4 sm:$0xff]  }
  0x92   :  { %2045 = vmatprep.subr.bf16.mxu0 %v4164_v23 }
  0x95   :  { %2046 = vmatpush1.bf16.msra.mxu0 %v4162_v22 }
  0x96   :  { %1472 = vmatmul.mubr.bf16.gmra.mrb[72].mxu1 %v4090_v62  ;;  %2047 = vmatprep.subr.bf16.mxu0 %v4167_v42 }
  0x97   :  { %1479 = vmatprep.mubr.bf16.mxu1 %v4096_v63 }
  0x98   :  { %1633 = vmatmul.mubr.bf16.gmra.mrb[72].mxu0 %v4095_v0 }
  0x99   :  { %1640 = vmatprep.mubr.bf16.mxu0 %v4099_v1  ;;  %2048 = vmatpush1.bf16.msra.mxu0 %v4165_v41  ;;  %v4134_v1 = vld [vmem:[%s5681_s0 + $0x1f0] ss:$24 sps:$4 sm:$0xff]  }
  0x9a   :  { %2049 = vmatprep.subr.bf16.mxu0 %v4170_v59 }
  0x9d   :  { %2050 = vmatpush1.bf16.msra.mxu0 %v4168_v58 }
  0x9e   :  { %1480 = vmatmul.mubr.bf16.gmra.mrb[76].mxu1 %v4098_v2  ;;  %2051 = vmatprep.subr.bf16.mxu0 %v4173_v11 }
  0x9f   :  { %1681 = vmatprep.mubr.bf16.mxu1 %v4104_v5 }
  0xa0   :  { %1641 = vmatmul.mubr.bf16.gmra.mrb[76].mxu0 %v4101_v6 }
  0xa1   :  { %2052 = vmatpush1.bf16.msra.mxu0 %v4171_v10 }
  0xa6   :  { %1682 = vmatmul.mubr.bf16.vlgmr.msra.gmra.mrb[80].mxu1 %v4102_v7 }
  0xa7   :  { %1689 = vmatprep.mubr.bf16.mxu1 %v4105_v8  ;;  %v4137_v8 = vld [vmem:[%s5681_s0 + $0x220] ss:$24 sps:$4 sm:$0xff]  }
  0xae   :  { %1690 = vmatmul.mubr.bf16.gmra.mrb[84].mxu1 %v4107_v9 }
  0xaf   :  { %1697 = vmatprep.mubr.bf16.mxu1 %v4108_v12 }
  0xb6   :  { %1698 = vmatmul.mubr.bf16.gmra.mrb[88].mxu1 %v4110_v13 }
  0xb7   :  { %1705 = vmatprep.mubr.bf16.mxu1 %v4111_v14  ;;  %v4138_v14 = vld [vmem:[%s5681_s0 + $0x254] ss:$24 sps:$4 sm:$0xff]  }
  0xbe   :  { %1706 = vmatmul.mubr.bf16.gmra.mrb[92].mxu1 %v4113_v15 }
  0xbf   :  { %1713 = vmatprep.mubr.bf16.mxu1 %v4114_v18 }
  0xc6   :  { %1714 = vmatmul.mubr.bf16.gmra.mrb[96].mxu1 %v4116_v19 }
  0xc7   :  { %1721 = vmatprep.mubr.bf16.mxu1 %v4117_v20 }
  0xce   :  { %1722 = vmatmul.mubr.bf16.gmra.mrb[100].mxu1 %v4119_v21 }
  0xcf   :  { %1729 = vmatprep.mubr.bf16.mxu1 %v4120_v24 }
  0xd6   :  { %1730 = vmatmul.mubr.bf16.gmra.mrb[104].mxu1 %v4122_v33 }
  0xd7   :  { %1737 = vmatprep.mubr.bf16.mxu1 %v4123_v34 }
  0xd9   :  { %v4868_v25 = vpop.f32.mrb[0].mxu1  ;;  %v4876_v29 = vpop.f32.mrb[0].mxu0 }
  0xda   :  { %v4870_v26 = vpop.f32.mrb[1].mxu1  ;;  %v4878_v30 = vpop.f32.mrb[1].mxu0 }
  0xdb   :  { %v4872_v27 = vpop.f32.mrb[2].mxu1  ;;  %v4880_v31 = vpop.f32.mrb[2].mxu0 }
  0xdc   :  { %v4874_v28 = vpop.f32.mrb[3].mxu1  ;;  %v4882_v32 = vpop.f32.mrb[3].mxu0 }
  0xde   :  { %1738 = vmatmul.mubr.bf16.gmra.mrb[108].mxu1 %v4125_v38 }
  0xdf   :  { %1745 = vmatprep.mubr.bf16.mxu1 %v4126_v43 }
  0xe1   :  { %v4890_v35 = vpop.f32.mrb[4].mxu1  ;;  %v4901_v40 = vpop.f32.mrb[4].mxu0 }
  0xe2   :  { %v4892_v36 = vpop.f32.mrb[5].mxu1  ;;  %v4912_v44 = vpop.f32.mrb[5].mxu0 }
  0xe3   :  { %v4894_v37 = vpop.f32.mrb[6].mxu1  ;;  %v4914_v45 = vpop.f32.mrb[6].mxu0 }
  0xe4   :  { %v4899_v39 = vpop.f32.mrb[7].mxu1  ;;  %v4916_v46 = vpop.f32.mrb[7].mxu0 }
  0xe6   :  { %1746 = vmatmul.mubr.bf16.gmra.mrb[112].mxu1 %v4128_v47  ;;  %v4144_v47 = vld [vmem:[%s5681_s0 + $0x284] ss:$24 sps:$4 sm:$0xff]  }
  0xe7   :  { %1753 = vmatprep.mubr.bf16.mxu1 %v4129_v50 }
  0xe9   :  { %v4921_v48 = vpop.f32.mrb[8].mxu1  ;;  %v4932_v53 = vpop.f32.mrb[8].mxu0 }
  0xea   :  { %v4923_v49 = vpop.f32.mrb[9].mxu1  ;;  %v4934_v54 = vpop.f32.mrb[9].mxu0 }
  0xeb   :  { %v4928_v51 = vpop.f32.mrb[10].mxu1  ;;  %v4936_v55 = vpop.f32.mrb[10].mxu0 }
  0xec   :  { %v4930_v52 = vpop.f32.mrb[11].mxu1  ;;  %v4938_v56 = vpop.f32.mrb[11].mxu0 }
  0xee   :  { %1754 = vmatmul.mubr.bf16.gmra.mrb[116].mxu1 %v4131_v57 }
  0xef   :  { %1761 = vmatprep.mubr.bf16.mxu1 %v4132_v60 }
  0xf1   :  { %v4952_v61 = vpop.f32.mrb[12].mxu1  ;;  %v4963_v2 = vpop.f32.mrb[12].mxu0 }
  0xf2   :  { %v4954_v62 = vpop.f32.mrb[13].mxu1  ;;  %v4965_v3 = vpop.f32.mrb[13].mxu0 }
  0xf3   :  { %v4956_v63 = vpop.f32.mrb[14].mxu1  ;;  %v4970_v5 = vpop.f32.mrb[14].mxu0 }
  0xf4   :  { %v4958_v0 = vpop.f32.mrb[15].mxu1  ;;  %v4972_v6 = vpop.f32.mrb[15].mxu0 }
  0xf6   :  { %1762 = vmatmul.mubr.bf16.gmra.mrb[120].mxu1 %v4134_v1 }
  0xf7   :  { %1769 = vmatprep.mubr.bf16.mxu1 %v4135_v4 }
  0xf9   :  { %v3435_v7 = vpop.f32.mrb[16].mxu1 }
  0xfa   :  { %v3436_v9 = vpop.f32.mrb[17].mxu1  ;;  %v3547_v15 = vpop.f32.mrb[16].mxu0 }
  0xfb   :  { %v3437_v12 = vadd.f32 %v3436_v9, %v3435_v7  ;;  %v3438_v13 = vpop.f32.mrb[18].mxu1  ;;  %v3548_v19 = vpop.f32.mrb[17].mxu0 }
  0xfc   :  { %v3439_v16 = vpop.f32.mrb[19].mxu1  ;;  %v3549_v20 = vadd.f32 %v3548_v19, %v3547_v15  ;;  %v3550_v21 = vpop.f32.mrb[18].mxu0 }
  0xfd   :  { %v1362_v17 = vadd.f32 %v3437_v12, %v4878_v30  ;;  %v3440_v18 = vadd.f32 %v3439_v16, %v3438_v13  ;;  %v3551_v23 = vpop.f32.mrb[19].mxu0  ;;  %v4140_v30 = vld [vmem:[%s5681_s0 + $0x250] ss:$24 sps:$4 sm:$0xff]  }
  0xfe   :  { %1770 = vmatmul.mubr.bf16.gmra.mrb[124].mxu1 %v4137_v8  ;;  %v3552_v33 = vadd.f32 %v3551_v23, %v3550_v21  ;;  %v4342_v8 = vmov 0  }
  0xff   :  { %v1365_v22 = vadd.f32 %v3440_v18, %v4882_v32  ;;  %1777 = vmatprep.mubr.bf16.mxu1 %v4138_v14  ;;  %v4988_v24 = vadd.f32 %v3549_v20, %v1362_v17  ;;  %2069 = vmatprep.mubr.bf16.mxu0 %v4342_v8 }
 0x101   :  { %v3441_v34 = vpop.f32.mrb[20].mxu1  ;;  %v4990_v38 = vadd.f32 %v3552_v33, %v1365_v22 }
 0x102   :  { %v3442_v41 = vpop.f32.mrb[21].mxu1  ;;  %v3553_v32 = vpop.f32.mrb[20].mxu0 }
 0x103   :  { %v3443_v42 = vadd.f32 %v3442_v41, %v3441_v34  ;;  %v3444_v43 = vpop.f32.mrb[22].mxu1  ;;  %v3554_v59 = vpop.f32.mrb[21].mxu0 }
 0x104   :  { %v3445_v50 = vpop.f32.mrb[23].mxu1  ;;  %v3555_v60 = vadd.f32 %v3554_v59, %v3553_v32  ;;  %v3556_v1 = vpop.f32.mrb[22].mxu0 }
 0x105   :  { %v1370_v57 = vadd.f32 %v4876_v29, %v3443_v42  ;;  %v3446_v58 = vadd.f32 %v3445_v50, %v3444_v43  ;;  %v3557_v7 = vpop.f32.mrb[23].mxu0  ;;  %v4146_v29 = vld [vmem:[%s5681_s0 + $0x280] ss:$24 sps:$4 sm:$0xff]   ;;  %v4153_v50 = vld [vmem:[%s5681_s0 + $0x2e4] ss:$24 sps:$4 sm:$0xff]  }
 0x106   :  { %1778 = vmatmul.mubr.bf16.gmra.mrb[128].mxu1 %v4140_v30  ;;  %v3558_v10 = vadd.f32 %v3557_v7, %v3556_v1 }
 0x107   :  { %v1373_v4 = vadd.f32 %v4880_v31, %v3446_v58  ;;  %1785 = vmatprep.mubr.bf16.mxu1 %v4144_v47  ;;  %v5001_v9 = vadd.f32 %v3555_v60, %v1370_v57  ;;  %v4147_v31 = vld [vmem:[%s5681_s0 + $0x2b4] ss:$24 sps:$4 sm:$0xff]  }
 0x109   :  { %v3447_v11 = vpop.f32.mrb[24].mxu1  ;;  %v5003_v12 = vadd.f32 %v3558_v10, %v1373_v4 }
 0x10a   :  { %v3448_v13 = vpop.f32.mrb[25].mxu1  ;;  %v3559_v16 = vpop.f32.mrb[24].mxu0 }
 0x10b   :  { %v3449_v14 = vadd.f32 %v3448_v13, %v3447_v11  ;;  %v3450_v15 = vpop.f32.mrb[26].mxu1  ;;  %v3560_v20 = vpop.f32.mrb[25].mxu0 }
 0x10c   :  { %v3451_v17 = vpop.f32.mrb[27].mxu1  ;;  %v3561_v21 = vadd.f32 %v3560_v20, %v3559_v16  ;;  %v3562_v22 = vpop.f32.mrb[26].mxu0 }
 0x10d   :  { %v1378_v18 = vadd.f32 %v3449_v14, %v4912_v44  ;;  %v3452_v19 = vadd.f32 %v3451_v17, %v3450_v15  ;;  %v3563_v33 = vpop.f32.mrb[27].mxu0  ;;  %v4149_v44 = vld [vmem:[%s5681_s0 + $0x2b0] ss:$24 sps:$4 sm:$0xff]  }
 0x10e   :  { %1786 = vmatmul.mubr.bf16.gmra.mrb[132].mxu1 %v4146_v29  ;;  %v3564_v41 = vadd.f32 %v3563_v33, %v3562_v22 }
 0x10f   :  { %v1381_v23 = vadd.f32 %v3452_v19, %v4916_v46  ;;  %1793 = vmatprep.mubr.bf16.mxu1 %v4147_v31  ;;  %v5013_v34 = vadd.f32 %v3561_v21, %v1378_v18 }
 0x111   :  { %v3453_v30 = vpop.f32.mrb[28].mxu1  ;;  %v5015_v42 = vadd.f32 %v3564_v41, %v1381_v23 }
 0x112   :  { %v3454_v43 = vpop.f32.mrb[29].mxu1  ;;  %v3565_v46 = vpop.f32.mrb[28].mxu0 }
 0x113   :  { %v3455_v47 = vadd.f32 %v3454_v43, %v3453_v30  ;;  %v3456_v32 = vpop.f32.mrb[30].mxu1  ;;  %v3566_v60 = vpop.f32.mrb[29].mxu0 }
 0x114   :  { %v3457_v57 = vpop.f32.mrb[31].mxu1  ;;  %v3567_v1 = vadd.f32 %v3566_v60, %v3565_v46  ;;  %v3568_v4 = vpop.f32.mrb[30].mxu0 }
 0x115   :  { %v1386_v58 = vadd.f32 %v4901_v40, %v3455_v47  ;;  %v3458_v59 = vadd.f32 %v3457_v57, %v3456_v32  ;;  %v3569_v10 = vpop.f32.mrb[31].mxu0  ;;  %v4155_v40 = vld [vmem:[%s5681_s0 + $0x2e0] ss:$24 sps:$4 sm:$0xff]  }
 0x116   :  { %1794 = vmatmul.mubr.bf16.gmra.mrb[136].mxu1 %v4149_v44  ;;  %v3570_v13 = vadd.f32 %v3569_v10, %v3568_v4 }
 0x117   :  { %v1389_v7 = vadd.f32 %v4914_v45, %v3458_v59  ;;  %1801 = vmatprep.mubr.bf16.mxu1 %v4153_v50  ;;  %v5025_v11 = vadd.f32 %v3567_v1, %v1386_v58 }
 0x119   :  { %v3459_v29 = vpop.f32.mrb[32].mxu1  ;;  %v5027_v14 = vadd.f32 %v3570_v13, %v1389_v7 }
 0x11a   :  { %v3460_v15 = vpop.f32.mrb[33].mxu1  ;;  %v3571_v17 = vpop.f32.mrb[32].mxu0 }
 0x11b   :  { %v3461_v31 = vadd.f32 %v3460_v15, %v3459_v29  ;;  %v3462_v16 = vpop.f32.mrb[34].mxu1  ;;  %v3572_v20 = vpop.f32.mrb[33].mxu0 }
 0x11c   :  { %v3463_v18 = vpop.f32.mrb[35].mxu1  ;;  %v3573_v21 = vadd.f32 %v3572_v20, %v3571_v17  ;;  %v3574_v22 = vpop.f32.mrb[34].mxu0 }
 0x11d   :  { %v1394_v19 = vadd.f32 %v3461_v31, %v4934_v54  ;;  %v3464_v45 = vadd.f32 %v3463_v18, %v3462_v16  ;;  %v3575_v33 = vpop.f32.mrb[35].mxu0 }
 0x11e   :  { %1802 = vmatmul.mubr.bf16.gmra.mrb[140].mxu1 %v4155_v40  ;;  %v3576_v30 = vadd.f32 %v3575_v33, %v3574_v22 }
 0x11f   :  { %v1397_v23 = vadd.f32 %v3464_v45, %v4938_v56  ;;  %v5034_v41 = vadd.f32 %v3573_v21, %v1394_v19 }
 0x121   :  { %v3465_v43 = vpop.f32.mrb[36].mxu1  ;;  %v5036_v44 = vadd.f32 %v3576_v30, %v1397_v23 }
 0x122   :  { %v3466_v47 = vpop.f32.mrb[37].mxu1  ;;  %v3577_v46 = vpop.f32.mrb[36].mxu0 }
 0x123   :  { %v3467_v32 = vadd.f32 %v3466_v47, %v3465_v43  ;;  %v3468_v50 = vpop.f32.mrb[38].mxu1  ;;  %v3578_v59 = vpop.f32.mrb[37].mxu0 }
 0x124   :  { %v3469_v57 = vpop.f32.mrb[39].mxu1  ;;  %v3579_v60 = vadd.f32 %v3578_v59, %v3577_v46  ;;  %v3580_v1 = vpop.f32.mrb[38].mxu0 }
 0x125   :  { %v1402_v54 = vadd.f32 %v4932_v53, %v3467_v32  ;;  %v3470_v58 = vadd.f32 %v3469_v57, %v3468_v50  ;;  %v3581_v4 = vpop.f32.mrb[39].mxu0 }
 0x126   :  { %v3582_v10 = vadd.f32 %v3581_v4, %v3580_v1 }
 0x127   :  { %v1405_v56 = vadd.f32 %v4936_v55, %v3470_v58  ;;  %v5040_v7 = vadd.f32 %v3579_v60, %v1402_v54 }
 0x129   :  { %v3471_v13 = vpop.f32.mrb[40].mxu1  ;;  %v5042_v29 = vadd.f32 %v3582_v10, %v1405_v56 }
 0x12a   :  { %v3472_v15 = vpop.f32.mrb[41].mxu1  ;;  %v3583_v16 = vpop.f32.mrb[40].mxu0 }
 0x12b   :  { %v3473_v40 = vadd.f32 %v3472_v15, %v3471_v13  ;;  %v3474_v31 = vpop.f32.mrb[42].mxu1  ;;  %v3584_v19 = vpop.f32.mrb[41].mxu0 }
 0x12c   :  { %v3475_v17 = vpop.f32.mrb[43].mxu1  ;;  %v3585_v45 = vadd.f32 %v3584_v19, %v3583_v16  ;;  %v3586_v20 = vpop.f32.mrb[42].mxu0 }
 0x12d   :  { %v1410_v53 = vadd.f32 %v3473_v40, %v4965_v3  ;;  %v3476_v18 = vadd.f32 %v3475_v17, %v3474_v31  ;;  %v3587_v21 = vpop.f32.mrb[43].mxu0 }
 0x12e   :  { %v3588_v23 = vadd.f32 %v3587_v21, %v3586_v20 }
 0x12f   :  { %v1413_v55 = vadd.f32 %v3476_v18, %v4972_v6  ;;  %v5046_v22 = vadd.f32 %v3585_v45, %v1410_v53 }
 0x131   :  { %v3477_v33 = vpop.f32.mrb[44].mxu1  ;;  %v5048_v30 = vadd.f32 %v3588_v23, %v1413_v55 }
 0x132   :  { %v3478_v43 = vpop.f32.mrb[45].mxu1  ;;  %v3589_v50 = vpop.f32.mrb[44].mxu0 }
 0x133   :  { %v3479_v47 = vadd.f32 %v3478_v43, %v3477_v33  ;;  %v3480_v32 = vpop.f32.mrb[46].mxu1  ;;  %v3590_v54 = vpop.f32.mrb[45].mxu0 }
 0x134   :  { %v3481_v46 = vpop.f32.mrb[47].mxu1  ;;  %v3591_v58 = vadd.f32 %v3590_v54, %v3589_v50  ;;  %v3592_v59 = vpop.f32.mrb[46].mxu0 }
 0x135   :  { %v1418_v3 = vadd.f32 %v4963_v2, %v3479_v47  ;;  %v3482_v57 = vadd.f32 %v3481_v46, %v3480_v32  ;;  %v3593_v60 = vpop.f32.mrb[47].mxu0 }
 0x136   :  { %v3594_v56 = vadd.f32 %v3593_v60, %v3592_v59 }
 0x137   :  { %v1421_v6 = vadd.f32 %v4970_v5, %v3482_v57  ;;  %v5052_v1 = vadd.f32 %v3591_v58, %v1418_v3 }
 0x139   :  { %v3483_v4 = vpop.f32.mrb[48].mxu1  ;;  %v5054_v10 = vadd.f32 %v3594_v56, %v1421_v6 }
 0x13a   :  { %v3484_v13 = vpop.f32.mrb[49].mxu1  ;;  %v3595_v31 = vpop.f32.mrb[48].mxu0 }
 0x13b   :  { %v3485_v15 = vadd.f32 %v3484_v13, %v3483_v4  ;;  %v3486_v40 = vpop.f32.mrb[50].mxu1  ;;  %v3596_v53 = vpop.f32.mrb[49].mxu0 }
 0x13c   :  { %v3487_v16 = vpop.f32.mrb[51].mxu1  ;;  %v3597_v18 = vadd.f32 %v3596_v53, %v3595_v31  ;;  %v3598_v19 = vpop.f32.mrb[50].mxu0 }
 0x13d   :  { %v1426_v2 = vadd.f32 %v3485_v15, %v4870_v26  ;;  %v3488_v17 = vadd.f32 %v3487_v16, %v3486_v40  ;;  %v3599_v45 = vpop.f32.mrb[51].mxu0 }
 0x13e   :  { %v3600_v55 = vadd.f32 %v3599_v45, %v3598_v19 }
 0x13f   :  { %v1429_v5 = vadd.f32 %v3488_v17, %v4874_v28  ;;  %v5058_v20 = vadd.f32 %v3597_v18, %v1426_v2 }
 0x141   :  { %v3489_v21 = vpop.f32.mrb[52].mxu1  ;;  %v5060_v23 = vadd.f32 %v3600_v55, %v1429_v5 }
 0x142   :  { %v3490_v33 = vpop.f32.mrb[53].mxu1  ;;  %v3601_v32 = vpop.f32.mrb[52].mxu0 }
 0x143   :  { %v3491_v43 = vadd.f32 %v3490_v33, %v3489_v21  ;;  %v3492_v47 = vpop.f32.mrb[54].mxu1  ;;  %v3602_v3 = vpop.f32.mrb[53].mxu0 }
 0x144   :  { %v3493_v50 = vpop.f32.mrb[55].mxu1  ;;  %v3603_v57 = vadd.f32 %v3602_v3, %v3601_v32  ;;  %v3604_v54 = vpop.f32.mrb[54].mxu0 }
 0x145   :  { %v1434_v26 = vadd.f32 %v4868_v25, %v3491_v43  ;;  %v3494_v46 = vadd.f32 %v3493_v50, %v3492_v47  ;;  %v3605_v58 = vpop.f32.mrb[55].mxu0 }
 0x146   :  { %v3606_v6 = vadd.f32 %v3605_v58, %v3604_v54 }
 0x147   :  { %v1437_v28 = vadd.f32 %v4872_v27, %v3494_v46  ;;  %v5064_v59 = vadd.f32 %v3603_v57, %v1434_v26 }
 0x149   :  { %v3495_v60 = vpop.f32.mrb[56].mxu1  ;;  %v5066_v56 = vadd.f32 %v3606_v6, %v1437_v28 }
 0x14a   :  { %v3496_v4 = vpop.f32.mrb[57].mxu1  ;;  %v3607_v40 = vpop.f32.mrb[56].mxu0 }
 0x14b   :  { %v3497_v13 = vadd.f32 %v3496_v4, %v3495_v60  ;;  %v3498_v15 = vpop.f32.mrb[58].mxu1  ;;  %v3608_v2 = vpop.f32.mrb[57].mxu0 }
 0x14c   :  { %v3499_v31 = vpop.f32.mrb[59].mxu1  ;;  %v3609_v17 = vadd.f32 %v3608_v2, %v3607_v40  ;;  %v3610_v53 = vpop.f32.mrb[58].mxu0 }
 0x14d   :  { %v1442_v25 = vadd.f32 %v3497_v13, %v4892_v36  ;;  %v3500_v16 = vadd.f32 %v3499_v31, %v3498_v15  ;;  %v3611_v18 = vpop.f32.mrb[59].mxu0 }
 0x14e   :  { %v3612_v5 = vadd.f32 %v3611_v18, %v3610_v53 }
 0x14f   :  { %v1445_v27 = vadd.f32 %v3500_v16, %v4899_v39  ;;  %v5070_v19 = vadd.f32 %v3609_v17, %v1442_v25 }
 0x151   :  { %v3501_v45 = vpop.f32.mrb[60].mxu1  ;;  %v5072_v55 = vadd.f32 %v3612_v5, %v1445_v27 }
 0x152   :  { %v3502_v21 = vpop.f32.mrb[61].mxu1 }
 0x153   :  { %v3503_v33 = vadd.f32 %v3502_v21, %v3501_v45  ;;  %v3504_v43 = vpop.f32.mrb[62].mxu1  ;;  %v3613_v47 = vpop.f32.mrb[60].mxu0 }
 0x154   :  { %v3505_v32 = vpop.f32.mrb[63].mxu1  ;;  %v3614_v26 = vpop.f32.mrb[61].mxu0 }
 0x155   :  { %v1450_v36 = vadd.f32 %v4890_v35, %v3503_v33  ;;  %v3506_v50 = vadd.f32 %v3505_v32, %v3504_v43  ;;  %v3615_v46 = vadd.f32 %v3614_v26, %v3613_v47  ;;  %v3616_v3 = vpop.f32.mrb[62].mxu0 }
 0x156   :  { %v3617_v57 = vpop.f32.mrb[63].mxu0 }
 0x157   :  { %v1453_v39 = vadd.f32 %v4894_v37, %v3506_v50  ;;  %v5076_v54 = vadd.f32 %v3615_v46, %v1450_v36  ;;  %v3618_v28 = vadd.f32 %v3617_v57, %v3616_v3 }
 0x159   :  { %v3507_v58 = vpop.f32.mrb[64].mxu1  ;;  %v5078_v6 = vadd.f32 %v3618_v28, %v1453_v39 }
 0x15a   :  { %v3508_v60 = vpop.f32.mrb[65].mxu1 }
 0x15b   :  { %v3509_v4 = vadd.f32 %v3508_v60, %v3507_v58  ;;  %v3510_v13 = vpop.f32.mrb[66].mxu1  ;;  %v3619_v15 = vpop.f32.mrb[64].mxu0 }
 0x15c   :  { %v3511_v40 = vpop.f32.mrb[67].mxu1  ;;  %v3620_v25 = vpop.f32.mrb[65].mxu0 }
 0x15d   :  { %v1458_v35 = vadd.f32 %v3509_v4, %v4923_v49  ;;  %v3512_v31 = vadd.f32 %v3511_v40, %v3510_v13  ;;  %v3621_v16 = vadd.f32 %v3620_v25, %v3619_v15  ;;  %v3622_v2 = vpop.f32.mrb[66].mxu0 }
 0x15e   :  { %v3623_v17 = vpop.f32.mrb[67].mxu0 }
 0x15f   :  { %v1461_v37 = vadd.f32 %v3512_v31, %v4930_v52  ;;  %v5082_v53 = vadd.f32 %v3621_v16, %v1458_v35  ;;  %v3624_v27 = vadd.f32 %v3623_v17, %v3622_v2 }
 0x161   :  { %v3513_v18 = vpop.f32.mrb[68].mxu1  ;;  %v5084_v5 = vadd.f32 %v3624_v27, %v1461_v37 }
 0x162   :  { %v3514_v45 = vpop.f32.mrb[69].mxu1 }
 0x163   :  { %v3515_v21 = vadd.f32 %v3514_v45, %v3513_v18  ;;  %v3516_v33 = vpop.f32.mrb[70].mxu1  ;;  %v3625_v43 = vpop.f32.mrb[68].mxu0 }
 0x164   :  { %v3517_v47 = vpop.f32.mrb[71].mxu1  ;;  %v3626_v36 = vpop.f32.mrb[69].mxu0 }
 0x165   :  { %v1466_v49 = vadd.f32 %v4921_v48, %v3515_v21  ;;  %v3518_v32 = vadd.f32 %v3517_v47, %v3516_v33  ;;  %v3627_v50 = vadd.f32 %v3626_v36, %v3625_v43  ;;  %v3628_v26 = vpop.f32.mrb[70].mxu0 }
 0x166   :  { %v3629_v46 = vpop.f32.mrb[71].mxu0 }
 0x167   :  { %v1469_v52 = vadd.f32 %v4928_v51, %v3518_v32  ;;  %v5088_v3 = vadd.f32 %v3627_v50, %v1466_v49  ;;  %v3630_v39 = vadd.f32 %v3629_v46, %v3628_v26 }
 0x169   :  { %v3519_v57 = vpop.f32.mrb[72].mxu1  ;;  %v5090_v28 = vadd.f32 %v3630_v39, %v1469_v52 }
 0x16a   :  { %v3520_v58 = vpop.f32.mrb[73].mxu1 }
 0x16b   :  { %v3521_v60 = vadd.f32 %v3520_v58, %v3519_v57  ;;  %v3522_v4 = vpop.f32.mrb[74].mxu1  ;;  %v3631_v13 = vpop.f32.mrb[72].mxu0 }
 0x16c   :  { %v3523_v15 = vpop.f32.mrb[75].mxu1  ;;  %v3632_v35 = vpop.f32.mrb[73].mxu0 }
 0x16d   :  { %v1474_v48 = vadd.f32 %v3521_v60, %v4954_v62  ;;  %v3524_v40 = vadd.f32 %v3523_v15, %v3522_v4  ;;  %v3633_v31 = vadd.f32 %v3632_v35, %v3631_v13  ;;  %v3634_v25 = vpop.f32.mrb[74].mxu0  ;;  %v4175_v35 = vld [vmem:[%s5688_s7 + $0x10] ss:$8 sps:$4 sm:$0xff]  }
 0x16e   :  { %v3635_v16 = vpop.f32.mrb[75].mxu0 }
 0x16f   :  { %v1477_v51 = vadd.f32 %v3524_v40, %v4958_v0  ;;  %v5094_v2 = vadd.f32 %v3633_v31, %v1474_v48  ;;  %v3636_v37 = vadd.f32 %v3635_v16, %v3634_v25  ;;  %v4174_v40 = vld [vmem:[%s5688_s7] ss:$8 sps:$4 sm:$0xff]   ;;  %v4177_v31 = vld [vmem:[%s5688_s7 + $0x84] ss:$8 sps:$4 sm:$0xff]  }
 0x170   :  { %3837 = vmatprep.subr.bf16.mxu1 %v4174_v40  ;;  %3885 = vmatprep.subr.bf16.mxu0 %v4177_v31 }
 0x171   :  { %v3525_v17 = vpop.f32.mrb[76].mxu1  ;;  %v5096_v27 = vadd.f32 %v3636_v37, %v1477_v51  ;;  %3838 = vmatpush3.bf16.msra.mxu1 %v4174_v40 }
 0x172   :  { %v3526_v18 = vpop.f32.mrb[77].mxu1  ;;  %3839 = vmatprep.subr.bf16.mxu1 %v4175_v35 }
 0x173   :  { %v3527_v45 = vadd.f32 %v3526_v18, %v3525_v17  ;;  %v3528_v21 = vpop.f32.mrb[78].mxu1  ;;  %v3637_v33 = vpop.f32.mrb[76].mxu0  ;;  %v4176_v18 = vld [vmem:[%s5688_s7 + $0x20] ss:$8 sps:$4 sm:$0xff]  }
 0x174   :  { %v3529_v43 = vpop.f32.mrb[79].mxu1  ;;  %v3638_v49 = vpop.f32.mrb[77].mxu0 }
 0x175   :  { %v1482_v62 = vadd.f32 %v4952_v61, %v3527_v45  ;;  %v3530_v47 = vadd.f32 %v3529_v43, %v3528_v21  ;;  %v3639_v32 = vadd.f32 %v3638_v49, %v3637_v33  ;;  %v3640_v36 = vpop.f32.mrb[78].mxu0  ;;  %v5107_v61 = vld [vmem:[%s5685_s4] ss:$0 sm:$0xff]  ;;  %3840 = vmatpush3.bf16.msra.mxu1 %v4175_v35 }
 0x176   :  { %v3641_v50 = vpop.f32.mrb[79].mxu0  ;;  %3841 = vmatprep.subr.bf16.mxu1 %v4176_v18 }
 0x177   :  { %v1485_v0 = vadd.f32 %v4956_v63, %v3530_v47  ;;  %v5100_v26 = vadd.f32 %v3639_v32, %v1482_v62  ;;  %v3642_v52 = vadd.f32 %v3641_v50, %v3640_v36  ;;  %v4178_v62 = vld [vmem:[%s5688_s7 + $0x94] ss:$8 sps:$4 sm:$0xff]   ;;  %v4179_v32 = vld [vmem:[%s5688_s7 + $0x30] ss:$8 sps:$4 sm:$0xff]   ;;  %v4180_v50 = vld [vmem:[%s5688_s7 + $0xa4] ss:$8 sps:$4 sm:$0xff]  }
 0x179   :  { %v3659_v46 = vpop.f32.mrb[80].mxu1  ;;  %v5102_v39 = vadd.f32 %v3642_v52, %v1485_v0  ;;  %3842 = vmatpush3.bf16.msra.mxu1 %v4176_v18 }
 0x17a   :  { %v3660_v57 = vpop.f32.mrb[81].mxu1  ;;  %3843 = vmatprep.subr.bf16.mxu1 %v4179_v32 }
 0x17b   :  { %v3661_v58 = vadd.f32 %v3660_v57, %v3659_v46  ;;  %v3662_v60 = vpop.f32.mrb[82].mxu1 }
 0x17c   :  { %v3663_v4 = vpop.f32.mrb[83].mxu1 }
 0x17d   :  { %v1684_v13 = vadd.f32 %v3661_v58, %v4988_v24  ;;  %v3664_v15 = vadd.f32 %v3663_v4, %v3662_v60  ;;  %3844 = vmatpush3.bf16.msra.mxu1 %v4179_v32 }
 0x17f   :  { %v1817_v63 = vadd.f32 %v5107_v61, %v1684_v13  ;;  %v1687_v48 = vadd.f32 %v3664_v15, %v4990_v38  ;;  %v4181_v15 = vld [vmem:[%s5688_s7 + $0xb4] ss:$8 sps:$4 sm:$0xff]  }
 0x181   :  { %v1849_v25 = vmax.f32 %v1817_v63, 0.0  ;;  %v1818_v24 = vadd.f32 %v5107_v61, %v1687_v48  ;;  %v3665_v51 = vpop.f32.mrb[84].mxu1 }
 0x182   :  { %v3666_v16 = vpop.f32.mrb[85].mxu1 }
 0x183   :  { %1881 = vst [vmem:[#allocation2] sm:$0xff] %v1849_v25  ;;  %v1850_v38 = vmax.f32 %v1818_v24, 0.0  ;;  %v3667_v37 = vadd.f32 %v3666_v16, %v3665_v51  ;;  %v3668_v17 = vpop.f32.mrb[86].mxu1 }
 0x184   :  { %v3669_v45 = vpop.f32.mrb[87].mxu1 }
 0x185   :  { %1882 = vst [vmem:[#allocation2 + $0x20] sm:$0xff] %v1850_v38  ;;  %v1913_v21 = vpack.c.bf16 %v1850_v38, %v1849_v25  ;;  %v1692_v33 = vadd.f32 %v3667_v37, %v5001_v9  ;;  %v3670_v43 = vadd.f32 %v3669_v45, %v3668_v17 }
 0x187   :  { %v1819_v47 = vadd.f32 %v5107_v61, %v1692_v33  ;;  %v1695_v49 = vadd.f32 %v3670_v43, %v5003_v12  ;;  %2070 = vmatmul.mubr.bf16.vlgmr.msra.gmra.mrb[80].mxu0 %v1913_v21 }
 0x188   :  { %2079 = vmatprep.mubr.bf16.mxu0 %v4342_v8  ;;  %3886 = vmatpush3.bf16.msra.mxu0 %v4177_v31 }
 0x189   :  { %v1851_v9 = vmax.f32 %v1819_v47, 0.0  ;;  %v1820_v36 = vadd.f32 %v5107_v61, %v1695_v49  ;;  %v3671_v0 = vpop.f32.mrb[88].mxu1  ;;  %3887 = vmatprep.subr.bf16.mxu0 %v4178_v62 }
 0x18a   :  { %v3672_v52 = vpop.f32.mrb[89].mxu1 }
 0x18b   :  { %1883 = vst [vmem:[#allocation2 + $0x40] sm:$0xff] %v1851_v9  ;;  %v1852_v12 = vmax.f32 %v1820_v36, 0.0  ;;  %v3673_v46 = vadd.f32 %v3672_v52, %v3671_v0  ;;  %v3674_v57 = vpop.f32.mrb[90].mxu1 }
 0x18c   :  { %v3675_v58 = vpop.f32.mrb[91].mxu1  ;;  %3888 = vmatpush3.bf16.msra.mxu0 %v4178_v62 }
 0x18d   :  { %1884 = vst [vmem:[#allocation2 + $0x60] sm:$0xff] %v1852_v12  ;;  %v1700_v60 = vadd.f32 %v3673_v46, %v5013_v34  ;;  %v3676_v4 = vadd.f32 %v3675_v58, %v3674_v57  ;;  %v1914_v13 = vpack.c.bf16 %v1852_v12, %v1851_v9  ;;  %3889 = vmatprep.subr.bf16.mxu0 %v4180_v50 }
 0x18f   :  { %v1821_v63 = vadd.f32 %v5107_v61, %v1700_v60  ;;  %v1703_v48 = vadd.f32 %v3676_v4, %v5015_v42  ;;  %2080 = vmatmul.mubr.bf16.gmra.mrb[84].mxu0 %v1914_v13 }
 0x190   :  { %2089 = vmatprep.mubr.bf16.mxu0 %v4342_v8  ;;  %3890 = vmatpush3.bf16.msra.mxu0 %v4180_v50 }
 0x191   :  { %v1853_v40 = vmax.f32 %v1821_v63, 0.0  ;;  %v1822_v35 = vadd.f32 %v5107_v61, %v1703_v48  ;;  %v3677_v34 = vpop.f32.mrb[92].mxu1  ;;  %3891 = vmatprep.subr.bf16.mxu0 %v4181_v15 }
 0x192   :  { %v3678_v31 = vpop.f32.mrb[93].mxu1 }
 0x193   :  { %1885 = vst [vmem:[#allocation2 + $0x80] sm:$0xff] %v1853_v40  ;;  %v1854_v25 = vmax.f32 %v1822_v35, 0.0  ;;  %v3679_v24 = vadd.f32 %v3678_v31, %v3677_v34  ;;  %v3680_v51 = vpop.f32.mrb[94].mxu1 }
 0x194   :  { %v3681_v16 = vpop.f32.mrb[95].mxu1  ;;  %3892 = vmatpush3.bf16.msra.mxu0 %v4181_v15 }
 0x195   :  { %1886 = vst [vmem:[#allocation2 + $0xa0] sm:$0xff] %v1854_v25  ;;  %v1708_v38 = vadd.f32 %v3679_v24, %v5025_v11  ;;  %v3682_v42 = vadd.f32 %v3681_v16, %v3680_v51  ;;  %v1915_v37 = vpack.c.bf16 %v1854_v25, %v1853_v40 }
 0x197   :  { %v1823_v17 = vadd.f32 %v5107_v61, %v1708_v38  ;;  %v1711_v18 = vadd.f32 %v3682_v42, %v5027_v14  ;;  %2090 = vmatmul.mubr.bf16.gmra.mrb[88].mxu0 %v1915_v37 }
 0x198   :  { %2099 = vmatprep.mubr.bf16.mxu0 %v4342_v8 }
 0x199   :  { %v1855_v45 = vmax.f32 %v1823_v17, 0.0  ;;  %v1824_v21 = vadd.f32 %v5107_v61, %v1711_v18  ;;  %v3683_v33 = vpop.f32.mrb[96].mxu1 }
 0x19a   :  { %v3684_v43 = vpop.f32.mrb[97].mxu1 }
 0x19b   :  { %1887 = vst [vmem:[#allocation2 + $0xc0] sm:$0xff] %v1855_v45  ;;  %v1856_v62 = vmax.f32 %v1824_v21, 0.0  ;;  %v3685_v47 = vadd.f32 %v3684_v43, %v3683_v33  ;;  %v3686_v49 = vpop.f32.mrb[98].mxu1 }
 0x19c   :  { %v3687_v32 = vpop.f32.mrb[99].mxu1 }
 0x19d   :  { %1888 = vst [vmem:[#allocation2 + $0xe0] sm:$0xff] %v1856_v62  ;;  %v1716_v11 = vadd.f32 %v3685_v47, %v5034_v41  ;;  %v3688_v9 = vadd.f32 %v3687_v32, %v3686_v49  ;;  %v1916_v36 = vpack.c.bf16 %v1856_v62, %v1855_v45 }
 0x19f   :  { %v1825_v14 = vadd.f32 %v5107_v61, %v1716_v11  ;;  %v1719_v0 = vadd.f32 %v3688_v9, %v5036_v44  ;;  %2100 = vmatmul.mubr.bf16.gmra.mrb[92].mxu0 %v1916_v36 }
 0x1a0   :  { %2109 = vmatprep.mubr.bf16.mxu0 %v4342_v8 }
 0x1a1   :  { %v1857_v50 = vmax.f32 %v1825_v14, 0.0  ;;  %v1826_v52 = vadd.f32 %v5107_v61, %v1719_v0  ;;  %v3689_v12 = vpop.f32.mrb[100].mxu1 }
 0x1a2   :  { %v3690_v46 = vpop.f32.mrb[101].mxu1 }
 0x1a3   :  { %1889 = vst [vmem:[#allocation2 + $0x100] sm:$0xff] %v1857_v50  ;;  %v1858_v57 = vmax.f32 %v1826_v52, 0.0  ;;  %v3691_v58 = vadd.f32 %v3690_v46, %v3689_v12  ;;  %v3692_v60 = vpop.f32.mrb[102].mxu1 }
 0x1a4   :  { %v3693_v4 = vpop.f32.mrb[103].mxu1 }
 0x1a5   :  { %1890 = vst [vmem:[#allocation2 + $0x120] sm:$0xff] %v1858_v57  ;;  %v1724_v41 = vadd.f32 %v3691_v58, %v5040_v7  ;;  %v3694_v13 = vadd.f32 %v3693_v4, %v3692_v60  ;;  %v1917_v15 = vpack.c.bf16 %v1858_v57, %v1857_v50 }
 0x1a7   :  { %v1827_v44 = vadd.f32 %v5107_v61, %v1724_v41  ;;  %v1727_v63 = vadd.f32 %v3694_v13, %v5042_v29  ;;  %2110 = vmatmul.mubr.bf16.gmra.mrb[96].mxu0 %v1917_v15 }
 0x1a8   :  { %2119 = vmatprep.mubr.bf16.mxu0 %v4342_v8 }
 0x1a9   :  { %v1859_v48 = vmax.f32 %v1827_v44, 0.0  ;;  %v1828_v40 = vadd.f32 %v5107_v61, %v1727_v63  ;;  %v3695_v35 = vpop.f32.mrb[104].mxu1 }
 0x1aa   :  { %v3696_v34 = vpop.f32.mrb[105].mxu1 }
 0x1ab   :  { %1891 = vst [vmem:[#allocation2 + $0x140] sm:$0xff] %v1859_v48  ;;  %v1860_v31 = vmax.f32 %v1828_v40, 0.0  ;;  %v3697_v25 = vadd.f32 %v3696_v34, %v3695_v35  ;;  %v3698_v24 = vpop.f32.mrb[106].mxu1 }
 0x1ac   :  { %v3699_v51 = vpop.f32.mrb[107].mxu1 }
 0x1ad   :  { %1892 = vst [vmem:[#allocation2 + $0x160] sm:$0xff] %v1860_v31  ;;  %v1732_v7 = vadd.f32 %v3697_v25, %v5046_v22  ;;  %v3700_v16 = vadd.f32 %v3699_v51, %v3698_v24  ;;  %v1918_v38 = vpack.c.bf16 %v1860_v31, %v1859_v48 }
 0x1af   :  { %v1829_v29 = vadd.f32 %v5107_v61, %v1732_v7  ;;  %v1735_v42 = vadd.f32 %v3700_v16, %v5048_v30  ;;  %2120 = vmatmul.mubr.bf16.gmra.mrb[100].mxu0 %v1918_v38 }
 0x1b0   :  { %2129 = vmatprep.mubr.bf16.mxu0 %v4342_v8 }
 0x1b1   :  { %v1861_v37 = vmax.f32 %v1829_v29, 0.0  ;;  %v1830_v17 = vadd.f32 %v5107_v61, %v1735_v42  ;;  %v3701_v18 = vpop.f32.mrb[108].mxu1 }
 0x1b2   :  { %v3702_v45 = vpop.f32.mrb[109].mxu1 }
 0x1b3   :  { %1893 = vst [vmem:[#allocation2 + $0x180] sm:$0xff] %v1861_v37  ;;  %v1862_v21 = vmax.f32 %v1830_v17, 0.0  ;;  %v3703_v33 = vadd.f32 %v3702_v45, %v3701_v18  ;;  %v3704_v43 = vpop.f32.mrb[110].mxu1 }
 0x1b4   :  { %v3705_v62 = vpop.f32.mrb[111].mxu1 }
 0x1b5   :  { %1894 = vst [vmem:[#allocation2 + $0x1a0] sm:$0xff] %v1862_v21  ;;  %v1740_v22 = vadd.f32 %v3703_v33, %v5052_v1  ;;  %v3706_v47 = vadd.f32 %v3705_v62, %v3704_v43  ;;  %v1919_v49 = vpack.c.bf16 %v1862_v21, %v1861_v37 }
 0x1b7   :  { %v1831_v30 = vadd.f32 %v5107_v61, %v1740_v22  ;;  %v1743_v32 = vadd.f32 %v3706_v47, %v5054_v10  ;;  %2130 = vmatmul.mubr.bf16.gmra.mrb[104].mxu0 %v1919_v49 }
 0x1b8   :  { %2139 = vmatprep.mubr.bf16.mxu0 %v4342_v8 }
 0x1b9   :  { %v1863_v11 = vmax.f32 %v1831_v30, 0.0  ;;  %v1832_v9 = vadd.f32 %v5107_v61, %v1743_v32  ;;  %v3707_v36 = vpop.f32.mrb[112].mxu1 }
 0x1ba   :  { %v3708_v14 = vpop.f32.mrb[113].mxu1 }
 0x1bb   :  { %1895 = vst [vmem:[#allocation2 + $0x1c0] sm:$0xff] %v1863_v11  ;;  %v1864_v0 = vmax.f32 %v1832_v9, 0.0  ;;  %v3709_v50 = vadd.f32 %v3708_v14, %v3707_v36  ;;  %v3710_v52 = vpop.f32.mrb[114].mxu1 }
 0x1bc   :  { %v3711_v12 = vpop.f32.mrb[115].mxu1 }
 0x1bd   :  { %1896 = vst [vmem:[#allocation2 + $0x1e0] sm:$0xff] %v1864_v0  ;;  %v1748_v1 = vadd.f32 %v3709_v50, %v5058_v20  ;;  %v3712_v46 = vadd.f32 %v3711_v12, %v3710_v52  ;;  %v1920_v57 = vpack.c.bf16 %v1864_v0, %v1863_v11  ;;  %v4182_v0 = vld [vmem:[%s5688_s7 + $0x40] ss:$8 sps:$4 sm:$0xff]  }
 0x1be   :  { %3845 = vmatprep.subr.bf16.mxu1 %v4182_v0 }
 0x1bf   :  { %v1833_v10 = vadd.f32 %v5107_v61, %v1748_v1  ;;  %v1751_v58 = vadd.f32 %v3712_v46, %v5060_v23  ;;  %2140 = vmatmul.mubr.bf16.gmra.mrb[108].mxu0 %v1920_v57  ;;  %3846 = vmatpush3.bf16.msra.mxu1 %v4182_v0  ;;  %v1947_v0 = vlaneseq }
 0x1c0   :  { %2149 = vmatprep.mubr.bf16.mxu0 %v4342_v8 }
 0x1c1   :  { %v1865_v60 = vmax.f32 %v1833_v10, 0.0  ;;  %v1834_v4 = vadd.f32 %v5107_v61, %v1751_v58  ;;  %v3713_v41 = vpop.f32.mrb[116].mxu1  ;;  %v4184_v10 = vld [vmem:[%s5688_s7 + $0x50] ss:$8 sps:$4 sm:$0xff]  }
 0x1c2   :  { %v3714_v13 = vpop.f32.mrb[117].mxu1  ;;  %3847 = vmatprep.subr.bf16.mxu1 %v4184_v10 }
 0x1c3   :  { %1897 = vst [vmem:[#allocation2 + $0x200] sm:$0xff] %v1865_v60  ;;  %v1866_v15 = vmax.f32 %v1834_v4, 0.0  ;;  %v3715_v44 = vadd.f32 %v3714_v13, %v3713_v41  ;;  %v3716_v63 = vpop.f32.mrb[118].mxu1  ;;  %v4185_v4 = vld [vmem:[%s5688_s7 + $0xd4] ss:$8 sps:$4 sm:$0xff]   ;;  %3848 = vmatpush3.bf16.msra.mxu1 %v4184_v10 }
 0x1c4   :  { %v3717_v48 = vpop.f32.mrb[119].mxu1 }
 0x1c5   :  { %1898 = vst [vmem:[#allocation2 + $0x220] sm:$0xff] %v1866_v15  ;;  %v1756_v20 = vadd.f32 %v3715_v44, %v5064_v59  ;;  %v3718_v40 = vadd.f32 %v3717_v48, %v3716_v63  ;;  %v1921_v35 = vpack.c.bf16 %v1866_v15, %v1865_v60 }
 0x1c7   :  { %v1835_v23 = vadd.f32 %v5107_v61, %v1756_v20  ;;  %v1759_v34 = vadd.f32 %v3718_v40, %v5066_v56  ;;  %2150 = vmatmul.mubr.bf16.gmra.mrb[112].mxu0 %v1921_v35  ;;  %v4187_v20 = vld [vmem:[%s5688_s7 + $0xe4] ss:$8 sps:$4 sm:$0xff]  }
 0x1c8   :  { %2159 = vmatprep.mubr.bf16.mxu0 %v4342_v8 }
 0x1c9   :  { %v1867_v31 = vmax.f32 %v1835_v23, 0.0  ;;  %v1836_v25 = vadd.f32 %v5107_v61, %v1759_v34  ;;  %v3719_v24 = vpop.f32.mrb[120].mxu1 }
 0x1ca   :  { %v3720_v51 = vpop.f32.mrb[121].mxu1 }
 0x1cb   :  { %1899 = vst [vmem:[#allocation2 + $0x240] sm:$0xff] %v1867_v31  ;;  %v1868_v7 = vmax.f32 %v1836_v25, 0.0  ;;  %v3721_v16 = vadd.f32 %v3720_v51, %v3719_v24  ;;  %v3722_v38 = vpop.f32.mrb[122].mxu1  ;;  %v4189_v51 = vld [vmem:[%s5688_s7 + $0xf4] ss:$8 sps:$4 sm:$0xff]  }
 0x1cc   :  { %v3723_v29 = vpop.f32.mrb[123].mxu1 }
 0x1cd   :  { %1900 = vst [vmem:[#allocation2 + $0x260] sm:$0xff] %v1868_v7  ;;  %v1764_v59 = vadd.f32 %v3721_v16, %v5070_v19  ;;  %v3724_v42 = vadd.f32 %v3723_v29, %v3722_v38  ;;  %v1922_v37 = vpack.c.bf16 %v1868_v7, %v1867_v31  ;;  %v4188_v31 = vld [vmem:[%s5688_s7 + $0x70] ss:$8 sps:$4 sm:$0xff]  }
 0x1cf   :  { %v1837_v56 = vadd.f32 %v5107_v61, %v1764_v59  ;;  %v1767_v17 = vadd.f32 %v3724_v42, %v5072_v55  ;;  %2160 = vmatmul.mubr.bf16.gmra.mrb[116].mxu0 %v1922_v37 }
 0x1d0   :  { %2169 = vmatprep.mubr.bf16.mxu0 %v4342_v8 }
 0x1d1   :  { %v1869_v18 = vmax.f32 %v1837_v56, 0.0  ;;  %v1838_v45 = vadd.f32 %v5107_v61, %v1767_v17  ;;  %v3725_v21 = vpop.f32.mrb[124].mxu1 }
 0x1d2   :  { %v3726_v33 = vpop.f32.mrb[125].mxu1 }
 0x1d3   :  { %1901 = vst [vmem:[#allocation2 + $0x280] sm:$0xff] %v1869_v18  ;;  %v1870_v43 = vmax.f32 %v1838_v45, 0.0  ;;  %v3727_v62 = vadd.f32 %v3726_v33, %v3725_v21  ;;  %v3728_v22 = vpop.f32.mrb[126].mxu1 }
 0x1d4   :  { %v3729_v47 = vpop.f32.mrb[127].mxu1 }
 0x1d5   :  { %1902 = vst [vmem:[#allocation2 + $0x2a0] sm:$0xff] %v1870_v43  ;;  %v1772_v19 = vadd.f32 %v3727_v62, %v5076_v54  ;;  %v3730_v49 = vadd.f32 %v3729_v47, %v3728_v22  ;;  %v1923_v30 = vpack.c.bf16 %v1870_v43, %v1869_v18 }
 0x1d7   :  { %v1839_v55 = vadd.f32 %v5107_v61, %v1772_v19  ;;  %v1775_v32 = vadd.f32 %v3730_v49, %v5078_v6  ;;  %2170 = vmatmul.mubr.bf16.gmra.mrb[120].mxu0 %v1923_v30  ;;  %v4183_v6 = vld [vmem:[%s5688_s7 + $0xc4] ss:$8 sps:$4 sm:$0xff]  }
 0x1d8   :  { %2179 = vmatprep.mubr.bf16.mxu0 %v4342_v8  ;;  %3893 = vmatprep.subr.bf16.mxu0 %v4183_v6 }
 0x1d9   :  { %v1871_v11 = vmax.f32 %v1839_v55, 0.0  ;;  %v1840_v9 = vadd.f32 %v5107_v61, %v1775_v32  ;;  %v3731_v36 = vpop.f32.mrb[128].mxu1  ;;  %3894 = vmatpush3.bf16.msra.mxu0 %v4183_v6 }
 0x1da   :  { %v3732_v14 = vpop.f32.mrb[129].mxu1  ;;  %3895 = vmatprep.subr.bf16.mxu0 %v4185_v4 }
 0x1db   :  { %1903 = vst [vmem:[#allocation2 + $0x2c0] sm:$0xff] %v1871_v11  ;;  %v1872_v54 = vmax.f32 %v1840_v9, 0.0  ;;  %v3733_v50 = vadd.f32 %v3732_v14, %v3731_v36  ;;  %v3734_v52 = vpop.f32.mrb[130].mxu1 }
 0x1dc   :  { %v3735_v12 = vpop.f32.mrb[131].mxu1 }
 0x1dd   :  { %1904 = vst [vmem:[#allocation2 + $0x2e0] sm:$0xff] %v1872_v54  ;;  %v1780_v1 = vadd.f32 %v3733_v50, %v5082_v53  ;;  %v3736_v46 = vadd.f32 %v3735_v12, %v3734_v52  ;;  %v1924_v57 = vpack.c.bf16 %v1872_v54, %v1871_v11  ;;  %3896 = vmatpush3.bf16.msra.mxu0 %v4185_v4  ;;  %v1948_v54 = vshrl.u32 %v1947_v0, 7  ;;  %v1945_v50 = vld [vmem:[%s5687_s6] sm:$0x3] }
 0x1de   :  { %3897 = vmatprep.subr.bf16.mxu0 %v4187_v20 }
 0x1df   :  { %v1841_v58 = vadd.f32 %v5107_v61, %v1780_v1  ;;  %v1783_v60 = vadd.f32 %v3736_v46, %v5084_v5  ;;  %2180 = vmatmul.mubr.bf16.gmra.mrb[124].mxu0 %v1924_v57  ;;  %v4186_v5 = vld [vmem:[%s5688_s7 + $0x60] ss:$8 sps:$4 sm:$0xff]   ;;  %v1953_v52 = vsub.s32 1, %v1948_v54 }
 0x1e0   :  { %2189 = vmatprep.mubr.bf16.mxu0 %v4342_v8  ;;  %3849 = vmatprep.subr.bf16.mxu1 %v4186_v5 }
 0x1e1   :  { %v1873_v53 = vmax.f32 %v1841_v58, 0.0  ;;  %v1842_v41 = vadd.f32 %v5107_v61, %v1783_v60  ;;  %v3737_v13 = vpop.f32.mrb[132].mxu1  ;;  %3850 = vmatpush3.bf16.msra.mxu1 %v4186_v5  ;;  %3898 = vmatpush3.bf16.msra.mxu0 %v4187_v20  ;;  %v5241_v6 = vrot.slane %v1945_v50, %v1953_v52 }
 0x1e2   :  { %v3738_v15 = vpop.f32.mrb[133].mxu1  ;;  %3851 = vmatprep.subr.bf16.mxu1 %v4188_v31  ;;  %3899 = vmatprep.subr.bf16.mxu0 %v4189_v51 }
 0x1e3   :  { %1905 = vst [vmem:[#allocation2 + $0x300] sm:$0xff] %v1873_v53  ;;  %v1874_v44 = vmax.f32 %v1842_v41, 0.0  ;;  %v3739_v63 = vadd.f32 %v3738_v15, %v3737_v13  ;;  %v3740_v48 = vpop.f32.mrb[134].mxu1 }
 0x1e4   :  { %v3741_v40 = vpop.f32.mrb[135].mxu1 }
 0x1e5   :  { %1906 = vst [vmem:[#allocation2 + $0x320] sm:$0xff] %v1874_v44  ;;  %v1788_v35 = vadd.f32 %v3739_v63, %v5088_v3  ;;  %v3742_v23 = vadd.f32 %v3741_v40, %v3740_v48  ;;  %v1925_v34 = vpack.c.bf16 %v1874_v44, %v1873_v53  ;;  %3852 = vmatpush3.bf16.msra.mxu1 %v4188_v31 }
 0x1e6   :  { %3900 = vmatpush3.bf16.msra.mxu0 %v4189_v51 }
 0x1e7   :  { %v1843_v25 = vadd.f32 %v5107_v61, %v1788_v35  ;;  %v1791_v24 = vadd.f32 %v3742_v23, %v5090_v28  ;;  %2190 = vmatmul.mubr.bf16.gmra.mrb[128].mxu0 %v1925_v34 }
 0x1e8   :  { %2199 = vmatprep.mubr.bf16.mxu0 %v4342_v8 }
 0x1e9   :  { %v1875_v3 = vmax.f32 %v1843_v25, 0.0  ;;  %v1844_v7 = vadd.f32 %v5107_v61, %v1791_v24  ;;  %v3743_v16 = vpop.f32.mrb[136].mxu1 }
 0x1ea   :  { %v3744_v38 = vpop.f32.mrb[137].mxu1 }
 0x1eb   :  { %1907 = vst [vmem:[#allocation2 + $0x340] sm:$0xff] %v1875_v3  ;;  %v1876_v29 = vmax.f32 %v1844_v7, 0.0  ;;  %v3745_v59 = vadd.f32 %v3744_v38, %v3743_v16  ;;  %v3746_v28 = vpop.f32.mrb[138].mxu1 }
 0x1ec   :  { %v3747_v42 = vpop.f32.mrb[139].mxu1 }
 0x1ed   :  { %1908 = vst [vmem:[#allocation2 + $0x360] sm:$0xff] %v1876_v29  ;;  %v1796_v37 = vadd.f32 %v3745_v59, %v5094_v2  ;;  %v3748_v56 = vadd.f32 %v3747_v42, %v3746_v28  ;;  %v1926_v17 = vpack.c.bf16 %v1876_v29, %v1875_v3 }
 0x1ef   :  { %v1845_v18 = vadd.f32 %v5107_v61, %v1796_v37  ;;  %v1799_v45 = vadd.f32 %v3748_v56, %v5096_v27  ;;  %2200 = vmatmul.mubr.bf16.gmra.mrb[132].mxu0 %v1926_v17 }
 0x1f0   :  { %2209 = vmatprep.mubr.bf16.mxu0 %v4342_v8 }
 0x1f1   :  { %v1877_v21 = vmax.f32 %v1845_v18, 0.0  ;;  %v1846_v33 = vadd.f32 %v5107_v61, %v1799_v45  ;;  %v3749_v43 = vpop.f32.mrb[140].mxu1 }
 0x1f2   :  { %v3750_v62 = vpop.f32.mrb[141].mxu1 }
 0x1f3   :  { %1909 = vst [vmem:[#allocation2 + $0x380] sm:$0xff] %v1877_v21  ;;  %v1878_v22 = vmax.f32 %v1846_v33, 0.0  ;;  %v3751_v47 = vadd.f32 %v3750_v62, %v3749_v43  ;;  %v3752_v19 = vpop.f32.mrb[142].mxu1 }
 0x1f4   :  { %v3753_v49 = vpop.f32.mrb[143].mxu1 }
 0x1f5   :  { %1910 = vst [vmem:[#allocation2 + $0x3a0] sm:$0xff] %v1878_v22  ;;  %v1804_v2 = vadd.f32 %v3751_v47, %v5100_v26  ;;  %v3754_v30 = vadd.f32 %v3753_v49, %v3752_v19  ;;  %v1927_v55 = vpack.c.bf16 %v1878_v22, %v1877_v21  ;;  %v1949_v26 = vsub.s32 0, %v1948_v54 }
 0x1f7   :  { %v1847_v27 = vadd.f32 %v5107_v61, %v1804_v2  ;;  %v1807_v32 = vadd.f32 %v3754_v30, %v5102_v39  ;;  %2210 = vmatmul.mubr.bf16.gmra.mrb[136].mxu0 %v1927_v55  ;;  %v5239_v39 = vrot.slane %v1945_v50, %v1949_v26 }
 0x1f8   :  { %2219 = vmatprep.mubr.bf16.mxu0 %v4342_v8 }
 0x1f9   :  { %v1879_v11 = vmax.f32 %v1847_v27, 0.0  ;;  %v1848_v9 = vadd.f32 %v5107_v61, %v1807_v32 }
 0x1fb   :  { %1911 = vst [vmem:[#allocation2 + $0x3c0] sm:$0xff] %v1879_v11  ;;  %v1880_v36 = vmax.f32 %v1848_v9, 0.0 }
 0x1fd   :  { %1912 = vst [vmem:[#allocation2 + $0x3e0] sm:$0xff] %v1880_v36  ;;  %v1928_v14 = vpack.c.bf16 %v1880_v36, %v1879_v11 }
 0x1ff   :  { %2220 = vmatmul.mubr.bf16.gmra.mrb[140].mxu0 %v1928_v14 }
 0x25a   :  { %v2071_v8 = vpop.f32.mrb[80].mxu0 }
 0x25b   :  { %v2072_v61 = vadd.f32 %v2071_v8, %v5239_v39  ;;  %v2073_v12 = vpop.f32.mrb[81].mxu0 }
 0x25c   :  { %v2074_v1 = vadd.f32 %v2073_v12, %v5241_v6  ;;  %v2075_v46 = vpop.f32.mrb[82].mxu0 }
 0x25d   :  { %v2076_v57 = vadd.f32 %v2075_v46, %v5239_v39  ;;  %v2077_v10 = vpop.f32.mrb[83].mxu0  ;;  %v2230_v60 = vmax.f32 %v2072_v61, 0.0 }
 0x25e   :  { %v2078_v58 = vadd.f32 %v2077_v10, %v5241_v6  ;;  %v2231_v53 = vmax.f32 %v2074_v1, 0.0 }
 0x25f   :  { %v2232_v4 = vmax.f32 %v2076_v57, 0.0 }
 0x260   :  { %v2233_v41 = vmax.f32 %v2078_v58, 0.0 }
 0x261   :  { %v2294_v13 = vpack.c.bf16 %v2232_v4, %v2230_v60 }
 0x262   :  { %v2542_v15 = vpack.c.bf16 %v2233_v41, %v2231_v53  ;;  %v2081_v5 = vpop.f32.mrb[84].mxu0 }
 0x263   :  { %v2082_v44 = vadd.f32 %v2081_v5, %v5239_v39  ;;  %v2083_v63 = vpop.f32.mrb[85].mxu0  ;;  %3853 = vmatprep.mubr.bf16.mxu1 %v2294_v13 }
 0x264   :  { %v2084_v48 = vadd.f32 %v2083_v63, %v5241_v6  ;;  %v2085_v20 = vpop.f32.mrb[86].mxu0  ;;  %3901 = vmatprep.mubr.bf16.mxu0 %v2542_v15 }
 0x265   :  { %v2086_v40 = vadd.f32 %v2085_v20, %v5239_v39  ;;  %v2087_v35 = vpop.f32.mrb[87].mxu0  ;;  %v2234_v34 = vmax.f32 %v2082_v44, 0.0 }
 0x266   :  { %v2088_v23 = vadd.f32 %v2087_v35, %v5241_v6  ;;  %v2235_v25 = vmax.f32 %v2084_v48, 0.0 }
 0x267   :  { %v2236_v31 = vmax.f32 %v2086_v40, 0.0 }
 0x268   :  { %v2237_v24 = vmax.f32 %v2088_v23, 0.0 }
 0x269   :  { %v2295_v51 = vpack.c.bf16 %v2236_v31, %v2234_v34 }
 0x26a   :  { %v2543_v3 = vpack.c.bf16 %v2237_v24, %v2235_v25  ;;  %v2091_v7 = vpop.f32.mrb[88].mxu0 }
 0x26b   :  { %v2092_v16 = vadd.f32 %v2091_v7, %v5239_v39  ;;  %v2093_v38 = vpop.f32.mrb[89].mxu0  ;;  %3854 = vmatmul.mubr.bf16.vlgmr.msra.gmra.mrb[144].mxu1 %v2295_v51 }
 0x26c   :  { %v2094_v29 = vadd.f32 %v2093_v38, %v5241_v6  ;;  %v2095_v59 = vpop.f32.mrb[90].mxu0  ;;  %3902 = vmatmul.mubr.bf16.vlgmr.msra.gmra.mrb[144].mxu0 %v2543_v3 }
 0x26d   :  { %v2096_v28 = vadd.f32 %v2095_v59, %v5239_v39  ;;  %v2097_v42 = vpop.f32.mrb[91].mxu0  ;;  %v2238_v56 = vmax.f32 %v2092_v16, 0.0 }
 0x26e   :  { %v2098_v37 = vadd.f32 %v2097_v42, %v5241_v6  ;;  %v2239_v18 = vmax.f32 %v2094_v29, 0.0 }
 0x26f   :  { %v2240_v17 = vmax.f32 %v2096_v28, 0.0 }
 0x270   :  { %v2241_v45 = vmax.f32 %v2098_v37, 0.0 }
 0x271   :  { %v2296_v21 = vpack.c.bf16 %v2240_v17, %v2238_v56 }
 0x272   :  { %v2544_v33 = vpack.c.bf16 %v2241_v45, %v2239_v18  ;;  %v2101_v43 = vpop.f32.mrb[92].mxu0 }
 0x273   :  { %v2102_v62 = vadd.f32 %v2101_v43, %v5239_v39  ;;  %v2103_v22 = vpop.f32.mrb[93].mxu0  ;;  %3857 = vmatprep.mubr.bf16.mxu1 %v2296_v21 }
 0x274   :  { %v2104_v47 = vadd.f32 %v2103_v22, %v5241_v6  ;;  %v2105_v19 = vpop.f32.mrb[94].mxu0  ;;  %3905 = vmatprep.mubr.bf16.mxu0 %v2544_v33 }
 0x275   :  { %v2106_v49 = vadd.f32 %v2105_v19, %v5239_v39  ;;  %v2107_v2 = vpop.f32.mrb[95].mxu0  ;;  %v2242_v55 = vmax.f32 %v2102_v62, 0.0 }
 0x276   :  { %v2108_v30 = vadd.f32 %v2107_v2, %v5241_v6  ;;  %v2243_v32 = vmax.f32 %v2104_v47, 0.0 }
 0x277   :  { %v2244_v27 = vmax.f32 %v2106_v49, 0.0 }
 0x278   :  { %v2245_v11 = vmax.f32 %v2108_v30, 0.0 }
 0x279   :  { %v2297_v9 = vpack.c.bf16 %v2244_v27, %v2242_v55 }
 0x27a   :  { %v2545_v36 = vpack.c.bf16 %v2245_v11, %v2243_v32  ;;  %v2111_v14 = vpop.f32.mrb[96].mxu0 }
 0x27b   :  { %v2112_v0 = vadd.f32 %v2111_v14, %v5239_v39  ;;  %v2113_v54 = vpop.f32.mrb[97].mxu0  ;;  %3858 = vmatmul.mubr.bf16.gmra.mrb[148].mxu1 %v2297_v9 }
 0x27c   :  { %v2114_v26 = vadd.f32 %v2113_v54, %v5241_v6  ;;  %v2115_v50 = vpop.f32.mrb[98].mxu0  ;;  %3906 = vmatmul.mubr.bf16.gmra.mrb[148].mxu0 %v2545_v36 }
 0x27d   :  { %v2116_v52 = vadd.f32 %v2115_v50, %v5239_v39  ;;  %v2117_v8 = vpop.f32.mrb[99].mxu0  ;;  %v2246_v12 = vmax.f32 %v2112_v0, 0.0 }
 0x27e   :  { %v2118_v61 = vadd.f32 %v2117_v8, %v5241_v6  ;;  %v2247_v46 = vmax.f32 %v2114_v26, 0.0 }
 0x27f   :  { %v2248_v1 = vmax.f32 %v2116_v52, 0.0 }
 0x280   :  { %v2249_v57 = vmax.f32 %v2118_v61, 0.0 }
 0x281   :  { %v2298_v10 = vpack.c.bf16 %v2248_v1, %v2246_v12 }
 0x282   :  { %v2546_v58 = vpack.c.bf16 %v2249_v57, %v2247_v46  ;;  %v2121_v60 = vpop.f32.mrb[100].mxu0 }
 0x283   :  { %v2122_v4 = vadd.f32 %v2121_v60, %v5239_v39  ;;  %v2123_v53 = vpop.f32.mrb[101].mxu0  ;;  %3861 = vmatprep.mubr.bf16.mxu1 %v2298_v10 }
 0x284   :  { %v2124_v41 = vadd.f32 %v2123_v53, %v5241_v6  ;;  %v2125_v13 = vpop.f32.mrb[102].mxu0  ;;  %3909 = vmatprep.mubr.bf16.mxu0 %v2546_v58 }
 0x285   :  { %v2126_v15 = vadd.f32 %v2125_v13, %v5239_v39  ;;  %v2127_v5 = vpop.f32.mrb[103].mxu0  ;;  %v2250_v63 = vmax.f32 %v2122_v4, 0.0 }
 0x286   :  { %v2128_v44 = vadd.f32 %v2127_v5, %v5241_v6  ;;  %v2251_v20 = vmax.f32 %v2124_v41, 0.0 }
 0x287   :  { %v2252_v48 = vmax.f32 %v2126_v15, 0.0 }
 0x288   :  { %v2253_v40 = vmax.f32 %v2128_v44, 0.0 }
 0x289   :  { %v2299_v35 = vpack.c.bf16 %v2252_v48, %v2250_v63 }
 0x28a   :  { %v2547_v23 = vpack.c.bf16 %v2253_v40, %v2251_v20  ;;  %v2131_v34 = vpop.f32.mrb[104].mxu0 }
 0x28b   :  { %v2132_v31 = vadd.f32 %v2131_v34, %v5239_v39  ;;  %v2133_v25 = vpop.f32.mrb[105].mxu0  ;;  %3862 = vmatmul.mubr.bf16.gmra.mrb[152].mxu1 %v2299_v35 }
 0x28c   :  { %v2134_v24 = vadd.f32 %v2133_v25, %v5241_v6  ;;  %v2135_v51 = vpop.f32.mrb[106].mxu0  ;;  %3910 = vmatmul.mubr.bf16.gmra.mrb[152].mxu0 %v2547_v23 }
 0x28d   :  { %v2136_v3 = vadd.f32 %v2135_v51, %v5239_v39  ;;  %v2137_v7 = vpop.f32.mrb[107].mxu0  ;;  %v2254_v38 = vmax.f32 %v2132_v31, 0.0 }
 0x28e   :  { %v2138_v16 = vadd.f32 %v2137_v7, %v5241_v6  ;;  %v2255_v59 = vmax.f32 %v2134_v24, 0.0 }
 0x28f   :  { %v2256_v29 = vmax.f32 %v2136_v3, 0.0 }
 0x290   :  { %v2257_v28 = vmax.f32 %v2138_v16, 0.0 }
 0x291   :  { %v2300_v42 = vpack.c.bf16 %v2256_v29, %v2254_v38 }
 0x292   :  { %v2548_v37 = vpack.c.bf16 %v2257_v28, %v2255_v59  ;;  %v2141_v56 = vpop.f32.mrb[108].mxu0 }
 0x293   :  { %v2142_v17 = vadd.f32 %v2141_v56, %v5239_v39  ;;  %v2143_v18 = vpop.f32.mrb[109].mxu0  ;;  %3865 = vmatprep.mubr.bf16.mxu1 %v2300_v42 }
 0x294   :  { %v2144_v45 = vadd.f32 %v2143_v18, %v5241_v6  ;;  %v2145_v21 = vpop.f32.mrb[110].mxu0  ;;  %3913 = vmatprep.mubr.bf16.mxu0 %v2548_v37 }
 0x295   :  { %v2146_v33 = vadd.f32 %v2145_v21, %v5239_v39  ;;  %v2147_v43 = vpop.f32.mrb[111].mxu0  ;;  %v2258_v22 = vmax.f32 %v2142_v17, 0.0 }
 0x296   :  { %v2148_v62 = vadd.f32 %v2147_v43, %v5241_v6  ;;  %v2259_v19 = vmax.f32 %v2144_v45, 0.0 }
 0x297   :  { %v2260_v47 = vmax.f32 %v2146_v33, 0.0 }
 0x298   :  { %v2261_v49 = vmax.f32 %v2148_v62, 0.0 }
 0x299   :  { %v2301_v2 = vpack.c.bf16 %v2260_v47, %v2258_v22 }
 0x29a   :  { %v2549_v30 = vpack.c.bf16 %v2261_v49, %v2259_v19  ;;  %v2151_v55 = vpop.f32.mrb[112].mxu0 }
 0x29b   :  { %v2152_v27 = vadd.f32 %v2151_v55, %v5239_v39  ;;  %v2153_v32 = vpop.f32.mrb[113].mxu0  ;;  %3866 = vmatmul.mubr.bf16.gmra.mrb[156].mxu1 %v2301_v2 }
 0x29c   :  { %v2154_v11 = vadd.f32 %v2153_v32, %v5241_v6  ;;  %v2155_v9 = vpop.f32.mrb[114].mxu0  ;;  %3914 = vmatmul.mubr.bf16.gmra.mrb[156].mxu0 %v2549_v30 }
 0x29d   :  { %v2156_v36 = vadd.f32 %v2155_v9, %v5239_v39  ;;  %v2157_v14 = vpop.f32.mrb[115].mxu0  ;;  %v2262_v54 = vmax.f32 %v2152_v27, 0.0 }
 0x29e   :  { %v2158_v0 = vadd.f32 %v2157_v14, %v5241_v6  ;;  %v2263_v50 = vmax.f32 %v2154_v11, 0.0 }
 0x29f   :  { %v2264_v26 = vmax.f32 %v2156_v36, 0.0 }
 0x2a0   :  { %v2265_v52 = vmax.f32 %v2158_v0, 0.0 }
 0x2a1   :  { %v2302_v8 = vpack.c.bf16 %v2264_v26, %v2262_v54 }
 0x2a2   :  { %v2550_v61 = vpack.c.bf16 %v2265_v52, %v2263_v50  ;;  %v2161_v12 = vpop.f32.mrb[116].mxu0 }
 0x2a3   :  { %v2162_v1 = vadd.f32 %v2161_v12, %v5239_v39  ;;  %v2163_v46 = vpop.f32.mrb[117].mxu0  ;;  %3869 = vmatprep.mubr.bf16.mxu1 %v2302_v8 }
 0x2a4   :  { %v2164_v57 = vadd.f32 %v2163_v46, %v5241_v6  ;;  %v2165_v10 = vpop.f32.mrb[118].mxu0  ;;  %3917 = vmatprep.mubr.bf16.mxu0 %v2550_v61 }
 0x2a5   :  { %v2166_v58 = vadd.f32 %v2165_v10, %v5239_v39  ;;  %v2167_v60 = vpop.f32.mrb[119].mxu0  ;;  %v2266_v53 = vmax.f32 %v2162_v1, 0.0 }
 0x2a6   :  { %v2168_v4 = vadd.f32 %v2167_v60, %v5241_v6  ;;  %v2267_v13 = vmax.f32 %v2164_v57, 0.0 }
 0x2a7   :  { %v2268_v41 = vmax.f32 %v2166_v58, 0.0 }
 0x2a8   :  { %v2269_v15 = vmax.f32 %v2168_v4, 0.0 }
 0x2a9   :  { %v2303_v5 = vpack.c.bf16 %v2268_v41, %v2266_v53 }
 0x2aa   :  { %v2551_v44 = vpack.c.bf16 %v2269_v15, %v2267_v13  ;;  %v2171_v63 = vpop.f32.mrb[120].mxu0 }
 0x2ab   :  { %v2172_v48 = vadd.f32 %v2171_v63, %v5239_v39  ;;  %v2173_v20 = vpop.f32.mrb[121].mxu0  ;;  %3870 = vmatmul.mubr.bf16.gmra.mrb[160].mxu1 %v2303_v5 }
 0x2ac   :  { %v2174_v40 = vadd.f32 %v2173_v20, %v5241_v6  ;;  %v2175_v35 = vpop.f32.mrb[122].mxu0  ;;  %3918 = vmatmul.mubr.bf16.gmra.mrb[160].mxu0 %v2551_v44 }
 0x2ad   :  { %v2176_v23 = vadd.f32 %v2175_v35, %v5239_v39  ;;  %v2177_v34 = vpop.f32.mrb[123].mxu0  ;;  %v2270_v25 = vmax.f32 %v2172_v48, 0.0 }
 0x2ae   :  { %v2178_v31 = vadd.f32 %v2177_v34, %v5241_v6  ;;  %v2271_v51 = vmax.f32 %v2174_v40, 0.0 }
 0x2af   :  { %v2272_v24 = vmax.f32 %v2176_v23, 0.0 }
 0x2b0   :  { %v2273_v3 = vmax.f32 %v2178_v31, 0.0 }
 0x2b1   :  { %v2304_v7 = vpack.c.bf16 %v2272_v24, %v2270_v25 }
 0x2b2   :  { %v2552_v16 = vpack.c.bf16 %v2273_v3, %v2271_v51  ;;  %v2181_v38 = vpop.f32.mrb[124].mxu0 }
 0x2b3   :  { %v2182_v29 = vadd.f32 %v2181_v38, %v5239_v39  ;;  %v2183_v59 = vpop.f32.mrb[125].mxu0  ;;  %3873 = vmatprep.mubr.bf16.mxu1 %v2304_v7 }
 0x2b4   :  { %v2184_v28 = vadd.f32 %v2183_v59, %v5241_v6  ;;  %v2185_v42 = vpop.f32.mrb[126].mxu0  ;;  %3921 = vmatprep.mubr.bf16.mxu0 %v2552_v16 }
 0x2b5   :  { %v2186_v37 = vadd.f32 %v2185_v42, %v5239_v39  ;;  %v2187_v56 = vpop.f32.mrb[127].mxu0  ;;  %v2274_v18 = vmax.f32 %v2182_v29, 0.0 }
 0x2b6   :  { %v2188_v17 = vadd.f32 %v2187_v56, %v5241_v6  ;;  %v2275_v21 = vmax.f32 %v2184_v28, 0.0 }
 0x2b7   :  { %v2276_v45 = vmax.f32 %v2186_v37, 0.0 }
 0x2b8   :  { %v2277_v33 = vmax.f32 %v2188_v17, 0.0 }
 0x2b9   :  { %v2305_v43 = vpack.c.bf16 %v2276_v45, %v2274_v18  ;;  %v5310_v18 = vld [vmem:[%s5689_s8] ss:$0 sm:$0xff] }
 0x2ba   :  { %v2553_v62 = vpack.c.bf16 %v2277_v33, %v2275_v21  ;;  %v2191_v22 = vpop.f32.mrb[128].mxu0 }
 0x2bb   :  { %v2192_v47 = vadd.f32 %v2191_v22, %v5239_v39  ;;  %v2193_v19 = vpop.f32.mrb[129].mxu0  ;;  %3874 = vmatmul.mubr.bf16.gmra.mrb[164].mxu1 %v2305_v43 }
 0x2bc   :  { %v2194_v49 = vadd.f32 %v2193_v19, %v5241_v6  ;;  %v2195_v2 = vpop.f32.mrb[130].mxu0  ;;  %3922 = vmatmul.mubr.bf16.gmra.mrb[164].mxu0 %v2553_v62 }
 0x2bd   :  { %v2196_v30 = vadd.f32 %v2195_v2, %v5239_v39  ;;  %v2197_v55 = vpop.f32.mrb[131].mxu0  ;;  %v2278_v32 = vmax.f32 %v2192_v47, 0.0 }
 0x2be   :  { %v2198_v27 = vadd.f32 %v2197_v55, %v5241_v6  ;;  %v2279_v9 = vmax.f32 %v2194_v49, 0.0 }
 0x2bf   :  { %v2280_v11 = vmax.f32 %v2196_v30, 0.0 }
 0x2c0   :  { %v2281_v36 = vmax.f32 %v2198_v27, 0.0 }
 0x2c1   :  { %v2306_v14 = vpack.c.bf16 %v2280_v11, %v2278_v32 }
 0x2c2   :  { %v2554_v0 = vpack.c.bf16 %v2281_v36, %v2279_v9  ;;  %v2201_v54 = vpop.f32.mrb[132].mxu0 }
 0x2c3   :  { %v2202_v26 = vadd.f32 %v2201_v54, %v5239_v39  ;;  %v2203_v50 = vpop.f32.mrb[133].mxu0  ;;  %3877 = vmatprep.mubr.bf16.mxu1 %v2306_v14 }
 0x2c4   :  { %v2204_v52 = vadd.f32 %v2203_v50, %v5241_v6  ;;  %v2205_v8 = vpop.f32.mrb[134].mxu0  ;;  %3925 = vmatprep.mubr.bf16.mxu0 %v2554_v0 }
 0x2c5   :  { %v2206_v61 = vadd.f32 %v2205_v8, %v5239_v39  ;;  %v2207_v12 = vpop.f32.mrb[135].mxu0  ;;  %v2282_v46 = vmax.f32 %v2202_v26, 0.0 }
 0x2c6   :  { %v2208_v1 = vadd.f32 %v2207_v12, %v5241_v6  ;;  %v2283_v10 = vmax.f32 %v2204_v52, 0.0 }
 0x2c7   :  { %v2284_v57 = vmax.f32 %v2206_v61, 0.0 }
 0x2c8   :  { %v2285_v58 = vmax.f32 %v2208_v1, 0.0 }
 0x2c9   :  { %v2307_v60 = vpack.c.bf16 %v2284_v57, %v2282_v46 }
 0x2ca   :  { %v2555_v4 = vpack.c.bf16 %v2285_v58, %v2283_v10  ;;  %v2211_v53 = vpop.f32.mrb[136].mxu0 }
 0x2cb   :  { %v2212_v41 = vadd.f32 %v2211_v53, %v5239_v39  ;;  %v2213_v13 = vpop.f32.mrb[137].mxu0  ;;  %3878 = vmatmul.mubr.bf16.gmra.mrb[168].mxu1 %v2307_v60 }
 0x2cc   :  { %v2214_v15 = vadd.f32 %v2213_v13, %v5241_v6  ;;  %v2215_v5 = vpop.f32.mrb[138].mxu0  ;;  %3926 = vmatmul.mubr.bf16.gmra.mrb[168].mxu0 %v2555_v4 }
 0x2cd   :  { %v2216_v44 = vadd.f32 %v2215_v5, %v5239_v39  ;;  %v2217_v63 = vpop.f32.mrb[139].mxu0  ;;  %v2286_v20 = vmax.f32 %v2212_v41, 0.0 }
 0x2ce   :  { %v2218_v48 = vadd.f32 %v2217_v63, %v5241_v6  ;;  %v2287_v35 = vmax.f32 %v2214_v15, 0.0 }
 0x2cf   :  { %v2288_v40 = vmax.f32 %v2216_v44, 0.0 }
 0x2d0   :  { %v2289_v23 = vmax.f32 %v2218_v48, 0.0 }
 0x2d1   :  { %v2308_v34 = vpack.c.bf16 %v2288_v40, %v2286_v20 }
 0x2d2   :  { %v2556_v31 = vpack.c.bf16 %v2289_v23, %v2287_v35  ;;  %v2221_v25 = vpop.f32.mrb[140].mxu0 }
 0x2d3   :  { %v2222_v24 = vadd.f32 %v2221_v25, %v5239_v39  ;;  %v2223_v51 = vpop.f32.mrb[141].mxu0  ;;  %3881 = vmatprep.mubr.bf16.mxu1 %v2308_v34 }
 0x2d4   :  { %v2224_v3 = vadd.f32 %v2223_v51, %v5241_v6  ;;  %v2225_v7 = vpop.f32.mrb[142].mxu0  ;;  %3929 = vmatprep.mubr.bf16.mxu0 %v2556_v31 }
 0x2d5   :  { %v2226_v16 = vadd.f32 %v2225_v7, %v5239_v39  ;;  %v2227_v38 = vpop.f32.mrb[143].mxu0  ;;  %v2290_v59 = vmax.f32 %v2222_v24, 0.0  ;;  %v5315_v39 = vld [vmem:[%s5689_s8 + $0x1] ss:$0 sm:$0xff]  ;;  %s4343_s8 = smov [#allocation2]  }
 0x2d6   :  { %v2228_v29 = vadd.f32 %v2227_v38, %v5241_v6  ;;  %v2291_v42 = vmax.f32 %v2224_v3, 0.0  ;;  %s3179_s21 = sshll.u32 %s4343_s8, 4  ;;  %s3180_s21 = int_to_ptr.vmem [resolvable:$true] %s3179_s21 }
 0x2d7   :  { %v2292_v28 = vmax.f32 %v2226_v16, 0.0  ;;  %s4318_s22 = scalar_lea.vmem %s3180_s21, 16384  ;;  %p4323_p1 = scmp.lt.s32.totalorder %s3180_s21, %s3180_s21 }
 0x2d8   :  { %v2293_v37 = vmax.f32 %v2228_v29, 0.0  ;;  %p4319_p0 = scmp.ne.s32.totalorder %s3180_s21, %s4318_s22  ;;  %p4324_p2 = scmp.lt.s32.totalorder %s4318_s22, %s4318_s22 }
 0x2d9   :  { %v2309_v56 = vpack.c.bf16 %v2292_v28, %v2290_v59 }
 0x2da   :  { %v2557_v17 = vpack.c.bf16 %v2293_v37, %v2291_v42  ;;  %p4325_p3 = por %p4324_p2, %p4323_p1 }
 0x2db   :  { %3882 = vmatmul.mubr.bf16.gmra.mrb[172].mxu1 %v2309_v56 }
 0x2dc   :  { %3930 = vmatmul.mubr.bf16.gmra.mrb[172].mxu0 %v2557_v17  ;;  %p4326_p4 = pnand %p4325_p3, %p4319_p0 }
 0x33e   :  { %v3855_v45 = vpop.f32.mrb[144].mxu1 }
 0x33f   :  { %v5318_v6 = vadd.f32 %v3855_v45, %v5310_v18  ;;  %v2415_v21 = vpop.f32.mrb[145].mxu1  ;;  %v3903_v33 = vpop.f32.mrb[144].mxu0 }
 0x340   :  { %v5321_v43 = vadd.f32 %v5310_v18, %v2415_v21  ;;  %v2672_v62 = vadd.f32 %v3903_v33, %v5315_v39  ;;  %v3856_v22 = vpop.f32.mrb[146].mxu1  ;;  %v2663_v47 = vpop.f32.mrb[145].mxu0 }
 0x341   :  { %2792 = vst [vmem:[#allocation2 + $0x48] sm:$0xff] %v5318_v6  ;;  %v5326_v19 = vadd.f32 %v3856_v22, %v5310_v18  ;;  %v2664_v49 = vadd.f32 %v5315_v39, %v2663_v47  ;;  %v3904_v2 = vpop.f32.mrb[146].mxu0  ;;  %2858 = vmax.xlane.f32.xlu1 %v5318_v6  ;;  %v2418_v30 = vpop.f32.mrb[147].mxu1 }
 0x342   :  { %2790 = vst [vmem:[#allocation2 + $0x8] sm:$0xff] %v5321_v43  ;;  %2824 = vst [vmem:[#allocation2 + $0x58] sm:$0xff] %v2672_v62  ;;  %v2675_v55 = vadd.f32 %v3904_v2, %v5315_v39  ;;  %v5333_v27 = vadd.f32 %v5310_v18, %v2418_v30  ;;  %v2666_v32 = vpop.f32.mrb[147].mxu0  ;;  %2854 = vmax.xlane.f32.xlu0 %v5321_v43 }
 0x343   :  { %2793 = vst [vmem:[#allocation2 + $0x68] sm:$0xff] %v5326_v19  ;;  %2822 = vst [vmem:[#allocation2 + $0x18] sm:$0xff] %v2664_v49  ;;  %v2667_v11 = vadd.f32 %v5315_v39, %v2666_v32 }
 0x344   :  { %2825 = vst [vmem:[#allocation2 + $0x78] sm:$0xff] %v2675_v55  ;;  %2791 = vst [vmem:[#allocation2 + $0x28] sm:$0xff] %v5333_v27 }
 0x345   :  { %2823 = vst [vmem:[#allocation2 + $0x38] sm:$0xff] %v2667_v11  ;;  %2860 = vmax.xlane.f32.xlu1 %v5326_v19 }
 0x346   :  { %2856 = vmax.xlane.f32.xlu0 %v5333_v27 }
 0x34e   :  { %v3859_v9 = vpop.f32.mrb[148].mxu1 }
 0x34f   :  { %v5342_v36 = vadd.f32 %v3859_v9, %v5310_v18  ;;  %v2431_v14 = vpop.f32.mrb[149].mxu1  ;;  %v3907_v0 = vpop.f32.mrb[148].mxu0 }
 0x350   :  { %v5345_v54 = vadd.f32 %v5310_v18, %v2431_v14  ;;  %v2688_v26 = vadd.f32 %v3907_v0, %v5315_v39  ;;  %v3860_v50 = vpop.f32.mrb[150].mxu1  ;;  %v2679_v52 = vpop.f32.mrb[149].mxu0 }
 0x351   :  { %2796 = vst [vmem:[#allocation2 + $0xc8] sm:$0xff] %v5342_v36  ;;  %v5350_v8 = vadd.f32 %v3860_v50, %v5310_v18  ;;  %v2680_v61 = vadd.f32 %v5315_v39, %v2679_v52  ;;  %v2434_v12 = vpop.f32.mrb[151].mxu1  ;;  %v3908_v1 = vpop.f32.mrb[150].mxu0  ;;  %2866 = vmax.xlane.f32.xlu0 %v5342_v36 }
 0x352   :  { %2794 = vst [vmem:[#allocation2 + $0x88] sm:$0xff] %v5345_v54  ;;  %2828 = vst [vmem:[#allocation2 + $0xd8] sm:$0xff] %v2688_v26  ;;  %v5356_v46 = vadd.f32 %v5310_v18, %v2434_v12  ;;  %v2691_v57 = vadd.f32 %v3908_v1, %v5315_v39  ;;  %v2682_v10 = vpop.f32.mrb[151].mxu0 }
 0x353   :  { %2797 = vst [vmem:[#allocation2 + $0xe8] sm:$0xff] %v5350_v8  ;;  %2826 = vst [vmem:[#allocation2 + $0x98] sm:$0xff] %v2680_v61  ;;  %v2683_v58 = vadd.f32 %v5315_v39, %v2682_v10  ;;  %2868 = vmax.xlane.f32.xlu1 %v5350_v8 }
 0x354   :  { %2795 = vst [vmem:[#allocation2 + $0xa8] sm:$0xff] %v5356_v46  ;;  %2829 = vst [vmem:[#allocation2 + $0xf8] sm:$0xff] %v2691_v57 }
 0x355   :  { %2827 = vst [vmem:[#allocation2 + $0xb8] sm:$0xff] %v2683_v58  ;;  %2862 = vmax.xlane.f32.xlu0 %v5345_v54 }
 0x357   :  { %2864 = vmax.xlane.f32.xlu1 %v5356_v46 }
 0x35e   :  { %v3863_v60 = vpop.f32.mrb[152].mxu1 }
 0x35f   :  { %v5366_v4 = vadd.f32 %v3863_v60, %v5310_v18  ;;  %v2447_v53 = vpop.f32.mrb[153].mxu1  ;;  %v3911_v41 = vpop.f32.mrb[152].mxu0 }
 0x360   :  { %v5369_v13 = vadd.f32 %v5310_v18, %v2447_v53  ;;  %v2704_v15 = vadd.f32 %v3911_v41, %v5315_v39  ;;  %v3864_v5 = vpop.f32.mrb[154].mxu1  ;;  %v2695_v44 = vpop.f32.mrb[153].mxu0 }
 0x361   :  { %2800 = vst [vmem:[#allocation2 + $0x148] sm:$0xff] %v5366_v4  ;;  %v5374_v63 = vadd.f32 %v3864_v5, %v5310_v18  ;;  %v2696_v48 = vadd.f32 %v5315_v39, %v2695_v44  ;;  %v2450_v20 = vpop.f32.mrb[155].mxu1  ;;  %v3912_v40 = vpop.f32.mrb[154].mxu0  ;;  %2874 = vmax.xlane.f32.xlu0 %v5366_v4 }
 0x362   :  { %2798 = vst [vmem:[#allocation2 + $0x108] sm:$0xff] %v5369_v13  ;;  %2832 = vst [vmem:[#allocation2 + $0x158] sm:$0xff] %v2704_v15  ;;  %v5380_v35 = vadd.f32 %v5310_v18, %v2450_v20  ;;  %v2707_v23 = vadd.f32 %v3912_v40, %v5315_v39  ;;  %v2698_v34 = vpop.f32.mrb[155].mxu0 }
 0x363   :  { %2801 = vst [vmem:[#allocation2 + $0x168] sm:$0xff] %v5374_v63  ;;  %2830 = vst [vmem:[#allocation2 + $0x118] sm:$0xff] %v2696_v48  ;;  %v2699_v31 = vadd.f32 %v5315_v39, %v2698_v34  ;;  %2876 = vmax.xlane.f32.xlu1 %v5374_v63 }
 0x364   :  { %2799 = vst [vmem:[#allocation2 + $0x128] sm:$0xff] %v5380_v35  ;;  %2833 = vst [vmem:[#allocation2 + $0x178] sm:$0xff] %v2707_v23 }
 0x365   :  { %2831 = vst [vmem:[#allocation2 + $0x138] sm:$0xff] %v2699_v31  ;;  %2870 = vmax.xlane.f32.xlu0 %v5369_v13 }
 0x367   :  { %2872 = vmax.xlane.f32.xlu1 %v5380_v35 }
 0x36e   :  { %v3867_v25 = vpop.f32.mrb[156].mxu1 }
 0x36f   :  { %v5390_v24 = vadd.f32 %v3867_v25, %v5310_v18  ;;  %v2463_v51 = vpop.f32.mrb[157].mxu1  ;;  %v3915_v3 = vpop.f32.mrb[156].mxu0 }
 0x370   :  { %v5393_v7 = vadd.f32 %v5310_v18, %v2463_v51  ;;  %v2720_v16 = vadd.f32 %v3915_v3, %v5315_v39  ;;  %v3868_v38 = vpop.f32.mrb[158].mxu1  ;;  %v2711_v29 = vpop.f32.mrb[157].mxu0 }
 0x371   :  { %2804 = vst [vmem:[#allocation2 + $0x1c8] sm:$0xff] %v5390_v24  ;;  %v5398_v59 = vadd.f32 %v3868_v38, %v5310_v18  ;;  %v2712_v28 = vadd.f32 %v5315_v39, %v2711_v29  ;;  %v2466_v42 = vpop.f32.mrb[159].mxu1  ;;  %v3916_v37 = vpop.f32.mrb[158].mxu0  ;;  %2882 = vmax.xlane.f32.xlu0 %v5390_v24 }
 0x372   :  { %2802 = vst [vmem:[#allocation2 + $0x188] sm:$0xff] %v5393_v7  ;;  %2836 = vst [vmem:[#allocation2 + $0x1d8] sm:$0xff] %v2720_v16  ;;  %v5404_v56 = vadd.f32 %v5310_v18, %v2466_v42  ;;  %v2723_v17 = vadd.f32 %v3916_v37, %v5315_v39  ;;  %v2714_v45 = vpop.f32.mrb[159].mxu0 }
 0x373   :  { %2805 = vst [vmem:[#allocation2 + $0x1e8] sm:$0xff] %v5398_v59  ;;  %2834 = vst [vmem:[#allocation2 + $0x198] sm:$0xff] %v2712_v28  ;;  %v2715_v21 = vadd.f32 %v5315_v39, %v2714_v45  ;;  %2884 = vmax.xlane.f32.xlu1 %v5398_v59 }
 0x374   :  { %2803 = vst [vmem:[#allocation2 + $0x1a8] sm:$0xff] %v5404_v56  ;;  %2837 = vst [vmem:[#allocation2 + $0x1f8] sm:$0xff] %v2723_v17 }
 0x375   :  { %2835 = vst [vmem:[#allocation2 + $0x1b8] sm:$0xff] %v2715_v21  ;;  %2878 = vmax.xlane.f32.xlu0 %v5393_v7 }
 0x377   :  { %2880 = vmax.xlane.f32.xlu1 %v5404_v56 }
 0x37e   :  { %v3871_v33 = vpop.f32.mrb[160].mxu1 }
 0x37f   :  { %v5414_v62 = vadd.f32 %v3871_v33, %v5310_v18  ;;  %v2479_v22 = vpop.f32.mrb[161].mxu1  ;;  %v3919_v47 = vpop.f32.mrb[160].mxu0 }
 0x380   :  { %v5417_v49 = vadd.f32 %v5310_v18, %v2479_v22  ;;  %v2736_v2 = vadd.f32 %v3919_v47, %v5315_v39  ;;  %v3872_v30 = vpop.f32.mrb[162].mxu1  ;;  %v2727_v55 = vpop.f32.mrb[161].mxu0 }
 0x381   :  { %2808 = vst [vmem:[#allocation2 + $0x248] sm:$0xff] %v5414_v62  ;;  %v5422_v32 = vadd.f32 %v3872_v30, %v5310_v18  ;;  %v2728_v11 = vadd.f32 %v5315_v39, %v2727_v55  ;;  %v2482_v9 = vpop.f32.mrb[163].mxu1  ;;  %v3920_v14 = vpop.f32.mrb[162].mxu0  ;;  %2890 = vmax.xlane.f32.xlu0 %v5414_v62 }
 0x382   :  { %2806 = vst [vmem:[#allocation2 + $0x208] sm:$0xff] %v5417_v49  ;;  %2840 = vst [vmem:[#allocation2 + $0x258] sm:$0xff] %v2736_v2  ;;  %v5428_v0 = vadd.f32 %v5310_v18, %v2482_v9  ;;  %v2739_v26 = vadd.f32 %v3920_v14, %v5315_v39  ;;  %v2730_v50 = vpop.f32.mrb[163].mxu0 }
 0x383   :  { %2809 = vst [vmem:[#allocation2 + $0x268] sm:$0xff] %v5422_v32  ;;  %2838 = vst [vmem:[#allocation2 + $0x218] sm:$0xff] %v2728_v11  ;;  %v2731_v52 = vadd.f32 %v5315_v39, %v2730_v50  ;;  %2892 = vmax.xlane.f32.xlu1 %v5422_v32 }
 0x384   :  { %2807 = vst [vmem:[#allocation2 + $0x228] sm:$0xff] %v5428_v0  ;;  %2841 = vst [vmem:[#allocation2 + $0x278] sm:$0xff] %v2739_v26 }
 0x385   :  { %2839 = vst [vmem:[#allocation2 + $0x238] sm:$0xff] %v2731_v52  ;;  %2886 = vmax.xlane.f32.xlu0 %v5417_v49 }
 0x387   :  { %2888 = vmax.xlane.f32.xlu1 %v5428_v0 }
 0x38e   :  { %v3875_v61 = vpop.f32.mrb[164].mxu1 }
 0x38f   :  { %v5438_v12 = vadd.f32 %v3875_v61, %v5310_v18  ;;  %v2495_v1 = vpop.f32.mrb[165].mxu1  ;;  %v3923_v57 = vpop.f32.mrb[164].mxu0 }
 0x390   :  { %v5441_v10 = vadd.f32 %v5310_v18, %v2495_v1  ;;  %v2752_v58 = vadd.f32 %v3923_v57, %v5315_v39  ;;  %v3876_v60 = vpop.f32.mrb[166].mxu1  ;;  %v2743_v53 = vpop.f32.mrb[165].mxu0 }
 0x391   :  { %2812 = vst [vmem:[#allocation2 + $0x2c8] sm:$0xff] %v5438_v12  ;;  %v5446_v41 = vadd.f32 %v3876_v60, %v5310_v18  ;;  %v2744_v15 = vadd.f32 %v5315_v39, %v2743_v53  ;;  %v2498_v5 = vpop.f32.mrb[167].mxu1  ;;  %v3924_v44 = vpop.f32.mrb[166].mxu0  ;;  %2898 = vmax.xlane.f32.xlu0 %v5438_v12 }
 0x392   :  { %2810 = vst [vmem:[#allocation2 + $0x288] sm:$0xff] %v5441_v10  ;;  %2844 = vst [vmem:[#allocation2 + $0x2d8] sm:$0xff] %v2752_v58  ;;  %v5452_v48 = vadd.f32 %v5310_v18, %v2498_v5  ;;  %v2755_v20 = vadd.f32 %v3924_v44, %v5315_v39  ;;  %v2746_v40 = vpop.f32.mrb[167].mxu0 }
 0x393   :  { %2813 = vst [vmem:[#allocation2 + $0x2e8] sm:$0xff] %v5446_v41  ;;  %2842 = vst [vmem:[#allocation2 + $0x298] sm:$0xff] %v2744_v15  ;;  %v2747_v23 = vadd.f32 %v5315_v39, %v2746_v40  ;;  %2900 = vmax.xlane.f32.xlu1 %v5446_v41 }
 0x394   :  { %2811 = vst [vmem:[#allocation2 + $0x2a8] sm:$0xff] %v5452_v48  ;;  %2845 = vst [vmem:[#allocation2 + $0x2f8] sm:$0xff] %v2755_v20 }
 0x395   :  { %2843 = vst [vmem:[#allocation2 + $0x2b8] sm:$0xff] %v2747_v23  ;;  %2894 = vmax.xlane.f32.xlu0 %v5441_v10 }
 0x397   :  { %2896 = vmax.xlane.f32.xlu1 %v5452_v48 }
 0x39e   :  { %v3879_v34 = vpop.f32.mrb[168].mxu1 }
 0x39f   :  { %v5462_v31 = vadd.f32 %v3879_v34, %v5310_v18  ;;  %v2511_v25 = vpop.f32.mrb[169].mxu1  ;;  %v3927_v51 = vpop.f32.mrb[168].mxu0 }
 0x3a0   :  { %v5465_v3 = vadd.f32 %v5310_v18, %v2511_v25  ;;  %v2768_v16 = vadd.f32 %v3927_v51, %v5315_v39  ;;  %v3880_v38 = vpop.f32.mrb[170].mxu1  ;;  %v2759_v29 = vpop.f32.mrb[169].mxu0 }
 0x3a1   :  { %2816 = vst [vmem:[#allocation2 + $0x348] sm:$0xff] %v5462_v31  ;;  %v5470_v28 = vadd.f32 %v3880_v38, %v5310_v18  ;;  %v2760_v42 = vadd.f32 %v5315_v39, %v2759_v29  ;;  %v2514_v37 = vpop.f32.mrb[171].mxu1  ;;  %v3928_v17 = vpop.f32.mrb[170].mxu0  ;;  %2906 = vmax.xlane.f32.xlu0 %v5462_v31 }
 0x3a2   :  { %2814 = vst [vmem:[#allocation2 + $0x308] sm:$0xff] %v5465_v3  ;;  %2848 = vst [vmem:[#allocation2 + $0x358] sm:$0xff] %v2768_v16  ;;  %v5476_v45 = vadd.f32 %v5310_v18, %v2514_v37  ;;  %v2771_v21 = vadd.f32 %v3928_v17, %v5315_v39  ;;  %v2762_v33 = vpop.f32.mrb[171].mxu0 }
 0x3a3   :  { %2817 = vst [vmem:[#allocation2 + $0x368] sm:$0xff] %v5470_v28  ;;  %2846 = vst [vmem:[#allocation2 + $0x318] sm:$0xff] %v2760_v42  ;;  %v2763_v22 = vadd.f32 %v5315_v39, %v2762_v33  ;;  %2908 = vmax.xlane.f32.xlu1 %v5470_v28 }
 0x3a4   :  { %2815 = vst [vmem:[#allocation2 + $0x328] sm:$0xff] %v5476_v45  ;;  %2849 = vst [vmem:[#allocation2 + $0x378] sm:$0xff] %v2771_v21 }
 0x3a5   :  { %2847 = vst [vmem:[#allocation2 + $0x338] sm:$0xff] %v2763_v22  ;;  %2902 = vmax.xlane.f32.xlu0 %v5465_v3 }
 0x3a7   :  { %2904 = vmax.xlane.f32.xlu1 %v5476_v45 }
 0x3ae   :  { %v3883_v47 = vpop.f32.mrb[172].mxu1 }
 0x3af   :  { %v5486_v2 = vadd.f32 %v3883_v47, %v5310_v18  ;;  %v2527_v30 = vpop.f32.mrb[173].mxu1  ;;  %v3931_v55 = vpop.f32.mrb[172].mxu0 }
 0x3b0   :  { %v5489_v11 = vadd.f32 %v5310_v18, %v2527_v30  ;;  %v2784_v9 = vadd.f32 %v3931_v55, %v5315_v39  ;;  %v3884_v14 = vpop.f32.mrb[174].mxu1  ;;  %v2775_v26 = vpop.f32.mrb[173].mxu0 }
 0x3b1   :  { %2820 = vst [vmem:[#allocation2 + $0x3c8] sm:$0xff] %v5486_v2  ;;  %v5494_v50 = vadd.f32 %v3884_v14, %v5310_v18  ;;  %v2776_v52 = vadd.f32 %v5315_v39, %v2775_v26  ;;  %v2530_v61 = vpop.f32.mrb[175].mxu1  ;;  %v3932_v1 = vpop.f32.mrb[174].mxu0 }
 0x3b2   :  { %2818 = vst [vmem:[#allocation2 + $0x388] sm:$0xff] %v5489_v11  ;;  %2852 = vst [vmem:[#allocation2 + $0x3d8] sm:$0xff] %v2784_v9  ;;  %v5499_v57 = vadd.f32 %v5310_v18, %v2530_v61  ;;  %v2787_v58 = vadd.f32 %v3932_v1, %v5315_v39  ;;  %v2778_v60 = vpop.f32.mrb[175].mxu0  ;;  %2910 = vmax.xlane.f32.xlu0 %v5489_v11 }
 0x3b3   :  { %2821 = vst [vmem:[#allocation2 + $0x3e8] sm:$0xff] %v5494_v50  ;;  %2850 = vst [vmem:[#allocation2 + $0x398] sm:$0xff] %v2776_v52  ;;  %v2779_v53 = vadd.f32 %v5315_v39, %v2778_v60 }
 0x3b4   :  { %2819 = vst [vmem:[#allocation2 + $0x3a8] sm:$0xff] %v5499_v57  ;;  %2853 = vst [vmem:[#allocation2 + $0x3f8] sm:$0xff] %v2787_v58  ;;  %2912 = vmax.xlane.f32.xlu1 %v5499_v57 }
 0x3b5   :  { %2851 = vst [vmem:[#allocation2 + $0x3b8] sm:$0xff] %v2779_v53 }
 0x3b6   :  { %2914 = vmax.xlane.f32.xlu0 %v5486_v2 }
 0x3b8   :  { %2916 = vmax.xlane.f32.xlu1 %v5494_v50 }
 0x3ce   :  { %v2859_v18 = vpop.xlane.xlu1 %2858 }
 0x3cf   :  { %v2920_v15 = vsub.f32 %v5318_v6, %v2859_v18  ;;  %v2855_v5 = vpop.xlane.xlu0 %2854 }
 0x3d0   :  { %v2918_v44 = vsub.f32 %v5321_v43, %v2855_v5 }
 0x3d1   :  { %v2954_v20 = vmul.f32 1.442695, %v2920_v15 }
 0x3d2   :  { %v2950_v40 = vmul.f32 1.442695, %v2918_v44  ;;  %v2861_v23 = vpop.xlane.xlu1 %2860 }
 0x3d3   :  { %4190 = vpow2.f32 %v2954_v20  ;;  %v2921_v39 = vsub.f32 %v5326_v19, %v2861_v23  ;;  %v2857_v34 = vpop.xlane.xlu0 %2856 }
 0x3d4   :  { %v2919_v25 = vsub.f32 %v5333_v27, %v2857_v34  ;;  %4192 = vpow2.f32 %v2950_v40 }
 0x3d5   :  { %v2956_v51 = vmul.f32 1.442695, %v2921_v39 }
 0x3d6   :  { %v2952_v16 = vmul.f32 1.442695, %v2919_v25 }
 0x3d7   :  { %4194 = vpow2.f32 %v2956_v51 }
 0x3d8   :  { %4196 = vpow2.f32 %v2952_v16 }
 0x3dd   :  { %v5513_v38 = vpop.eup %4190 }
 0x3de   :  { %3018 = vadd.xlane.f32.xlu0 %v5513_v38  ;;  %v2867_v6 = vpop.xlane.xlu0 %2866  ;;  %v5517_v29 = vpop.eup %4192 }
 0x3df   :  { %v2924_v43 = vsub.f32 %v5342_v36, %v2867_v6 }
 0x3e0   :  { %v2869_v42 = vpop.xlane.xlu1 %2868 }
 0x3e1   :  { %v5519_v37 = vpop.eup %4194  ;;  %v2962_v19 = vmul.f32 1.442695, %v2924_v43  ;;  %v2925_v27 = vsub.f32 %v5350_v8, %v2869_v42 }
 0x3e2   :  { %3020 = vadd.xlane.f32.xlu1 %v5519_v37  ;;  %3014 = vadd.xlane.f32.xlu0 %v5517_v29  ;;  %v2863_v17 = vpop.xlane.xlu0 %2862  ;;  %v5525_v47 = vpop.eup %4196 }
 0x3e3   :  { %4198 = vpow2.f32 %v2962_v19  ;;  %v2964_v21 = vmul.f32 1.442695, %v2925_v27  ;;  %v2922_v33 = vsub.f32 %v5345_v54, %v2863_v17 }
 0x3e4   :  { %v2865_v22 = vpop.xlane.xlu1 %2864 }
 0x3e5   :  { %4200 = vpow2.f32 %v2964_v21  ;;  %v2958_v36 = vmul.f32 1.442695, %v2922_v33  ;;  %v2923_v30 = vsub.f32 %v5356_v46, %v2865_v22 }
 0x3e6   :  { %3016 = vadd.xlane.f32.xlu1 %v5525_v47 }
 0x3e7   :  { %4202 = vpow2.f32 %v2958_v36  ;;  %v2960_v8 = vmul.f32 1.442695, %v2923_v30 }
 0x3e9   :  { %4204 = vpow2.f32 %v2960_v8 }
 0x3ed   :  { %v5529_v55 = vpop.eup %4198 }
 0x3ee   :  { %3026 = vadd.xlane.f32.xlu0 %v5529_v55  ;;  %v2875_v9 = vpop.xlane.xlu0 %2874 }
 0x3ef   :  { %v5532_v14 = vpop.eup %4200  ;;  %v2928_v54 = vsub.f32 %v5366_v4, %v2875_v9 }
 0x3f0   :  { %v2877_v26 = vpop.xlane.xlu1 %2876  ;;  %3028 = vadd.xlane.f32.xlu1 %v5532_v14 }
 0x3f1   :  { %v5536_v52 = vpop.eup %4202  ;;  %v2970_v46 = vmul.f32 1.442695, %v2928_v54  ;;  %v2929_v61 = vsub.f32 %v5374_v63, %v2877_v26 }
 0x3f2   :  { %3022 = vadd.xlane.f32.xlu0 %v5536_v52  ;;  %v2871_v1 = vpop.xlane.xlu0 %2870 }
 0x3f3   :  { %v5540_v58 = vpop.eup %4204  ;;  %4206 = vpow2.f32 %v2970_v46  ;;  %v2972_v60 = vmul.f32 1.442695, %v2929_v61  ;;  %v2926_v53 = vsub.f32 %v5369_v13, %v2871_v1 }
 0x3f4   :  { %v2873_v18 = vpop.xlane.xlu1 %2872  ;;  %3024 = vadd.xlane.f32.xlu1 %v5540_v58 }
 0x3f5   :  { %4208 = vpow2.f32 %v2972_v60  ;;  %v2966_v4 = vmul.f32 1.442695, %v2926_v53  ;;  %v2927_v15 = vsub.f32 %v5380_v35, %v2873_v18 }
 0x3f7   :  { %4210 = vpow2.f32 %v2966_v4  ;;  %v2968_v5 = vmul.f32 1.442695, %v2927_v15 }
 0x3f9   :  { %4212 = vpow2.f32 %v2968_v5 }
 0x3fd   :  { %v5545_v63 = vpop.eup %4206 }
 0x3fe   :  { %3034 = vadd.xlane.f32.xlu0 %v5545_v63  ;;  %v2883_v44 = vpop.xlane.xlu0 %2882 }
 0x3ff   :  { %v5548_v20 = vpop.eup %4208  ;;  %v2932_v40 = vsub.f32 %v5390_v24, %v2883_v44 }
 0x400   :  { %v2885_v13 = vpop.xlane.xlu1 %2884  ;;  %3036 = vadd.xlane.f32.xlu1 %v5548_v20 }
 0x401   :  { %v5552_v23 = vpop.eup %4210  ;;  %v2978_v39 = vmul.f32 1.442695, %v2932_v40  ;;  %v2933_v35 = vsub.f32 %v5398_v59, %v2885_v13 }
 0x402   :  { %3030 = vadd.xlane.f32.xlu0 %v5552_v23  ;;  %v2879_v34 = vpop.xlane.xlu0 %2878 }
 0x403   :  { %v5556_v25 = vpop.eup %4212  ;;  %4214 = vpow2.f32 %v2978_v39  ;;  %v2980_v51 = vmul.f32 1.442695, %v2933_v35  ;;  %v2930_v16 = vsub.f32 %v5393_v7, %v2879_v34 }
 0x404   :  { %v2881_v6 = vpop.xlane.xlu1 %2880  ;;  %3032 = vadd.xlane.f32.xlu1 %v5556_v25 }
 0x405   :  { %4216 = vpow2.f32 %v2980_v51  ;;  %v2974_v24 = vmul.f32 1.442695, %v2930_v16  ;;  %v2931_v43 = vsub.f32 %v5404_v56, %v2881_v6 }
 0x407   :  { %4218 = vpow2.f32 %v2974_v24  ;;  %v2976_v42 = vmul.f32 1.442695, %v2931_v43 }
 0x409   :  { %4220 = vpow2.f32 %v2976_v42 }
 0x40d   :  { %v5561_v59 = vpop.eup %4214 }
 0x40e   :  { %3042 = vadd.xlane.f32.xlu0 %v5561_v59  ;;  %v2891_v19 = vpop.xlane.xlu0 %2890 }
 0x40f   :  { %v5564_v27 = vpop.eup %4216  ;;  %v2936_v17 = vsub.f32 %v5414_v62, %v2891_v19 }
 0x410   :  { %v2893_v7 = vpop.xlane.xlu1 %2892  ;;  %3044 = vadd.xlane.f32.xlu1 %v5564_v27 }
 0x411   :  { %v5568_v21 = vpop.eup %4218  ;;  %v2986_v33 = vmul.f32 1.442695, %v2936_v17  ;;  %v2937_v56 = vsub.f32 %v5422_v32, %v2893_v7 }
 0x412   :  { %3038 = vadd.xlane.f32.xlu0 %v5568_v21  ;;  %v2887_v22 = vpop.xlane.xlu0 %2886 }
 0x413   :  { %v5572_v36 = vpop.eup %4220  ;;  %4222 = vpow2.f32 %v2986_v33  ;;  %v2988_v30 = vmul.f32 1.442695, %v2937_v56  ;;  %v2934_v8 = vsub.f32 %v5417_v49, %v2887_v22 }
 0x414   :  { %v2889_v9 = vpop.xlane.xlu1 %2888  ;;  %3040 = vadd.xlane.f32.xlu1 %v5572_v36 }
 0x415   :  { %4224 = vpow2.f32 %v2988_v30  ;;  %v2982_v62 = vmul.f32 1.442695, %v2934_v8  ;;  %v2935_v54 = vsub.f32 %v5428_v0, %v2889_v9 }
 0x417   :  { %4226 = vpow2.f32 %v2982_v62  ;;  %v2984_v26 = vmul.f32 1.442695, %v2935_v54 }
 0x419   :  { %4228 = vpow2.f32 %v2984_v26 }
 0x41d   :  { %v5577_v32 = vpop.eup %4222 }
 0x41e   :  { %3050 = vadd.xlane.f32.xlu0 %v5577_v32  ;;  %v2899_v46 = vpop.xlane.xlu0 %2898 }
 0x41f   :  { %v5580_v61 = vpop.eup %4224  ;;  %v2940_v1 = vsub.f32 %v5438_v12, %v2899_v46 }
 0x420   :  { %v2901_v49 = vpop.xlane.xlu1 %2900  ;;  %3052 = vadd.xlane.f32.xlu1 %v5580_v61 }
 0x421   :  { %v5584_v60 = vpop.eup %4226  ;;  %v2994_v53 = vmul.f32 1.442695, %v2940_v1  ;;  %v2941_v0 = vsub.f32 %v5446_v41, %v2901_v49 }
 0x422   :  { %3046 = vadd.xlane.f32.xlu0 %v5584_v60  ;;  %v2895_v18 = vpop.xlane.xlu0 %2894 }
 0x423   :  { %v5588_v4 = vpop.eup %4228  ;;  %4230 = vpow2.f32 %v2994_v53  ;;  %v2996_v15 = vmul.f32 1.442695, %v2941_v0  ;;  %v2938_v5 = vsub.f32 %v5441_v10, %v2895_v18 }
 0x424   :  { %v2897_v44 = vpop.xlane.xlu1 %2896  ;;  %3048 = vadd.xlane.f32.xlu1 %v5588_v4 }
 0x425   :  { %4232 = vpow2.f32 %v2996_v15  ;;  %v2990_v12 = vmul.f32 1.442695, %v2938_v5  ;;  %v2939_v40 = vsub.f32 %v5452_v48, %v2897_v44 }
 0x427   :  { %4234 = vpow2.f32 %v2990_v12  ;;  %v2992_v13 = vmul.f32 1.442695, %v2939_v40 }
 0x429   :  { %4236 = vpow2.f32 %v2992_v13 }
 0x42d   :  { %v5593_v41 = vpop.eup %4230 }
 0x42e   :  { %3058 = vadd.xlane.f32.xlu0 %v5593_v41  ;;  %v2907_v39 = vpop.xlane.xlu0 %2906 }
 0x42f   :  { %v5596_v35 = vpop.eup %4232  ;;  %v2944_v34 = vsub.f32 %v5462_v31, %v2907_v39 }
 0x430   :  { %v2909_v10 = vpop.xlane.xlu1 %2908  ;;  %3060 = vadd.xlane.f32.xlu1 %v5596_v35 }
 0x431   :  { %v5600_v51 = vpop.eup %4234  ;;  %v3002_v16 = vmul.f32 1.442695, %v2944_v34  ;;  %v2945_v48 = vsub.f32 %v5470_v28, %v2909_v10 }
 0x432   :  { %3054 = vadd.xlane.f32.xlu0 %v5600_v51  ;;  %v2903_v6 = vpop.xlane.xlu0 %2902 }
 0x433   :  { %v5604_v24 = vpop.eup %4236  ;;  %4238 = vpow2.f32 %v3002_v16  ;;  %v3004_v43 = vmul.f32 1.442695, %v2945_v48  ;;  %v2942_v42 = vsub.f32 %v5465_v3, %v2903_v6 }
 0x434   :  { %v2905_v19 = vpop.xlane.xlu1 %2904  ;;  %3056 = vadd.xlane.f32.xlu1 %v5604_v24 }
 0x435   :  { %4240 = vpow2.f32 %v3004_v43  ;;  %v2998_v31 = vmul.f32 1.442695, %v2942_v42  ;;  %v2943_v17 = vsub.f32 %v5476_v45, %v2905_v19 }
 0x437   :  { %4242 = vpow2.f32 %v2998_v31  ;;  %v3000_v7 = vmul.f32 1.442695, %v2943_v17 }
 0x439   :  { %4244 = vpow2.f32 %v3000_v7 }
 0x43d   :  { %v5609_v28 = vpop.eup %4238 }
 0x43e   :  { %3066 = vadd.xlane.f32.xlu0 %v5609_v28 }
 0x43f   :  { %v5612_v33 = vpop.eup %4240  ;;  %v2911_v56 = vpop.xlane.xlu0 %2910 }
 0x440   :  { %v2946_v22 = vsub.f32 %v5489_v11, %v2911_v56  ;;  %3068 = vadd.xlane.f32.xlu1 %v5612_v33 }
 0x441   :  { %v5616_v3 = vpop.eup %4242  ;;  %v2913_v30 = vpop.xlane.xlu1 %2912 }
 0x442   :  { %v3006_v8 = vmul.f32 1.442695, %v2946_v22  ;;  %v2947_v45 = vsub.f32 %v5499_v57, %v2913_v30  ;;  %3062 = vadd.xlane.f32.xlu0 %v5616_v3 }
 0x443   :  { %v5620_v9 = vpop.eup %4244  ;;  %v2915_v62 = vpop.xlane.xlu0 %2914 }
 0x444   :  { %4246 = vpow2.f32 %v3006_v8  ;;  %v3008_v54 = vmul.f32 1.442695, %v2947_v45  ;;  %v2948_v26 = vsub.f32 %v5486_v2, %v2915_v62  ;;  %3064 = vadd.xlane.f32.xlu1 %v5620_v9 }
 0x445   :  { %v2917_v11 = vpop.xlane.xlu1 %2916 }
 0x446   :  { %4248 = vpow2.f32 %v3008_v54  ;;  %v3010_v46 = vmul.f32 1.442695, %v2948_v26  ;;  %v2949_v1 = vsub.f32 %v5494_v50, %v2917_v11 }
 0x448   :  { %4250 = vpow2.f32 %v3010_v46  ;;  %v3012_v49 = vmul.f32 1.442695, %v2949_v1 }
 0x44a   :  { %4252 = vpow2.f32 %v3012_v49 }
 0x44e   :  { %v5625_v57 = vpop.eup %4246 }
 0x44f   :  { %3070 = vadd.xlane.f32.xlu0 %v5625_v57 }
 0x450   :  { %v5628_v53 = vpop.eup %4248 }
 0x451   :  { %3072 = vadd.xlane.f32.xlu1 %v5628_v53 }
 0x452   :  { %v5631_v0 = vpop.eup %4250 }
 0x453   :  { %3074 = vadd.xlane.f32.xlu0 %v5631_v0 }
 0x454   :  { %v5634_v2 = vpop.eup %4252 }
 0x455   :  { %3076 = vadd.xlane.f32.xlu1 %v5634_v2 }
 0x46b   :  { %v3019_v50 = vpop.xlane.xlu0 %3018 }
 0x46c   :  { %4254 = vrcp.f32 %v3019_v50 }
 0x46f   :  { %v3021_v18 = vpop.xlane.xlu1 %3020  ;;  %v3015_v15 = vpop.xlane.xlu0 %3014 }
 0x470   :  { %4256 = vrcp.f32 %v3021_v18 }
 0x471   :  { %4258 = vrcp.f32 %v3015_v15 }
 0x473   :  { %v3017_v5 = vpop.xlane.xlu1 %3016 }
 0x474   :  { %4260 = vrcp.f32 %v3017_v5 }
 0x476   :  { %v4255_v44 = vpop.eup %4254 }
 0x477   :  { %v3112_v12 = vmul.f32 %v4255_v44, %v5513_v38 }
 0x479   :  { %3144 = vst [vmem:[#allocation2 + $0x50] sm:$0xff] %v3112_v12 }
 0x47a   :  { %v4257_v40 = vpop.eup %4256 }
 0x47b   :  { %v4259_v13 = vpop.eup %4258  ;;  %v3113_v39 = vmul.f32 %v4257_v40, %v5519_v37  ;;  %v3027_v34 = vpop.xlane.xlu0 %3026 }
 0x47c   :  { %v3110_v10 = vmul.f32 %v4259_v13, %v5517_v29  ;;  %4262 = vrcp.f32 %v3027_v34 }
 0x47d   :  { %3145 = vst [vmem:[#allocation2 + $0x70] sm:$0xff] %v3113_v39  ;;  %v3029_v16 = vpop.xlane.xlu1 %3028 }
 0x47e   :  { %v4261_v48 = vpop.eup %4260  ;;  %3142 = vst [vmem:[#allocation2 + $0x10] sm:$0xff] %v3110_v10  ;;  %4264 = vrcp.f32 %v3029_v16 }
 0x47f   :  { %v3111_v6 = vmul.f32 %v4261_v48, %v5525_v47  ;;  %v3023_v43 = vpop.xlane.xlu0 %3022 }
 0x480   :  { %4266 = vrcp.f32 %v3023_v43 }
 0x481   :  { %3143 = vst [vmem:[#allocation2 + $0x30] sm:$0xff] %v3111_v6  ;;  %v3025_v38 = vpop.xlane.xlu1 %3024 }
 0x482   :  { %4268 = vrcp.f32 %v3025_v38 }
 0x486   :  { %v4263_v42 = vpop.eup %4262 }
 0x487   :  { %v3116_v19 = vmul.f32 %v4263_v42, %v5529_v55 }
 0x488   :  { %v4265_v37 = vpop.eup %4264 }
 0x489   :  { %3148 = vst [vmem:[#allocation2 + $0xd0] sm:$0xff] %v3116_v19  ;;  %v3117_v29 = vmul.f32 %v4265_v37, %v5532_v14 }
 0x48a   :  { %v4267_v31 = vpop.eup %4266 }
 0x48b   :  { %3149 = vst [vmem:[#allocation2 + $0xf0] sm:$0xff] %v3117_v29  ;;  %v3114_v17 = vmul.f32 %v4267_v31, %v5536_v52  ;;  %v3035_v7 = vpop.xlane.xlu0 %3034 }
 0x48c   :  { %v4269_v56 = vpop.eup %4268  ;;  %4270 = vrcp.f32 %v3035_v7 }
 0x48d   :  { %3146 = vst [vmem:[#allocation2 + $0x90] sm:$0xff] %v3114_v17  ;;  %v3115_v47 = vmul.f32 %v4269_v56, %v5540_v58  ;;  %v3037_v22 = vpop.xlane.xlu1 %3036 }
 0x48e   :  { %4272 = vrcp.f32 %v3037_v22 }
 0x48f   :  { %3147 = vst [vmem:[#allocation2 + $0xb0] sm:$0xff] %v3115_v47  ;;  %v3031_v30 = vpop.xlane.xlu0 %3030 }
 0x490   :  { %4274 = vrcp.f32 %v3031_v30 }
 0x491   :  { %v3033_v55 = vpop.xlane.xlu1 %3032 }
 0x492   :  { %4276 = vrcp.f32 %v3033_v55 }
 0x496   :  { %v4271_v8 = vpop.eup %4270 }
 0x497   :  { %v3120_v14 = vmul.f32 %v4271_v8, %v5545_v63 }
 0x498   :  { %v4273_v45 = vpop.eup %4272 }
 0x499   :  { %3152 = vst [vmem:[#allocation2 + $0x150] sm:$0xff] %v3120_v14  ;;  %v3121_v52 = vmul.f32 %v4273_v45, %v5548_v20 }
 0x49a   :  { %v4275_v62 = vpop.eup %4274 }
 0x49b   :  { %3153 = vst [vmem:[#allocation2 + $0x170] sm:$0xff] %v3121_v52  ;;  %v3118_v54 = vmul.f32 %v4275_v62, %v5552_v23  ;;  %v3043_v26 = vpop.xlane.xlu0 %3042 }
 0x49c   :  { %v4277_v58 = vpop.eup %4276  ;;  %4278 = vrcp.f32 %v3043_v26 }
 0x49d   :  { %3150 = vst [vmem:[#allocation2 + $0x110] sm:$0xff] %v3118_v54  ;;  %v3119_v11 = vmul.f32 %v4277_v58, %v5556_v25  ;;  %v3045_v46 = vpop.xlane.xlu1 %3044 }
 0x49e   :  { %4280 = vrcp.f32 %v3045_v46 }
 0x49f   :  { %3151 = vst [vmem:[#allocation2 + $0x130] sm:$0xff] %v3119_v11  ;;  %v3039_v1 = vpop.xlane.xlu0 %3038 }
 0x4a0   :  { %4282 = vrcp.f32 %v3039_v1 }
 0x4a1   :  { %v3041_v63 = vpop.xlane.xlu1 %3040 }
 0x4a2   :  { %4284 = vrcp.f32 %v3041_v63 }
 0x4a6   :  { %v4279_v49 = vpop.eup %4278 }
 0x4a7   :  { %v3124_v20 = vmul.f32 %v4279_v49, %v5561_v59 }
 0x4a8   :  { %v4281_v50 = vpop.eup %4280 }
 0x4a9   :  { %3156 = vst [vmem:[#allocation2 + $0x1d0] sm:$0xff] %v3124_v20  ;;  %v3125_v23 = vmul.f32 %v4281_v50, %v5564_v27 }
 0x4aa   :  { %v4283_v18 = vpop.eup %4282 }
 0x4ab   :  { %3157 = vst [vmem:[#allocation2 + $0x1f0] sm:$0xff] %v3125_v23  ;;  %v3122_v15 = vmul.f32 %v4283_v18, %v5568_v21  ;;  %v3051_v5 = vpop.xlane.xlu0 %3050 }
 0x4ac   :  { %v4285_v25 = vpop.eup %4284  ;;  %4286 = vrcp.f32 %v3051_v5 }
 0x4ad   :  { %3154 = vst [vmem:[#allocation2 + $0x190] sm:$0xff] %v3122_v15  ;;  %v3123_v44 = vmul.f32 %v4285_v25, %v5572_v36  ;;  %v3053_v12 = vpop.xlane.xlu1 %3052 }
 0x4ae   :  { %4288 = vrcp.f32 %v3053_v12 }
 0x4af   :  { %3155 = vst [vmem:[#allocation2 + $0x1b0] sm:$0xff] %v3123_v44  ;;  %v3047_v40 = vpop.xlane.xlu0 %3046 }
 0x4b0   :  { %4290 = vrcp.f32 %v3047_v40 }
 0x4b1   :  { %v3049_v59 = vpop.xlane.xlu1 %3048 }
 0x4b2   :  { %4292 = vrcp.f32 %v3049_v59 }
 0x4b6   :  { %v4287_v13 = vpop.eup %4286 }
 0x4b7   :  { %v3128_v27 = vmul.f32 %v4287_v13, %v5577_v32 }
 0x4b8   :  { %v4289_v39 = vpop.eup %4288 }
 0x4b9   :  { %3160 = vst [vmem:[#allocation2 + $0x250] sm:$0xff] %v3128_v27  ;;  %v3129_v21 = vmul.f32 %v4289_v39, %v5580_v61 }
 0x4ba   :  { %v4291_v34 = vpop.eup %4290 }
 0x4bb   :  { %3161 = vst [vmem:[#allocation2 + $0x270] sm:$0xff] %v3129_v21  ;;  %v3126_v10 = vmul.f32 %v4291_v34, %v5584_v60  ;;  %v3059_v16 = vpop.xlane.xlu0 %3058 }
 0x4bc   :  { %v4293_v36 = vpop.eup %4292  ;;  %4294 = vrcp.f32 %v3059_v16 }
 0x4bd   :  { %3158 = vst [vmem:[#allocation2 + $0x210] sm:$0xff] %v3126_v10  ;;  %v3127_v48 = vmul.f32 %v4293_v36, %v5588_v4  ;;  %v3061_v6 = vpop.xlane.xlu1 %3060 }
 0x4be   :  { %4296 = vrcp.f32 %v3061_v6 }
 0x4bf   :  { %3159 = vst [vmem:[#allocation2 + $0x230] sm:$0xff] %v3127_v48  ;;  %v3055_v43 = vpop.xlane.xlu0 %3054 }
 0x4c0   :  { %4298 = vrcp.f32 %v3055_v43 }
 0x4c1   :  { %v3057_v32 = vpop.xlane.xlu1 %3056 }
 0x4c2   :  { %4300 = vrcp.f32 %v3057_v32 }
 0x4c6   :  { %v4295_v38 = vpop.eup %4294 }
 0x4c7   :  { %v3132_v61 = vmul.f32 %v4295_v38, %v5593_v41 }
 0x4c8   :  { %v4297_v42 = vpop.eup %4296 }
 0x4c9   :  { %3164 = vst [vmem:[#allocation2 + $0x2d0] sm:$0xff] %v3132_v61  ;;  %v3133_v60 = vmul.f32 %v4297_v42, %v5596_v35 }
 0x4ca   :  { %v4299_v19 = vpop.eup %4298 }
 0x4cb   :  { %3165 = vst [vmem:[#allocation2 + $0x2f0] sm:$0xff] %v3133_v60  ;;  %v3130_v37 = vmul.f32 %v4299_v19, %v5600_v51  ;;  %v3067_v29 = vpop.xlane.xlu0 %3066 }
 0x4cc   :  { %v4301_v4 = vpop.eup %4300  ;;  %4302 = vrcp.f32 %v3067_v29 }
 0x4cd   :  { %3162 = vst [vmem:[#allocation2 + $0x290] sm:$0xff] %v3130_v37  ;;  %v3131_v31 = vmul.f32 %v4301_v4, %v5604_v24  ;;  %v3069_v17 = vpop.xlane.xlu1 %3068 }
 0x4ce   :  { %4304 = vrcp.f32 %v3069_v17 }
 0x4cf   :  { %3163 = vst [vmem:[#allocation2 + $0x2b0] sm:$0xff] %v3131_v31  ;;  %v3063_v7 = vpop.xlane.xlu0 %3062 }
 0x4d0   :  { %4306 = vrcp.f32 %v3063_v7 }
 0x4d1   :  { %v3065_v41 = vpop.xlane.xlu1 %3064 }
 0x4d2   :  { %4308 = vrcp.f32 %v3065_v41 }
 0x4d6   :  { %v4303_v56 = vpop.eup %4302 }
 0x4d7   :  { %v3136_v35 = vmul.f32 %v4303_v56, %v5609_v28 }
 0x4d8   :  { %v4305_v47 = vpop.eup %4304 }
 0x4d9   :  { %3168 = vst [vmem:[#allocation2 + $0x350] sm:$0xff] %v3136_v35  ;;  %v3137_v51 = vmul.f32 %v4305_v47, %v5612_v33 }
 0x4da   :  { %v4307_v22 = vpop.eup %4306 }
 0x4db   :  { %3169 = vst [vmem:[#allocation2 + $0x370] sm:$0xff] %v3137_v51  ;;  %v3134_v30 = vmul.f32 %v4307_v22, %v5616_v3 }
 0x4dc   :  { %v4309_v55 = vpop.eup %4308  ;;  %v3071_v24 = vpop.xlane.xlu0 %3070 }
 0x4dd   :  { %3166 = vst [vmem:[#allocation2 + $0x310] sm:$0xff] %v3134_v30  ;;  %v3135_v8 = vmul.f32 %v4309_v55, %v5620_v9  ;;  %4310 = vrcp.f32 %v3071_v24 }
 0x4de   :  { %v3073_v14 = vpop.xlane.xlu1 %3072 }
 0x4df   :  { %3167 = vst [vmem:[#allocation2 + $0x330] sm:$0xff] %v3135_v8  ;;  %4312 = vrcp.f32 %v3073_v14 }
 0x4e0   :  { %v3075_v45 = vpop.xlane.xlu0 %3074 }
 0x4e1   :  { %4314 = vrcp.f32 %v3075_v45 }
 0x4e2   :  { %v3077_v28 = vpop.xlane.xlu1 %3076 }
 0x4e3   :  { %4316 = vrcp.f32 %v3077_v28 }
 0x4e7   :  { %v4311_v52 = vpop.eup %4310 }
 0x4e8   :  { %v3138_v33 = vmul.f32 %v4311_v52, %v5625_v57 }
 0x4e9   :  { %v4313_v62 = vpop.eup %4312 }
 0x4ea   :  { %3170 = vst [vmem:[#allocation2 + $0x390] sm:$0xff] %v3138_v33  ;;  %v3139_v3 = vmul.f32 %v4313_v62, %v5628_v53 }
 0x4eb   :  { %v4315_v54 = vpop.eup %4314 }
 0x4ec   :  { %3171 = vst [vmem:[#allocation2 + $0x3b0] sm:$0xff] %v3139_v3  ;;  %v3140_v9 = vmul.f32 %v4315_v54, %v5631_v0 }
 0x4ed   :  { %v4317_v26 = vpop.eup %4316 }
 0x4ee   :  { %3172 = vst [vmem:[#allocation2 + $0x3d0] sm:$0xff] %v3140_v9  ;;  %v3141_v58 = vmul.f32 %v4317_v26, %v5634_v2 }
 0x4f0   :  { %3173 = vst [vmem:[#allocation2 + $0x3f0] sm:$0xff] %v3141_v58 }
 0x4f1   :  { %4329 = shalt.err (!%p4326_p4)
}
 0x4f2   :  { %s4330_s24 = scalar_lea.hbm %s5690_s9, 16384 }
 0x4f3   :  { %p4331_p5 = scmp.ne.s32.totalorder %s5690_s9, %s4330_s24  ;;  %p4334_p6 = scmp.lt.u32.totalorder %s4330_s24, %s5690_s9 }
 0x4f5   :  { %p4336_p7 = pnand %p4334_p6, %p4331_p5 }
 0x4f7   :  { %4339 = shalt.err (!%p4336_p7)
}
 0x4f8   :  { %s4344_s28 = smov 512   ;;  %s4345_s29 = smov 32  }
 0x4f9   :  { %3185 = dma.vmem_to_hbm [thread:$0]  %s3180_s21, 16384, %s5690_s9, [#allocation3], %s4344_s28, %s4344_s28, %s4345_s29  }
 0x4fa   :  { %4340 = dma.done.wait [#allocation3], 16384  }
 0x4fb   :  { %4341 = vsyncadd [#allocation3], 4294950912 }
 0x4fc   :  { %3189 = vsyncpa [#allocation3], 1 }

</bundles_post_ra>
